<compile_context>
chip_gen: v6e
topology: v6e:2x2x1
jax: 0.10.0
libtpu: 0.0.40
codegen_flags: <defaults>
</compile_context>

<pallas_src>
import functools

import jax
import jax.numpy as jnp
import numpy as np
from jax import lax
from jax.experimental import pallas as pl
from jax.experimental.pallas import tpu as pltpu


# --------------------------------------------------------------------------
# helpers: tile picking + VMEM limits
# --------------------------------------------------------------------------
def _vmem_limit(est_bytes):
    """>= every gen's scoped default (32 MiB), 2x headroom over the estimate,
    and below v7x's 64 MiB physical VMEM."""
    return int(min(max(2 * est_bytes, 32 << 20), 56 << 20))


def _pick_hw_tile(hw, cin, cout, max_tile=8192, budget_bytes=10 << 20):
    """Largest lane-dense (multiple of 128) divisor of hw, <= max_tile, whose
    double-buffered block footprint fits budget_bytes (else full hw)."""
    def fits(t):
        return (2 * cin * t * 4 + cin * t * 2        # f32 input (dbl-buf) + bf16 cast
                + 2 * cout * t * 2 + cout * t * 4    # bf16 output (dbl-buf) + f32 acc
                ) <= budget_bytes
    if hw <= max_tile and fits(hw):
        return hw
    cap = (min(max_tile, hw) // 128) * 128
    for cand in range(cap, 0, -128):
        if hw % cand == 0 and fits(cand):
            return cand
    return hw


# --------------------------------------------------------------------------
# Kernel 1: pointwise (1x1) Conv2d  ==  (Cout, Cin) @ (Cin, T) + bias
# --------------------------------------------------------------------------
def _pointwise_conv_kernel(x_ref, w_ref, b_ref, o_ref):
    x = x_ref[0].astype(jnp.bfloat16)          # (Cin, T)
    w = w_ref[...]                             # (Cout, Cin) bf16
    acc = jnp.dot(w, x, preferred_element_type=jnp.float32) + b_ref[...]
    o_ref[0] = acc.astype(o_ref.dtype)


def pointwise_conv(x_flat, w_bf16, b, out_dtype=jnp.bfloat16, max_tile=8192):
    """x_flat: (B, Cin, HW), w_bf16: (Cout, Cin) bf16 -> (B, Cout, HW)."""
    B, Cin, HW = x_flat.shape
    Cout = w_bf16.shape[0]
    T = _pick_hw_tile(HW, Cin, Cout, max_tile=max_tile)
    est = (2 * Cin * T * 4 + Cin * T * 2 + 2 * Cout * T * 2 + Cout * T * 4
           + Cout * Cin * 2 + Cout * 4)
    return pl.pallas_call(
        _pointwise_conv_kernel,
        out_shape=jax.ShapeDtypeStruct((B, Cout, HW), out_dtype),
        grid=(B, HW // T),
        in_specs=[
            pl.BlockSpec((1, Cin, T), lambda b_, t: (b_, 0, t)),
            pl.BlockSpec((Cout, Cin), lambda b_, t: (0, 0)),
            pl.BlockSpec((Cout, 1), lambda b_, t: (0, 0)),
        ],
        out_specs=pl.BlockSpec((1, Cout, T), lambda b_, t: (b_, 0, t)),
        compiler_params=pltpu.CompilerParams(
            dimension_semantics=("parallel", "parallel"),
            vmem_limit_bytes=_vmem_limit(est)),
    )(x_flat, w_bf16, b.reshape(Cout, 1).astype(jnp.float32))


# --------------------------------------------------------------------------
# Kernel 2 (fused, per batch):
#   3x3 depthwise conv (padding=1) on the flattened (3C, HW) slab
#   -> block-diagonal all-head attention
#   -> project_out fused algebraically:  Wp @ (A @ v) == (Wp @ A) @ v
# --------------------------------------------------------------------------
def _fused_attn_kernel(qkv_ref, wdw_ref, bdw_ref, temp_ref, mask_ref,
                       wp_ref, bp_ref, o_ref, *, H, W, num_heads):
    x = qkv_ref[0].astype(jnp.float32)              # (3C, HW)  -- qkv 1x1-conv output
    wdw = wdw_ref[...]                              # (3C, 9) f32
    C3, HW = x.shape
    C = C3 // 3

    # ---- 3x3 depthwise conv: 9 taps = lane rotations + boundary masks ----
    # masks are hoisted out of the tap loops (computed once, reused).
    s = lax.broadcasted_iota(jnp.int32, (1, HW), 1)  # flattened spatial index
    col = s % W
    col_mask = {-1: col >= 1, 0: None, 1: col <= W - 2}
    row_mask = {-1: s >= W, 0: None, 1: s < (H - 1) * W}

    acc = jnp.zeros_like(x)
    for dj in (-1, 0, 1):                            # column (W) shift
        xc = x if dj == 0 else pltpu.roll(x, shift=(-dj) % HW, axis=1)
        if col_mask[dj] is not None:
            xc = jnp.where(col_mask[dj], xc, 0.0)
        for di in (-1, 0, 1):                        # row (H) shift = roll by W
            xs = xc if di == 0 else pltpu.roll(xc, shift=(-di * W) % HW, axis=1)
            if row_mask[di] is not None:
                xs = jnp.where(row_mask[di], xs, 0.0)
            tap = (di + 1) * 3 + (dj + 1)
            acc = acc + xs * wdw[:, tap:tap + 1]
    qkv_dw = acc + bdw_ref[...]                      # (3C, HW) f32, stays in VMEM

    q = qkv_dw[:C]                                   # (C, HW) f32
    k = qkv_dw[C:2 * C]
    v = qkv_dw[2 * C:]

    # ---- block-diagonal attention over ALL heads in one (C,C) matmul ----
    # F.normalize(dim=-1) + per-head temperature are applied as:
    #   * a rank-1 row scale  temp_h / ||q_i||  on the logits (no f32 qn copy)
    #   * ||k_j|| folded into k's bf16 MXU operand (no f32 kn copy kept)
    eps2 = 1e-24                                     # F.normalize eps=1e-12, squared
    q_ss = jnp.sum(q * q, axis=-1, keepdims=True)    # (C, 1) f32
    k_ss = jnp.sum(k * k, axis=-1, keepdims=True)
    row_scale = temp_ref[...] * lax.rsqrt(jnp.maximum(q_ss, eps2))
    k_inv = lax.rsqrt(jnp.maximum(k_ss, eps2))

    q_bf = q.astype(jnp.bfloat16)
    kn_bf = (k * k_inv).astype(jnp.bfloat16)
    logits = lax.dot_general(q_bf, kn_bf, (((1,), (1,)), ((), ())),
                             preferred_element_type=jnp.float32)      # (C, C)
    # head mask is additive (-1e30 off the per-head diagonal blocks), applied
    # BEFORE the row max / exp so there is no cross-head leakage in softmax.
    logits = logits * row_scale + mask_ref[...]

    m = jnp.max(logits, axis=-1, keepdims=True)
    e = jnp.exp(logits - m)                          # masked entries underflow to 0
    # NOTE: approx reciprocal (EUP) is fine at rtol=2e-2/atol=5e-3; switch to an
    # exact divide if tighter tolerances are ever required.
    attn = e * pl.reciprocal(jnp.sum(e, axis=-1, keepdims=True), approx=True)

    # ---- fused project_out: (Wp @ A) @ v  (A is exactly block-diagonal) ----
    w_fused = jnp.dot(wp_ref[...], attn, preferred_element_type=jnp.float32)  # (C,C)
    y = jnp.dot(w_fused.astype(jnp.bfloat16), v.astype(jnp.bfloat16),
                preferred_element_type=jnp.float32) + bp_ref[...]
    o_ref[0] = y.astype(o_ref.dtype)


def fused_dwconv_attention_project(qkv, w_dw9, b_dw, temp_vec, neg_mask,
                                   w_proj, b_proj, H, W, num_heads):
    """qkv: (B, 3C, HW) bf16 -> (B, C, HW) f32 (dwconv + attention + project_out)."""
    B, C3, HW = qkv.shape
    C = C3 // 3
    est = (2 * C3 * HW * 2          # double-buffered bf16 qkv input block
           + 2 * C * HW * 4         # double-buffered f32 output block
           + 6 * C3 * HW * 4        # f32 slab + rolled/masked temporaries + acc
           + 4 * C * HW * 2         # bf16 matmul operands
           + 16 * C * C * 4)        # logits / attn / head mask / fused proj weight
    kern = functools.partial(_fused_attn_kernel, H=H, W=W, num_heads=num_heads)
    return pl.pallas_call(
        kern,
        out_shape=jax.ShapeDtypeStruct((B, C, HW), jnp.float32),
        grid=(B,),
        in_specs=[
            pl.BlockSpec((1, C3, HW), lambda b: (b, 0, 0)),   # qkv (q|k|v channels)
            pl.BlockSpec((C3, 9), lambda b: (0, 0)),          # depthwise weights
            pl.BlockSpec((C3, 1), lambda b: (0, 0)),          # depthwise bias
            pl.BlockSpec((C, 1), lambda b: (0, 0)),           # per-channel temperature
            pl.BlockSpec((C, C), lambda b: (0, 0)),           # additive head-block mask
            pl.BlockSpec((C, C), lambda b: (0, 0)),           # project_out weight (f32)
            pl.BlockSpec((C, 1), lambda b: (0, 0)),           # project_out bias
        ],
        out_specs=pl.BlockSpec((1, C, HW), lambda b: (b, 0, 0)),
        compiler_params=pltpu.CompilerParams(
            dimension_semantics=("parallel",),
            vmem_limit_bytes=_vmem_limit(est)),
    )(qkv, w_dw9.astype(jnp.float32), b_dw.reshape(C3, 1).astype(jnp.float32),
      temp_vec, neg_mask, w_proj.astype(jnp.float32),
      b_proj.reshape(C, 1).astype(jnp.float32))


# --------------------------------------------------------------------------
# Full forward pass
# --------------------------------------------------------------------------
def attention_forward(x, params, num_heads):
    B, C, H, W = x.shape
    HW = H * W
    Ch = C // num_heads
    x_flat = x.reshape(B, C, HW)

    # 1) qkv = qkv(x)  (1x1 conv, bf16 intermediate in HBM)
    qkv = pointwise_conv(x_flat, params["w_qkv"].astype(jnp.bfloat16),
                         params["b_qkv"], out_dtype=jnp.bfloat16)       # (B, 3C, HW)

    # 2) fused: qkv_dwconv + block-diagonal attention + project_out
    temp_vec = jnp.repeat(params["temperature"], Ch).reshape(C, 1).astype(jnp.float32)
    head_id = jnp.arange(C) // Ch
    neg_mask = jnp.where(head_id[:, None] == head_id[None, :],
                         0.0, -1e30).astype(jnp.float32)                # (C, C)
    out = fused_dwconv_attention_project(
        qkv, params["w_dw"].reshape(3 * C, 9), params["b_dw"], temp_vec,
        neg_mask, params["w_proj"], params["b_proj"], H, W, num_heads)  # (B, C, HW)
    return out.reshape(B, C, H, W)


# --------------------------------------------------------------------------
# Pure-JAX reference (PyTorch module math; bf16 only where the kernels put bf16
# on the MXU / in HBM so the check stays tight).
# --------------------------------------------------------------------------
def attention_reference(x, params, num_heads):
    B, C, H, W = x.shape
    HW = H * W
    Ch = C // num_heads
    bf16 = jnp.bfloat16
    x_flat = x.reshape(B, C, HW)

    # 1x1 qkv conv
    qkv = jnp.einsum("oc,bcs->bos", params["w_qkv"].astype(bf16),
                     x_flat.astype(bf16), preferred_element_type=jnp.float32)
    qkv = (qkv + params["b_qkv"][None, :, None]).astype(bf16)

    # 3x3 depthwise conv, padding=1, f32 math
    q4 = qkv.reshape(B, 3 * C, H, W).astype(jnp.float32)
    xp = jnp.pad(q4, ((0, 0), (0, 0), (1, 1), (1, 1)))
    acc = jnp.zeros_like(q4)
    wdw = params["w_dw"]
    for di in (-1, 0, 1):
        for dj in (-1, 0, 1):
            acc = acc + (xp[:, :, 1 + di:1 + di + H, 1 + dj:1 + dj + W]
                         * wdw[None, :, di + 1, dj + 1, None, None])
    qkv_dw = acc + params["b_dw"][None, :, None, None]
    qkv_dw = qkv_dw.reshape(B, 3 * C, HW)

    q, k, v = jnp.split(qkv_dw, 3, axis=1)
    q = q.reshape(B, num_heads, Ch, HW)
    k = k.reshape(B, num_heads, Ch, HW)
    v = v.reshape(B, num_heads, Ch, HW)

    qn = q / jnp.maximum(jnp.linalg.norm(q, axis=-1, keepdims=True), 1e-12)
    kn = k / jnp.maximum(jnp.linalg.norm(k, axis=-1, keepdims=True), 1e-12)

    logits = jnp.einsum("bhcs,bhds->bhcd", qn.astype(bf16), kn.astype(bf16),
                        preferred_element_type=jnp.float32)
    logits = logits * params["temperature"][None, :, None, None]
    attn = jax.nn.softmax(logits, axis=-1)
    out = jnp.einsum("bhcd,bhds->bhcs", attn.astype(bf16), v.astype(bf16),
                     preferred_element_type=jnp.float32)
    out = out.reshape(B, C, HW)

    out = jnp.einsum("oc,bcs->bos", params["w_proj"].astype(bf16),
                     out.astype(bf16), preferred_element_type=jnp.float32)
    out = out + params["b_proj"][None, :, None]
    return out.reshape(B, C, H, W)


# --------------------------------------------------------------------------
def init_params(key, dim, num_heads):
    k1, k2, k3 = jax.random.split(key, 3)
    scale = 0.1
    return {
        # module init is ones(num_heads); use distinct values here so the
        # per-head temperature path is actually exercised by the check.
        "temperature": 1.0 + 0.25 * jnp.arange(num_heads, dtype=jnp.float32),
        "w_qkv": scale * jax.random.normal(k1, (3 * dim, dim), jnp.float32),
        "b_qkv": jnp.linspace(-0.1, 0.1, 3 * dim, dtype=jnp.float32),
        "w_dw": scale * jax.random.normal(k2, (3 * dim, 3, 3), jnp.float32),
        "b_dw": jnp.linspace(-0.05, 0.05, 3 * dim, dtype=jnp.float32),
        "w_proj": scale * jax.random.normal(k3, (dim, dim), jnp.float32),
        "b_proj": jnp.linspace(-0.02, 0.02, dim, dtype=jnp.float32),
    }


if __name__ == "__main__":
    dim, num_heads = 32, 4
    B, H, W = 2, 16, 16

    key = jax.random.PRNGKey(0)
    kx, kp = jax.random.split(key)
    x = jax.random.normal(kx, (B, dim, H, W), jnp.float32)
    params = init_params(kp, dim, num_heads)

    fwd = jax.jit(functools.partial(attention_forward, num_heads=num_heads))
    out = jax.block_until_ready(fwd(x, params))

    ref = jax.block_until_ready(attention_reference(x, params, num_heads))
    np.testing.assert_allclose(np.asarray(out), np.asarray(ref),
                               rtol=2e-2, atol=5e-3)

    print("KERNEL_OK")
</pallas_src>

<mosaic_0001>
module attributes {stable_mosaic.version = 11 : i64} {
  func.func @_pointwise_conv_kernel(%arg0: i32, %arg1: i32, %arg2: memref<1x32x256xf32, #tpu.memory_space<vmem>>, %arg3: memref<96x32xbf16, #tpu.memory_space<vmem>>, %arg4: memref<96x1xf32, #tpu.memory_space<vmem>>, %arg5: memref<1x96x256xbf16, #tpu.memory_space<vmem>>) attributes {dimension_semantics = [#tpu.dimension_semantics<parallel>, #tpu.dimension_semantics<parallel>], iteration_bounds = array<i64: 2, 1>, scalar_prefetch = 0 : i64, scratch_operands = 0 : i64, tpu.core_type = #tpu.core_type<tc>, window_params = [{transform_indices = @transform_0, window_bounds = array<i64: 1, 32, 256>}, {pipeline_mode = #tpu.pipeline_mode<synchronous>, transform_indices = @transform_1, window_bounds = array<i64: 96, 32>}, {pipeline_mode = #tpu.pipeline_mode<synchronous>, transform_indices = @transform_2, window_bounds = array<i64: 96, 1>}, {transform_indices = @transform_3, window_bounds = array<i64: 1, 96, 256>}]} {
    %c0 = arith.constant 0 : index
    %c0_0 = arith.constant 0 : index
    %c0_1 = arith.constant 0 : index
    %0 = vector.load %arg2[%c0, %c0_0, %c0_1] : memref<1x32x256xf32, #tpu.memory_space<vmem>>, vector<1x32x256xf32>
    %1 = vector.shape_cast %0 : vector<1x32x256xf32> to vector<32x256xf32>
    %2 = arith.truncf %1 : vector<32x256xf32> to vector<32x256xbf16>
    %c0_2 = arith.constant 0 : index
    %c0_3 = arith.constant 0 : index
    %3 = vector.load %arg3[%c0_2, %c0_3] : memref<96x32xbf16, #tpu.memory_space<vmem>>, vector<96x32xbf16>
    %cst = arith.constant dense<0.000000e+00> : vector<96x256xf32>
    %4 = tpu.matmul %3, %2, %cst {dimension_numbers = #tpu.dot_dimension_numbers<[1], [0], [0], [1], [0, 0, 1, 1], [], []>} : vector<96x32xbf16>, vector<32x256xbf16>, vector<96x256xf32> -> vector<96x256xf32>
    %c0_4 = arith.constant 0 : index
    %c0_5 = arith.constant 0 : index
    %5 = vector.load %arg4[%c0_4, %c0_5] : memref<96x1xf32, #tpu.memory_space<vmem>>, vector<96x1xf32>
    %6 = vector.broadcast %5 : vector<96x1xf32> to vector<96x256xf32>
    %7 = arith.addf %4, %6 : vector<96x256xf32>
    %8 = arith.truncf %7 : vector<96x256xf32> to vector<96x256xbf16>
    %c0_6 = arith.constant 0 : index
    %c0_7 = arith.constant 0 : index
    %c0_8 = arith.constant 0 : index
    %9 = vector.load %arg5[%c0_6, %c0_7, %c0_8] : memref<1x96x256xbf16, #tpu.memory_space<vmem>>, vector<1x96x256xbf16>
    %10 = vector.shape_cast %9 : vector<1x96x256xbf16> to vector<96x256xbf16>
    %11 = vector.shape_cast %8 : vector<96x256xbf16> to vector<1x96x256xbf16>
    tpu.vector_store %arg5[%c0_6, %c0_7, %c0_8], %11 {strides = array<i32>} : memref<1x96x256xbf16, #tpu.memory_space<vmem>>, vector<1x96x256xbf16>,
    return
  }
  func.func @transform_0(%arg0: i32, %arg1: i32) -> (i32, i32, i32) {
    %c0_i32 = arith.constant 0 : i32
    %c0_i32_0 = arith.constant 0 : i32
    return %arg0, %c0_i32, %arg1 : i32, i32, i32
  }
  func.func @transform_1(%arg0: i32, %arg1: i32) -> (i32, i32) {
    %c0_i32 = arith.constant 0 : i32
    %c0_i32_0 = arith.constant 0 : i32
    %c0_i32_1 = arith.constant 0 : i32
    return %c0_i32, %c0_i32_0 : i32, i32
  }
  func.func @transform_2(%arg0: i32, %arg1: i32) -> (i32, i32) {
    %c0_i32 = arith.constant 0 : i32
    %c0_i32_0 = arith.constant 0 : i32
    %c0_i32_1 = arith.constant 0 : i32
    return %c0_i32, %c0_i32_0 : i32, i32
  }
  func.func @transform_3(%arg0: i32, %arg1: i32) -> (i32, i32, i32) {
    %c0_i32 = arith.constant 0 : i32
    %c0_i32_0 = arith.constant 0 : i32
    return %arg0, %c0_i32, %arg1 : i32, i32, i32
  }
}

module attributes {stable_mosaic.version = 11 : i64} {
  func.func @_fused_attn_kernel(%arg0: i32, %arg1: memref<1x96x256xbf16, #tpu.memory_space<vmem>>, %arg2: memref<96x9xf32, #tpu.memory_space<vmem>>, %arg3: memref<96x1xf32, #tpu.memory_space<vmem>>, %arg4: memref<32x1xf32, #tpu.memory_space<vmem>>, %arg5: memref<32x32xf32, #tpu.memory_space<vmem>>, %arg6: memref<32x32xf32, #tpu.memory_space<vmem>>, %arg7: memref<32x1xf32, #tpu.memory_space<vmem>>, %arg8: memref<1x32x256xf32, #tpu.memory_space<vmem>>) attributes {dimension_semantics = [#tpu.dimension_semantics<parallel>], iteration_bounds = array<i64: 2>, scalar_prefetch = 0 : i64, scratch_operands = 0 : i64, tpu.core_type = #tpu.core_type<tc>, window_params = [{transform_indices = @transform_0, window_bounds = array<i64: 1, 96, 256>}, {pipeline_mode = #tpu.pipeline_mode<synchronous>, transform_indices = @transform_1, window_bounds = array<i64: 96, 9>}, {pipeline_mode = #tpu.pipeline_mode<synchronous>, transform_indices = @transform_2, window_bounds = array<i64: 96, 1>}, {pipeline_mode = #tpu.pipeline_mode<synchronous>, transform_indices = @transform_3, window_bounds = array<i64: 32, 1>}, {pipeline_mode = #tpu.pipeline_mode<synchronous>, transform_indices = @transform_4, window_bounds = array<i64: 32, 32>}, {pipeline_mode = #tpu.pipeline_mode<synchronous>, transform_indices = @transform_5, window_bounds = array<i64: 32, 32>}, {pipeline_mode = #tpu.pipeline_mode<synchronous>, transform_indices = @transform_6, window_bounds = array<i64: 32, 1>}, {transform_indices = @transform_7, window_bounds = array<i64: 1, 32, 256>}]} {
    %c0 = arith.constant 0 : index
    %c0_0 = arith.constant 0 : index
    %c0_1 = arith.constant 0 : index
    %0 = vector.load %arg1[%c0, %c0_0, %c0_1] : memref<1x96x256xbf16, #tpu.memory_space<vmem>>, vector<1x96x256xbf16>
    %1 = vector.shape_cast %0 : vector<1x96x256xbf16> to vector<96x256xbf16>
    %2 = arith.extf %1 : vector<96x256xbf16> to vector<96x256xf32>
    %c0_2 = arith.constant 0 : index
    %c0_3 = arith.constant 0 : index
    %3 = vector.load %arg2[%c0_2, %c0_3] : memref<96x9xf32, #tpu.memory_space<vmem>>, vector<96x9xf32>
    %4 = tpu.iota {dimensions = array<i32: 1>} : vector<1x256xi32>
    %c16_i32 = arith.constant 16 : i32
    %c0_i32 = arith.constant 0 : i32
    %5 = arith.cmpi eq, %c16_i32, %c0_i32 : i32
    %c1_i32 = arith.constant 1 : i32
    %6 = arith.select %5, %c1_i32, %c16_i32 : i32
    %7 = vector.broadcast %6 : i32 to vector<1x256xi32>
    %8 = arith.remsi %4, %7 : vector<1x256xi32>
    %c0_i32_4 = arith.constant 0 : i32
    %9 = vector.broadcast %c0_i32_4 : i32 to vector<1x256xi32>
    %10 = arith.cmpi ne, %8, %9 : vector<1x256xi32>
    %c0_i32_5 = arith.constant 0 : i32
    %11 = vector.broadcast %c0_i32_5 : i32 to vector<1x256xi32>
    %12 = arith.cmpi slt, %8, %11 : vector<1x256xi32>
    %c0_i32_6 = arith.constant 0 : i32
    %13 = arith.cmpi slt, %6, %c0_i32_6 : i32
    %14 = vector.broadcast %13 : i1 to vector<1x256xi1>
    %15 = vector.broadcast %14 : vector<1x256xi1> to vector<1x256xi1>
    %16 = arith.xori %12, %15 : vector<1x256xi1>
    %17 = arith.andi %16, %10 : vector<1x256xi1>
    %18 = vector.broadcast %6 : i32 to vector<1x256xi32>
    %19 = arith.addi %8, %18 : vector<1x256xi32>
    %20 = arith.select %17, %19, %8 : vector<1x256xi1>, vector<1x256xi32>
    %c1_i32_7 = arith.constant 1 : i32
    %21 = vector.broadcast %c1_i32_7 : i32 to vector<1x256xi32>
    %22 = arith.cmpi sge, %20, %21 : vector<1x256xi32>
    %c14_i32 = arith.constant 14 : i32
    %23 = vector.broadcast %c14_i32 : i32 to vector<1x256xi32>
    %24 = arith.cmpi sle, %20, %23 : vector<1x256xi32>
    %c16_i32_8 = arith.constant 16 : i32
    %25 = vector.broadcast %c16_i32_8 : i32 to vector<1x256xi32>
    %26 = arith.cmpi sge, %4, %25 : vector<1x256xi32>
    %c240_i32 = arith.constant 240 : i32
    %27 = vector.broadcast %c240_i32 : i32 to vector<1x256xi32>
    %28 = arith.cmpi slt, %4, %27 : vector<1x256xi32>
    %cst = arith.constant 0.000000e+00 : f32
    %29 = vector.broadcast %cst : f32 to vector<96x256xf32>
    %c1_i32_9 = arith.constant 1 : i32
    %30 = tpu.dynamic_rotate %2 by %c1_i32_9 dim 1 : vector<96x256xf32>, i32 -> vector<96x256xf32>
    %cst_10 = arith.constant 0.000000e+00 : f32
    %31 = vector.shape_cast %22 : vector<1x256xi1> to vector<1x256xi1>
    %32 = vector.broadcast %31 : vector<1x256xi1> to vector<96x256xi1>
    %33 = vector.broadcast %cst_10 : f32 to vector<96x256xf32>
    %34 = arith.select %32, %30, %33 : vector<96x256xi1>, vector<96x256xf32>
    %c16_i32_11 = arith.constant 16 : i32
    %35 = tpu.dynamic_rotate %34 by %c16_i32_11 dim 1 : vector<96x256xf32>, i32 -> vector<96x256xf32>
    %cst_12 = arith.constant 0.000000e+00 : f32
    %36 = vector.shape_cast %26 : vector<1x256xi1> to vector<1x256xi1>
    %37 = vector.broadcast %36 : vector<1x256xi1> to vector<96x256xi1>
    %38 = vector.broadcast %cst_12 : f32 to vector<96x256xf32>
    %39 = arith.select %37, %35, %38 : vector<96x256xi1>, vector<96x256xf32>
    %40 = vector.extract_strided_slice %3 {offsets = [0, 0], sizes = [96, 1], strides = [1, 1]} : vector<96x9xf32> to vector<96x1xf32>
    %41 = vector.broadcast %40 : vector<96x1xf32> to vector<96x256xf32>
    %42 = arith.mulf %39, %41 : vector<96x256xf32>
    %43 = arith.addf %29, %42 : vector<96x256xf32>
    %44 = vector.extract_strided_slice %3 {offsets = [0, 3], sizes = [96, 1], strides = [1, 1]} : vector<96x9xf32> to vector<96x1xf32>
    %45 = vector.broadcast %44 : vector<96x1xf32> to vector<96x256xf32>
    %46 = arith.mulf %34, %45 : vector<96x256xf32>
    %47 = arith.addf %43, %46 : vector<96x256xf32>
    %c240_i32_13 = arith.constant 240 : i32
    %48 = tpu.dynamic_rotate %34 by %c240_i32_13 dim 1 : vector<96x256xf32>, i32 -> vector<96x256xf32>
    %cst_14 = arith.constant 0.000000e+00 : f32
    %49 = vector.shape_cast %28 : vector<1x256xi1> to vector<1x256xi1>
    %50 = vector.broadcast %49 : vector<1x256xi1> to vector<96x256xi1>
    %51 = vector.broadcast %cst_14 : f32 to vector<96x256xf32>
    %52 = arith.select %50, %48, %51 : vector<96x256xi1>, vector<96x256xf32>
    %53 = vector.extract_strided_slice %3 {offsets = [0, 6], sizes = [96, 1], strides = [1, 1]} : vector<96x9xf32> to vector<96x1xf32>
    %54 = vector.broadcast %53 : vector<96x1xf32> to vector<96x256xf32>
    %55 = arith.mulf %52, %54 : vector<96x256xf32>
    %56 = arith.addf %47, %55 : vector<96x256xf32>
    %c16_i32_15 = arith.constant 16 : i32
    %57 = tpu.dynamic_rotate %2 by %c16_i32_15 dim 1 : vector<96x256xf32>, i32 -> vector<96x256xf32>
    %cst_16 = arith.constant 0.000000e+00 : f32
    %58 = vector.shape_cast %26 : vector<1x256xi1> to vector<1x256xi1>
    %59 = vector.broadcast %58 : vector<1x256xi1> to vector<96x256xi1>
    %60 = vector.broadcast %cst_16 : f32 to vector<96x256xf32>
    %61 = arith.select %59, %57, %60 : vector<96x256xi1>, vector<96x256xf32>
    %62 = vector.extract_strided_slice %3 {offsets = [0, 1], sizes = [96, 1], strides = [1, 1]} : vector<96x9xf32> to vector<96x1xf32>
    %63 = vector.broadcast %62 : vector<96x1xf32> to vector<96x256xf32>
    %64 = arith.mulf %61, %63 : vector<96x256xf32>
    %65 = arith.addf %56, %64 : vector<96x256xf32>
    %66 = vector.extract_strided_slice %3 {offsets = [0, 4], sizes = [96, 1], strides = [1, 1]} : vector<96x9xf32> to vector<96x1xf32>
    %67 = vector.broadcast %66 : vector<96x1xf32> to vector<96x256xf32>
    %68 = arith.mulf %2, %67 : vector<96x256xf32>
    %69 = arith.addf %65, %68 : vector<96x256xf32>
    %c240_i32_17 = arith.constant 240 : i32
    %70 = tpu.dynamic_rotate %2 by %c240_i32_17 dim 1 : vector<96x256xf32>, i32 -> vector<96x256xf32>
    %cst_18 = arith.constant 0.000000e+00 : f32
    %71 = vector.shape_cast %28 : vector<1x256xi1> to vector<1x256xi1>
    %72 = vector.broadcast %71 : vector<1x256xi1> to vector<96x256xi1>
    %73 = vector.broadcast %cst_18 : f32 to vector<96x256xf32>
    %74 = arith.select %72, %70, %73 : vector<96x256xi1>, vector<96x256xf32>
    %75 = vector.extract_strided_slice %3 {offsets = [0, 7], sizes = [96, 1], strides = [1, 1]} : vector<96x9xf32> to vector<96x1xf32>
    %76 = vector.broadcast %75 : vector<96x1xf32> to vector<96x256xf32>
    %77 = arith.mulf %74, %76 : vector<96x256xf32>
    %78 = arith.addf %69, %77 : vector<96x256xf32>
    %c255_i32 = arith.constant 255 : i32
    %79 = tpu.dynamic_rotate %2 by %c255_i32 dim 1 : vector<96x256xf32>, i32 -> vector<96x256xf32>
    %cst_19 = arith.constant 0.000000e+00 : f32
    %80 = vector.shape_cast %24 : vector<1x256xi1> to vector<1x256xi1>
    %81 = vector.broadcast %80 : vector<1x256xi1> to vector<96x256xi1>
    %82 = vector.broadcast %cst_19 : f32 to vector<96x256xf32>
    %83 = arith.select %81, %79, %82 : vector<96x256xi1>, vector<96x256xf32>
    %c16_i32_20 = arith.constant 16 : i32
    %84 = tpu.dynamic_rotate %83 by %c16_i32_20 dim 1 : vector<96x256xf32>, i32 -> vector<96x256xf32>
    %cst_21 = arith.constant 0.000000e+00 : f32
    %85 = vector.shape_cast %26 : vector<1x256xi1> to vector<1x256xi1>
    %86 = vector.broadcast %85 : vector<1x256xi1> to vector<96x256xi1>
    %87 = vector.broadcast %cst_21 : f32 to vector<96x256xf32>
    %88 = arith.select %86, %84, %87 : vector<96x256xi1>, vector<96x256xf32>
    %89 = vector.extract_strided_slice %3 {offsets = [0, 2], sizes = [96, 1], strides = [1, 1]} : vector<96x9xf32> to vector<96x1xf32>
    %90 = vector.broadcast %89 : vector<96x1xf32> to vector<96x256xf32>
    %91 = arith.mulf %88, %90 : vector<96x256xf32>
    %92 = arith.addf %78, %91 : vector<96x256xf32>
    %93 = vector.extract_strided_slice %3 {offsets = [0, 5], sizes = [96, 1], strides = [1, 1]} : vector<96x9xf32> to vector<96x1xf32>
    %94 = vector.broadcast %93 : vector<96x1xf32> to vector<96x256xf32>
    %95 = arith.mulf %83, %94 : vector<96x256xf32>
    %96 = arith.addf %92, %95 : vector<96x256xf32>
    %c240_i32_22 = arith.constant 240 : i32
    %97 = tpu.dynamic_rotate %83 by %c240_i32_22 dim 1 : vector<96x256xf32>, i32 -> vector<96x256xf32>
    %cst_23 = arith.constant 0.000000e+00 : f32
    %98 = vector.shape_cast %28 : vector<1x256xi1> to vector<1x256xi1>
    %99 = vector.broadcast %98 : vector<1x256xi1> to vector<96x256xi1>
    %100 = vector.broadcast %cst_23 : f32 to vector<96x256xf32>
    %101 = arith.select %99, %97, %100 : vector<96x256xi1>, vector<96x256xf32>
    %102 = vector.extract_strided_slice %3 {offsets = [0, 8], sizes = [96, 1], strides = [1, 1]} : vector<96x9xf32> to vector<96x1xf32>
    %103 = vector.broadcast %102 : vector<96x1xf32> to vector<96x256xf32>
    %104 = arith.mulf %101, %103 : vector<96x256xf32>
    %105 = arith.addf %96, %104 : vector<96x256xf32>
    %c0_24 = arith.constant 0 : index
    %c0_25 = arith.constant 0 : index
    %106 = vector.load %arg3[%c0_24, %c0_25] : memref<96x1xf32, #tpu.memory_space<vmem>>, vector<96x1xf32>
    %107 = vector.broadcast %106 : vector<96x1xf32> to vector<96x256xf32>
    %108 = arith.addf %105, %107 : vector<96x256xf32>
    %109 = vector.extract_strided_slice %108 {offsets = [0, 0], sizes = [32, 256], strides = [1, 1]} : vector<96x256xf32> to vector<32x256xf32>
    %110 = vector.extract_strided_slice %108 {offsets = [32, 0], sizes = [32, 256], strides = [1, 1]} : vector<96x256xf32> to vector<32x256xf32>
    %111 = vector.extract_strided_slice %108 {offsets = [64, 0], sizes = [32, 256], strides = [1, 1]} : vector<96x256xf32> to vector<32x256xf32>
    %112 = arith.mulf %109, %109 : vector<32x256xf32>
    %cst_26 = arith.constant dense<0.000000e+00> : vector<32xf32>
    %113 = vector.multi_reduction <add>, %112, %cst_26 [1] : vector<32x256xf32> to vector<32xf32>
    %114 = vector.shape_cast %113 : vector<32xf32> to vector<32x1xf32>
    %115 = arith.mulf %110, %110 : vector<32x256xf32>
    %cst_27 = arith.constant dense<0.000000e+00> : vector<32xf32>
    %116 = vector.multi_reduction <add>, %115, %cst_27 [1] : vector<32x256xf32> to vector<32xf32>
    %117 = vector.shape_cast %116 : vector<32xf32> to vector<32x1xf32>
    %c0_28 = arith.constant 0 : index
    %c0_29 = arith.constant 0 : index
    %118 = vector.load %arg4[%c0_28, %c0_29] : memref<32x1xf32, #tpu.memory_space<vmem>>, vector<32x1xf32>
    %cst_30 = arith.constant 1.000000e-24 : f32
    %119 = vector.broadcast %cst_30 : f32 to vector<32x1xf32>
    %120 = arith.maximumf %114, %119 : vector<32x1xf32>
    %121 = math.rsqrt %120 : vector<32x1xf32>
    %122 = arith.mulf %118, %121 : vector<32x1xf32>
    %cst_31 = arith.constant 1.000000e-24 : f32
    %123 = vector.broadcast %cst_31 : f32 to vector<32x1xf32>
    %124 = arith.maximumf %117, %123 : vector<32x1xf32>
    %125 = math.rsqrt %124 : vector<32x1xf32>
    %126 = arith.truncf %109 : vector<32x256xf32> to vector<32x256xbf16>
    %127 = vector.broadcast %125 : vector<32x1xf32> to vector<32x256xf32>
    %128 = arith.mulf %110, %127 : vector<32x256xf32>
    %129 = arith.truncf %128 : vector<32x256xf32> to vector<32x256xbf16>
    %cst_32 = arith.constant dense<0.000000e+00> : vector<32x32xf32>
    %130 = tpu.matmul %126, %129, %cst_32 {dimension_numbers = #tpu.dot_dimension_numbers<[1], [1], [0], [0], [0, 0, 1, 0], [], []>} : vector<32x256xbf16>, vector<32x256xbf16>, vector<32x32xf32> -> vector<32x32xf32>
    %131 = vector.broadcast %122 : vector<32x1xf32> to vector<32x32xf32>
    %132 = arith.mulf %130, %131 : vector<32x32xf32>
    %c0_33 = arith.constant 0 : index
    %c0_34 = arith.constant 0 : index
    %133 = vector.load %arg5[%c0_33, %c0_34] : memref<32x32xf32, #tpu.memory_space<vmem>>, vector<32x32xf32>
    %134 = arith.addf %132, %133 : vector<32x32xf32>
    %cst_35 = arith.constant dense<0xFF800000> : vector<32xf32>
    %135 = vector.multi_reduction <maximumf>, %134, %cst_35 [1] : vector<32x32xf32> to vector<32xf32>
    %136 = vector.shape_cast %135 : vector<32xf32> to vector<32x1xf32>
    %137 = vector.broadcast %136 : vector<32x1xf32> to vector<32x32xf32>
    %138 = arith.subf %134, %137 : vector<32x32xf32>
    %139 = math.exp %138 : vector<32x32xf32>
    %cst_36 = arith.constant dense<0.000000e+00> : vector<32xf32>
    %140 = vector.multi_reduction <add>, %139, %cst_36 [1] : vector<32x32xf32> to vector<32xf32>
    %141 = vector.shape_cast %140 : vector<32xf32> to vector<32x1xf32>
    %142 = tpu.reciprocal %141 {approx = true} : vector<32x1xf32> -> vector<32x1xf32>
    %143 = vector.broadcast %142 : vector<32x1xf32> to vector<32x32xf32>
    %144 = arith.mulf %139, %143 : vector<32x32xf32>
    %c0_37 = arith.constant 0 : index
    %c0_38 = arith.constant 0 : index
    %145 = vector.load %arg6[%c0_37, %c0_38] : memref<32x32xf32, #tpu.memory_space<vmem>>, vector<32x32xf32>
    %cst_39 = arith.constant dense<0.000000e+00> : vector<32x32xf32>
    %146 = tpu.matmul %145, %144, %cst_39 {dimension_numbers = #tpu.dot_dimension_numbers<[1], [0], [0], [1], [0, 0, 1, 1], [], []>} : vector<32x32xf32>, vector<32x32xf32>, vector<32x32xf32> -> vector<32x32xf32>
    %147 = arith.truncf %146 : vector<32x32xf32> to vector<32x32xbf16>
    %148 = arith.truncf %111 : vector<32x256xf32> to vector<32x256xbf16>
    %cst_40 = arith.constant dense<0.000000e+00> : vector<32x256xf32>
    %149 = tpu.matmul %147, %148, %cst_40 {dimension_numbers = #tpu.dot_dimension_numbers<[1], [0], [0], [1], [0, 0, 1, 1], [], []>} : vector<32x32xbf16>, vector<32x256xbf16>, vector<32x256xf32> -> vector<32x256xf32>
    %c0_41 = arith.constant 0 : index
    %c0_42 = arith.constant 0 : index
    %150 = vector.load %arg7[%c0_41, %c0_42] : memref<32x1xf32, #tpu.memory_space<vmem>>, vector<32x1xf32>
    %151 = vector.broadcast %150 : vector<32x1xf32> to vector<32x256xf32>
    %152 = arith.addf %149, %151 : vector<32x256xf32>
    %c0_43 = arith.constant 0 : index
    %c0_44 = arith.constant 0 : index
    %c0_45 = arith.constant 0 : index
    %153 = vector.load %arg8[%c0_43, %c0_44, %c0_45] : memref<1x32x256xf32, #tpu.memory_space<vmem>>, vector<1x32x256xf32>
    %154 = vector.shape_cast %153 : vector<1x32x256xf32> to vector<32x256xf32>
    %155 = vector.shape_cast %152 : vector<32x256xf32> to vector<1x32x256xf32>
    tpu.vector_store %arg8[%c0_43, %c0_44, %c0_45], %155 {strides = array<i32>} : memref<1x32x256xf32, #tpu.memory_space<vmem>>, vector<1x32x256xf32>,
    return
  }
  func.func @transform_0(%arg0: i32) -> (i32, i32, i32) {
    %c0_i32 = arith.constant 0 : i32
    %c0_i32_0 = arith.constant 0 : i32
    %c0_i32_1 = arith.constant 0 : i32
    return %arg0, %c0_i32, %c0_i32_0 : i32, i32, i32
  }
  func.func @transform_1(%arg0: i32) -> (i32, i32) {
    %c0_i32 = arith.constant 0 : i32
    %c0_i32_0 = arith.constant 0 : i32
    %c0_i32_1 = arith.constant 0 : i32
    return %c0_i32, %c0_i32_0 : i32, i32
  }
  func.func @transform_2(%arg0: i32) -> (i32, i32) {
    %c0_i32 = arith.constant 0 : i32
    %c0_i32_0 = arith.constant 0 : i32
    %c0_i32_1 = arith.constant 0 : i32
    return %c0_i32, %c0_i32_0 : i32, i32
  }
  func.func @transform_3(%arg0: i32) -> (i32, i32) {
    %c0_i32 = arith.constant 0 : i32
    %c0_i32_0 = arith.constant 0 : i32
    %c0_i32_1 = arith.constant 0 : i32
    return %c0_i32, %c0_i32_0 : i32, i32
  }
  func.func @transform_4(%arg0: i32) -> (i32, i32) {
    %c0_i32 = arith.constant 0 : i32
    %c0_i32_0 = arith.constant 0 : i32
    %c0_i32_1 = arith.constant 0 : i32
    return %c0_i32, %c0_i32_0 : i32, i32
  }
  func.func @transform_5(%arg0: i32) -> (i32, i32) {
    %c0_i32 = arith.constant 0 : i32
    %c0_i32_0 = arith.constant 0 : i32
    %c0_i32_1 = arith.constant 0 : i32
    return %c0_i32, %c0_i32_0 : i32, i32
  }
  func.func @transform_6(%arg0: i32) -> (i32, i32) {
    %c0_i32 = arith.constant 0 : i32
    %c0_i32_0 = arith.constant 0 : i32
    %c0_i32_1 = arith.constant 0 : i32
    return %c0_i32, %c0_i32_0 : i32, i32
  }
  func.func @transform_7(%arg0: i32) -> (i32, i32, i32) {
    %c0_i32 = arith.constant 0 : i32
    %c0_i32_0 = arith.constant 0 : i32
    %c0_i32_1 = arith.constant 0 : i32
    return %arg0, %c0_i32, %c0_i32_0 : i32, i32, i32
  }
}

</mosaic_0001>

<bundles_post_ra>
// kernel: attention_forward.2
= control target key start
LH: loop header
LB: loop body
LE: loop exit
PB: predicated region body
PF: predicated region fallthrough
CT: control target
= control target key end

     0   :  { %s750_s12 = smov 0   ;;  %s752_s13 = smov 0   ;;  %s869_s0 = inlined_call_operand.vmem [shape: f32[2,32,256], index: 0, kind: input, shape index: {}]   ;;  %s870_s1 = inlined_call_operand.vmem [shape: bf16[96,32], index: 1, kind: input, shape index: {}]   ;;  %s871_s2 = inlined_call_operand.vmem [shape: f32[96,1], index: 2, kind: input, shape index: {}]   ;;  %s872_s3 = inlined_call_operand.vmem [shape: bf16[2,96,256], index: 3, kind: output, shape index: {}]  }
   0x1   :  { %s754_s14 = smov 0  }
   0x2 LB: > { %s25_s15 = sadd.s32 1, %s723_s13  ;;  %p624_p0 = scmp.ge.s32.totalorder %s727_s14, 1  ;;  %s727_s14 = sphi %s754_s14, %s13_s14   ;;  %s723_s13 = sphi %s752_s13, %s874_s13   ;;  %s719_s12 = sphi %s750_s12, %s873_s12  }
   0x3   : > { %p27_p1 = scmp.ge.s32.totalorder %s25_s15, 2  ;;  %p158_p2 = scmp.lt.s32.totalorder %s727_s14, 3 }
   0x5   : > { %s876_s15 = smov (%p27_p1, %s25_s15), 0  ;;  %p159_p3 = pnand %p624_p0, %p158_p2 }
   0x6   : > { %p191_p4 = scmp.lt.s32.totalorder (!%p159_p3), %s719_s12, 1 }
   0x7   : > { %162 = sbr.rel (%p159_p3) target bundleno = 246 (0xf6), region = 32 }
   0xc   : > { %v729_v0 = vmov 0   ;;  %s878_s12 = smov (!%p191_p4, %s719_s12), 1  ;;  %v237_v12 = vld [vmem:[%s871_s2 + $0x10] sm:$0xff]  ;;  %v235_v13 = vld [vmem:[%s871_s2] sm:$0xff]  ;;  %v700_v16 = vld [vmem:[%s870_s1 + $0x18] sm:$0xff]   ;;  %vm337_vm0 = vcmask 261120  }
   0xd   : > { %388 = vmatprep.mubr.bf16.mxu0 %v729_v0  ;;  %418 = vmatprep.mubr.bf16.mxu1 %v729_v0  ;;  %s654_s16 = sshll.u32 %s878_s12, 6  ;;  %v699_v15 = vld [vmem:[%s870_s1] sm:$0xff]   ;;  %v238_v17 = vld [vmem:[%s871_s2 + $0x18] sm:$0xff]  ;;  %v236_v18 = vld [vmem:[%s871_s2 + $0x8] sm:$0xff]  ;;  %s671_s6 = smul.u32 96, %s878_s12 }
   0xe   : > { %698 = vset.pattern.permute.xlu1 %v729_v0  ;;  %697 = vset.pattern.permute.xlu0 %v729_v0  ;;  %s198_s19 = scalar_lea.vmem %s869_s0, %s654_s16  ;;  %v240_v19 = vld [vmem:[%s871_s2 + $0x28] sm:$0xff]  ;;  %v239_v20 = vld [vmem:[%s871_s2 + $0x20] sm:$0xff]  ;;  %v242_v23 = vld [vmem:[%s871_s2 + $0x38] sm:$0xff] }
   0xf   : > { %v216_v1 = vld [vmem:[%s198_s19 + $0x28] sm:$0xff]  ;;  %v218_v2 = vld [vmem:[%s198_s19 + $0x38] sm:$0xff]  ;;  %v215_v3 = vld [vmem:[%s198_s19 + $0x20] sm:$0xff]  ;;  %259 = vperm.xlu1 %698, %v237_v12   ;;  %249 = vperm.xlu0 %697, %v235_v13   ;;  %s842_s9 = scalar_lea.vmem %s872_s3, %s671_s6 }
  0x10   : > { %v222_v4 = vpack.c.bf16 %v218_v2, %v216_v1  ;;  %v217_v5 = vld [vmem:[%s198_s19 + $0x30] sm:$0xff]  ;;  %v212_v6 = vld [vmem:[%s198_s19 + $0x8] sm:$0xff]  ;;  %v214_v7 = vld [vmem:[%s198_s19 + $0x18] sm:$0xff] }
  0x11   : > { %v221_v8 = vpack.c.bf16 %v217_v5, %v215_v3  ;;  %v220_v9 = vpack.c.bf16 %v214_v7, %v212_v6  ;;  %v211_v10 = vld [vmem:[%s198_s19] sm:$0xff]  ;;  %v213_v11 = vld [vmem:[%s198_s19 + $0x10] sm:$0xff]  ;;  %v701_v21 = vld [vmem:[%s870_s1 + $0x8] sm:$0xff]  }
  0x12   : > { %368 = vmatprep.subr.bf16.mxu0 %v222_v4  ;;  %667 = vmatprep.subr.bf16.mxu1 %v222_v4  ;;  %v219_v14 = vpack.c.bf16 %v213_v11, %v211_v10  ;;  %v702_v22 = vld [vmem:[%s870_s1 + $0x20] sm:$0xff]   ;;  %v241_v24 = vld [vmem:[%s871_s2 + $0x30] sm:$0xff]  ;;  %v244_v25 = vld [vmem:[%s871_s2 + $0x48] sm:$0xff] }
  0x13   : > { %369 = vmatpush1.bf16.msra.mxu0 %v221_v8  ;;  %669 = vmatpush1.bf16.msra.mxu1 %v221_v8  ;;  %v243_v26 = vld [vmem:[%s871_s2 + $0x40] sm:$0xff]  ;;  %v703_v27 = vld [vmem:[%s870_s1 + $0x10] sm:$0xff]   ;;  %v704_v28 = vld [vmem:[%s870_s1 + $0x28] sm:$0xff]  }
  0x14   : > { %370 = vmatprep.subr.bf16.mxu0 %v220_v9  ;;  %668 = vmatprep.subr.bf16.mxu1 %v220_v9  ;;  %v246_v29 = vld [vmem:[%s871_s2 + $0x58] sm:$0xff]  ;;  %v245_v30 = vld [vmem:[%s871_s2 + $0x50] sm:$0xff] }
  0x15   : > { %264 = vperm.xlu1 %698, %v238_v17   ;;  %254 = vperm.xlu0 %697, %v236_v18  }
  0x17   : > { %371 = vmatpush1.bf16.msra.mxu0 %v219_v14  ;;  %670 = vmatpush1.bf16.msra.mxu1 %v219_v14 }
  0x19   : > { %274 = vperm.xlu1 %698, %v240_v19   ;;  %269 = vperm.xlu0 %697, %v239_v20  }
  0x1a   : > { %634 = vmatmul.mubr.msk.bf16.vlgmr.msra.gmra.mxu0 %vm337_vm0, %v699_v15  ;;  %637 = vmatmul.mubr.msk.bf16.vlgmr.msra.gmra.mxu1 %vm337_vm0, %v700_v16 }
  0x1b   : > { %398 = vmatprep.mubr.bf16.mxu0 %v729_v0  ;;  %428 = vmatprep.mubr.bf16.mxu1 %v729_v0 }
  0x1d   : > { %284 = vperm.xlu1 %698, %v242_v23   ;;  %279 = vperm.xlu0 %697, %v241_v24  }
  0x21   : > { %294 = vperm.xlu1 %698, %v244_v25   ;;  %289 = vperm.xlu0 %697, %v243_v26  }
  0x22   : > { %635 = vmatmul.mubr.msk.bf16.gmra.mxu0 %vm337_vm0, %v701_v21  ;;  %638 = vmatmul.mubr.msk.bf16.gmra.mxu1 %vm337_vm0, %v702_v22 }
  0x23   : > { %408 = vmatprep.mubr.bf16.mxu0 %v729_v0  ;;  %438 = vmatprep.mubr.bf16.mxu1 %v729_v0 }
  0x25   : > { %304 = vperm.xlu1 %698, %v246_v29   ;;  %299 = vperm.xlu0 %697, %v245_v30  }
  0x2a   : > { %636 = vmatmul.mubr.msk.bf16.gmra.mxu0 %vm337_vm0, %v703_v27  ;;  %639 = vmatmul.mubr.msk.bf16.gmra.mxu1 %vm337_vm0, %v704_v28 }
  0x8a   : > { %v250_v31 = vpop.permute.xlu0 %249  ;;  %v260_v32 = vpop.permute.xlu1 %259 }
  0x90   : > { %v255_v33 = vpop.permute.xlu0 %254  ;;  %v265_v34 = vpop.permute.xlu1 %264 }
  0x94   : > { %v834_v35 = vpop.permute.xlu0 %269  ;;  %v836_v36 = vpop.permute.xlu1 %274 }
  0x98   : > { %v280_v39 = vpop.permute.xlu0 %279  ;;  %v285_v48 = vpop.permute.xlu1 %284 }
  0x9c   : > { %v290_v59 = vpop.permute.xlu0 %289  ;;  %v295_v6 = vpop.permute.xlu1 %294 }
  0xa0   : > { %v300_v17 = vpop.permute.xlu0 %299  ;;  %v305_v28 = vpop.permute.xlu1 %304 }
  0xda   : > { %v390_v37 = vpop.f32.mrf.mxu0  ;;  %v420_v38 = vpop.f32.mrf.mxu1 }
  0xdb   : > { %v391_v42 = vadd.f32 %v390_v37, %v250_v31  ;;  %v421_v43 = vadd.f32 %v420_v38, %v280_v39 }
  0xdc   : > { %v392_v40 = vpop.f32.mrf.mxu0  ;;  %v422_v41 = vpop.f32.mrf.mxu1 }
  0xdd   : > { %v393_v44 = vadd.f32 %v392_v40, %v250_v31  ;;  %v423_v45 = vadd.f32 %v422_v41, %v280_v39 }
  0xde   : > { %v394_v46 = vpop.f32.mrf.mxu0  ;;  %v424_v47 = vpop.f32.mrf.mxu1 }
  0xdf   : > { %v655_v49 = vpack.c.bf16 %v393_v44, %v391_v42  ;;  %v661_v50 = vpack.c.bf16 %v423_v45, %v421_v43  ;;  %v395_v53 = vadd.f32 %v394_v46, %v255_v33  ;;  %v425_v54 = vadd.f32 %v424_v47, %v285_v48 }
  0xe0   : > { %v396_v51 = vpop.f32.mrf.mxu0  ;;  %v426_v52 = vpop.f32.mrf.mxu1 }
  0xe1   : > { %521 = vst [vmem:[%s842_s9] sm:$0xff] %v655_v49  ;;  %527 = vst [vmem:[%s842_s9 + $0x30] sm:$0xff] %v661_v50  ;;  %v397_v55 = vadd.f32 %v396_v51, %v255_v33  ;;  %v427_v56 = vadd.f32 %v426_v52, %v285_v48 }
  0xe2   : > { %v400_v57 = vpop.f32.mrf.mxu0  ;;  %v430_v58 = vpop.f32.mrf.mxu1 }
  0xe3   : > { %v656_v60 = vpack.c.bf16 %v397_v55, %v395_v53  ;;  %v662_v61 = vpack.c.bf16 %v427_v56, %v425_v54  ;;  %v401_v0 = vadd.f32 %v400_v57, %v260_v32  ;;  %v431_v1 = vadd.f32 %v430_v58, %v290_v59 }
  0xe4   : > { %v402_v62 = vpop.f32.mrf.mxu0  ;;  %v432_v63 = vpop.f32.mrf.mxu1 }
  0xe5   : > { %522 = vst [vmem:[%s842_s9 + $0x8] sm:$0xff] %v656_v60  ;;  %528 = vst [vmem:[%s842_s9 + $0x38] sm:$0xff] %v662_v61  ;;  %v403_v2 = vadd.f32 %v402_v62, %v260_v32  ;;  %v433_v3 = vadd.f32 %v432_v63, %v290_v59 }
  0xe6   : > { %v404_v4 = vpop.f32.mrf.mxu0  ;;  %v434_v5 = vpop.f32.mrf.mxu1 }
  0xe7   : > { %v657_v7 = vpack.c.bf16 %v403_v2, %v401_v0  ;;  %v663_v8 = vpack.c.bf16 %v433_v3, %v431_v1  ;;  %v405_v11 = vadd.f32 %v404_v4, %v265_v34  ;;  %v435_v12 = vadd.f32 %v434_v5, %v295_v6 }
  0xe8   : > { %v406_v9 = vpop.f32.mrf.mxu0  ;;  %v436_v10 = vpop.f32.mrf.mxu1 }
  0xe9   : > { %523 = vst [vmem:[%s842_s9 + $0x10] sm:$0xff] %v657_v7  ;;  %529 = vst [vmem:[%s842_s9 + $0x40] sm:$0xff] %v663_v8  ;;  %v407_v13 = vadd.f32 %v406_v9, %v265_v34  ;;  %v437_v14 = vadd.f32 %v436_v10, %v295_v6 }
  0xea   : > { %v410_v15 = vpop.f32.mrf.mxu0  ;;  %v440_v16 = vpop.f32.mrf.mxu1 }
  0xeb   : > { %v658_v18 = vpack.c.bf16 %v407_v13, %v405_v11  ;;  %v664_v19 = vpack.c.bf16 %v437_v14, %v435_v12  ;;  %v411_v22 = vadd.f32 %v410_v15, %v834_v35  ;;  %v441_v23 = vadd.f32 %v440_v16, %v300_v17 }
  0xec   : > { %v412_v20 = vpop.f32.mrf.mxu0  ;;  %v442_v21 = vpop.f32.mrf.mxu1 }
  0xed   : > { %524 = vst [vmem:[%s842_s9 + $0x18] sm:$0xff] %v658_v18  ;;  %530 = vst [vmem:[%s842_s9 + $0x48] sm:$0xff] %v664_v19  ;;  %v413_v24 = vadd.f32 %v412_v20, %v834_v35  ;;  %v443_v25 = vadd.f32 %v442_v21, %v300_v17 }
  0xee   : > { %v414_v26 = vpop.f32.mrf.mxu0  ;;  %v444_v27 = vpop.f32.mrf.mxu1 }
  0xef   : > { %v659_v29 = vpack.c.bf16 %v413_v24, %v411_v22  ;;  %v665_v30 = vpack.c.bf16 %v443_v25, %v441_v23  ;;  %v415_v33 = vadd.f32 %v414_v26, %v836_v36  ;;  %v445_v34 = vadd.f32 %v444_v27, %v305_v28 }
  0xf0   : > { %v416_v31 = vpop.f32.mrf.mxu0  ;;  %v446_v32 = vpop.f32.mrf.mxu1 }
  0xf1   : > { %525 = vst [vmem:[%s842_s9 + $0x20] sm:$0xff] %v659_v29  ;;  %531 = vst [vmem:[%s842_s9 + $0x50] sm:$0xff] %v665_v30  ;;  %v417_v37 = vadd.f32 %v416_v31, %v836_v36  ;;  %v447_v38 = vadd.f32 %v446_v32, %v305_v28 }
  0xf3   : > { %v660_v39 = vpack.c.bf16 %v417_v37, %v415_v33  ;;  %v666_v35 = vpack.c.bf16 %v447_v38, %v445_v34 }
  0xf5   : > { %526 = vst [vmem:[%s842_s9 + $0x28] sm:$0xff] %v660_v39  ;;  %532 = vst [vmem:[%s842_s9 + $0x58] sm:$0xff] %v666_v35 }
  0xf6 PF: > { %s13_s14 = sadd.s32 1, %s727_s14   ;;  %s873_s12 = smov %s723_s13 }
  0xf7   : > { %p10_p5 = scmp.ge.s32.totalorder %s13_s14, 4   ;;  %s874_s13 = smov %s876_s15 }
  0xf9   :  { %12 = sbr.rel (!%p10_p5) target bundleno = 2 (0x2), region = 62 }

// kernel: attention_forward.3
= control target key start
LH: loop header
LB: loop body
LE: loop exit
PB: predicated region body
PF: predicated region fallthrough
CT: control target
= control target key end

     0   :  { %s3298_s24 = smov 0   ;;  %s5716_s0 = inlined_call_operand.vmem [shape: bf16[2,96,256], index: 0, kind: input, shape index: {}]   ;;  %s5717_s1 = inlined_call_operand.vmem [shape: f32[96,9], index: 1, kind: input, shape index: {}]   ;;  %s5718_s2 = inlined_call_operand.vmem [shape: f32[96,1], index: 2, kind: input, shape index: {}]   ;;  %s5719_s3 = inlined_call_operand.vmem [shape: f32[32,1], index: 3, kind: input, shape index: {}]   ;;  %s5720_s4 = inlined_call_operand.vmem [shape: f32[32,32], index: 4, kind: input, shape index: {}]   ;;  %s5721_s5 = inlined_call_operand.vmem [shape: f32[32,32], index: 5, kind: input, shape index: {}]   ;;  %s5722_s6 = inlined_call_operand.vmem [shape: f32[32,1], index: 6, kind: input, shape index: {}]   ;;  %s5723_s7 = inlined_call_operand.vmem [shape: f32[2,32,256], index: 7, kind: output, shape index: {}]  }
   0x1 LB: > { %s2582_s25 = sadd.s32 4294967295, %s3243_s24   ;;  %p2586_p0 = scmp.ge.s32.totalorder %s3243_s24, 1  ;;  %s3243_s24 = sphi %s3298_s24, %s17_s24  }
   0x2   : > { %p237_p1 = scmp.lt.s32.totalorder %s3243_s24, 3 }
   0x4   : > { %p238_p2 = pnand %p2586_p0, %p237_p1 }
   0x6   : > { %241 = sbr.rel (%p238_p2) target bundleno = 1775 (0x6ef), region = 48 }
   0xb   : > { %p269_p3 = scmp.lt.s32.totalorder %s2582_s25, 1  ;;  %v5738_v0 = vmov 0   ;;  %v5768_v1 = vmov 6   ;;  %s3247_s30 = smov 1   ;;  %v3371_v18 = vld [vmem:[%s5717_s1 + $0x20] sm:$0xff]  ;;  %v3376_v19 = vld [vmem:[%s5717_s1 + $0x38] sm:$0xff]  ;;  %v328_v29 = vlaneseq }
   0xc   : > { %2683 = vset.pattern.permute.xlu1 %v5738_v0  ;;  %2701 = vset.pattern.permute.xlu0 %v5768_v1  ;;  %s3248_s8 = smov 127   ;;  %v3383_v20 = vld [vmem:[%s5717_s1 + $0x30] sm:$0xff]  ;;  %v5752_v21 = vmov 1   ;;  %v5760_v22 = vmov 3   ;;  %s3251_s15 = smov 112   ;;  %v5730_v23 = vmov 4  }
   0xd   : > { %s6043_s25 = smov (!%p269_p3, %s2582_s25), 1  ;;  %v5728_v24 = vmov 7   ;;  %s3254_s16 = smov 16   ;;  %v5724_v25 = vmov 2   ;;  %v3411_v26 = vld [vmem:[%s5717_s1 + $0x28] sm:$0xff]  ;;  %v5726_v27 = vmov 5  }
   0xe   : > { %s2621_s26 = smul.u32 96, %s6043_s25  ;;  %v5736_v28 = vmov 8   ;;  %v3435_v30 = vand.u32 127, %v328_v29  ;;  %v5841_v37 = vmov 0  ;;  %v5844_v38 = vmov 0  ;;  %s2598_s19 = sshll.u32 %s6043_s25, 6 }
   0xf   : > { %vm2284_vm10 = vcmask 261120   ;;  %s278_s22 = scalar_lea.vmem %s5723_s7, %s2598_s19 }
  0x10   : > { %s3314_s29 = scalar_lea.vmem %s5716_s0, %s2621_s26  ;;  %v3440_v31 = vadd.s32 128, %v3435_v30  ;;  %v335_v33 = vand.u32 15, %v3435_v30  ;;  %vm411_vm1 = vcmp.lt.s32.totalorder %v3435_v30, 1  ;;  %vm1494_vm2 = vcmp.lt.s32.totalorder %v3435_v30, 127 }
  0x11   : > { %v3317_v2 = vld [vmem:[%s3314_s29 + $0x30] sm:$0xff]  ;;  %v3320_v3 = vld [vmem:[%s3314_s29 + $0x38] sm:$0xff]  ;;  %v3323_v4 = vld [vmem:[%s3314_s29 + $0x20] sm:$0xff]  ;;  %vm512_vm6 = vcmp.lt.s32.totalorder %v3435_v30, 16  ;;  %vm359_vm7 = vcmp.ge.s32.totalorder %v3435_v30, 16  ;;  %vm817_vm8 = vcmp.lt.s32.totalorder %v3435_v30, 112 }
  0x12   : > { %v5750_v5 = vunpack.c.l.bf16 %v3317_v2  ;;  %v5742_v6 = vunpack.c.h.bf16 %v3317_v2  ;;  %v5751_v7 = vunpack.c.l.bf16 %v3320_v3  ;;  %v5749_v8 = vunpack.c.h.bf16 %v3320_v3  ;;  %v3330_v9 = vld [vmem:[%s3314_s29 + $0x28] sm:$0xff] }
  0x13   : > { %v5746_v10 = vunpack.c.l.bf16 %v3323_v4  ;;  %v5745_v11 = vunpack.c.h.bf16 %v3323_v4  ;;  %v5741_v12 = vunpack.c.l.bf16 %v3330_v9  ;;  %v5740_v13 = vunpack.c.h.bf16 %v3330_v9 }
  0x14   : > { %v2643_v14 = vpack.i.bf16 %v5751_v7, %v5750_v5  ;;  %v2648_v16 = vpack.i.bf16 %v5749_v8, %v5742_v6  ;;  %v342_v34 = vand.u32 15, %v3440_v31  ;;  %vm3444_vm0 = vcmp.ge.s32.totalorder %v335_v33, 1 }
  0x15   : > { %v3344_v15 = vpack.i.bf16 %v5741_v12, %v5746_v10  ;;  %v3357_v17 = vpack.i.bf16 %v5740_v13, %v5745_v11  ;;  %v5842_v37 = vsel %vm3444_vm0, 4294967295, %v5841_v37  ;;  %vm3482_vm4 = vcmp.le.s32.totalorder %v335_v33, 14 }
  0x16   : > { %2644 = vrot.lane.b32.xlu0 %v2643_v14, %s3247_s30  ;;  %5843 = vst [vmem:[#allocation2_spill] sm:$0xff] %v5842_v37  ;;  %vm3450_vm3 = vcmp.ge.s32.totalorder %v342_v34, 1  ;;  %vm3540_vm5 = vcmp.le.s32.totalorder %v342_v34, 14  ;;  %vm362_vm9 = vcmp.lt.s32.totalorder %v3440_v31, 240 }
  0x17   : > { %2654 = vrot.lane.b32.xlu1 %v3344_v15, %s3247_s30  ;;  %v5845_v38 = vsel %vm3450_vm3, 4294967295, %v5844_v38 }
  0x18   : > { %5846 = vst [vmem:[#allocation3_spill] sm:$0xff] %v5845_v38 }
  0x1a   : > { %2649 = vrot.lane.b32.xlu0 %v2648_v16, %s3247_s30 }
  0x1b   : > { %2659 = vrot.lane.b32.xlu1 %v3357_v17, %s3247_s30 }
  0x1e   : > { %2664 = vrot.lane.b32.xlu0 %v2643_v14, %s3248_s8 }
  0x1f   : > { %2669 = vrot.lane.b32.xlu1 %v2648_v16, %s3248_s8 }
  0x22   : > { %2674 = vrot.lane.b32.xlu0 %v3344_v15, %s3248_s8 }
  0x23   : > { %2679 = vrot.lane.b32.xlu1 %v3357_v17, %s3248_s8 }
  0x26   : > { %887 = vperm.xlu0 %2701, %v3371_v18  }
  0x27   : > { %602 = vperm.xlu1 %2683, %v3376_v19  }
  0x2a   : > { %2702 = vset.pattern.permute.xlu0 %v5752_v21 }
  0x2b   : > { %2684 = vset.pattern.permute.xlu1 %v5760_v22  ;;  %1087 = vperm.xlu0 %2702, %v3383_v20  }
  0x2c   : > { %698 = vperm.xlu1 %2684, %v3383_v20  }
  0x2f   : > { %2706 = vrot.lane.b32.xlu0 %v2643_v14, %s3251_s15 }
  0x30   : > { %2685 = vset.pattern.permute.xlu1 %v5768_v1 }
  0x31   : > { %895 = vperm.xlu1 %2685, %v3383_v20  }
  0x33   : > { %1079 = vperm.xlu0 %2702, %v3371_v18  }
  0x35   : > { %899 = vperm.xlu1 %2685, %v3376_v19  }
  0x37   : > { %2715 = vset.pattern.permute.xlu0 %v5730_v23 }
  0x38   : > { %1187 = vperm.xlu0 %2715, %v3376_v19  }
  0x39   : > { %2686 = vset.pattern.permute.xlu1 %v5752_v21 }
  0x3a   : > { %1091 = vperm.xlu1 %2686, %v3376_v19  }
  0x3c   : > { %1175 = vperm.xlu0 %2715, %v3371_v18  }
  0x3e   : > { %2687 = vset.pattern.permute.xlu1 %v5730_v23 }
  0x3f   : > { %1183 = vperm.xlu1 %2687, %v3383_v20  }
  0x40   : > { %2730 = vset.pattern.permute.xlu0 %v5728_v24 }
  0x41   : > { %1367 = vperm.xlu0 %2730, %v3371_v18  }
  0x43   : > { %2689 = vrot.lane.b32.xlu1 %v2643_v14, %s3254_s16  ;;  %v5849_v14 = vmov 0 }
  0x44   : > { %2698 = vset.pattern.permute.xlu1 %v5738_v0  ;;  %v5850_v14 = vsel %vm3482_vm4, 4294967295, %v5849_v14 }
  0x45   : > { %2731 = vset.pattern.permute.xlu0 %v5724_v25  ;;  %5851 = vst [vmem:[#allocation6_spill] sm:$0xff] %v5850_v14 }
  0x46   : > { %1672 = vperm.xlu0 %2731, %v3376_v19  }
  0x47   : > { %2694 = vrot.lane.b32.xlu1 %v2648_v16, %s3254_s16 }
  0x4b   : > { %592 = vperm.xlu1 %2698, %v3411_v26  }
  0x4f   : > { %2699 = vset.pattern.permute.xlu1 %v5760_v22 }
  0x50   : > { %690 = vperm.xlu1 %2699, %v3371_v18  }
  0x54   : > { %2700 = vset.pattern.permute.xlu1 %v5728_v24 }
  0x55   : > { %1375 = vperm.xlu1 %2700, %v3383_v20  }
  0x59   : > { %1379 = vperm.xlu1 %2700, %v3376_v19  }
  0x5d   : > { %2703 = vset.pattern.permute.xlu1 %v5768_v1 }
  0x5e   : > { %891 = vperm.xlu1 %2703, %v3411_v26  }
  0x62   : > { %2704 = vset.pattern.permute.xlu1 %v5724_v25 }
  0x63   : > { %1668 = vperm.xlu1 %2704, %v3383_v20  }
  0x67   : > { %2711 = vrot.lane.b32.xlu1 %v2648_v16, %s3251_s15 }
  0x68   : > { %2716 = vset.pattern.permute.xlu1 %v5752_v21 }
  0x6b   : > { %1083 = vperm.xlu1 %2716, %v3411_v26  }
  0x6f   : > { %2717 = vset.pattern.permute.xlu1 %v5726_v27 }
  0x70   : > { %1764 = vperm.xlu1 %2717, %v3383_v20  }
  0x74   : > { %2718 = vset.pattern.permute.xlu1 %v5730_v23 }
  0x75   : > { %1179 = vperm.xlu1 %2718, %v3411_v26  }
  0x79   : > { %2719 = vset.pattern.permute.xlu1 %v5736_v28 }
  0x7a   : > { %1956 = vperm.xlu1 %2719, %v3383_v20  }
  0x7e   : > { %2721 = vrot.lane.b32.xlu1 %v3344_v15, %s3254_s16 }
  0x7f   : > { %2782 = vset.pattern.permute.xlu1 %v5728_v24 }
  0x82   : > { %2726 = vrot.lane.b32.xlu1 %v3357_v17, %s3254_s16 }
  0x88   : > { %v2645_v32 = vpop.permute.xlu0 %2644 }
  0x89   : > { %v2655_v35 = vpop.permute.xlu1 %2654  ;;  %v2647_v39 = vunpack.i.h.bf16 %v2645_v32  ;;  %v2646_v40 = vunpack.i.l.bf16 %v2645_v32 }
  0x8a   : > { %v2657_v44 = vunpack.i.h.bf16 %v2655_v35  ;;  %v2656_v45 = vunpack.i.l.bf16 %v2655_v35 }
  0x8c   : > { %v2650_v36 = vpop.permute.xlu0 %2649 }
  0x8d   : > { %v2652_v41 = vunpack.i.h.bf16 %v2650_v36  ;;  %v2651_v42 = vunpack.i.l.bf16 %v2650_v36  ;;  %v2660_v43 = vpop.permute.xlu1 %2659 }
  0x8e   : > { %v2662_v46 = vunpack.i.h.bf16 %v2660_v43  ;;  %v2661_v47 = vunpack.i.l.bf16 %v2660_v43 }
  0x8f   : > { %v430_v48 = vsel %vm411_vm1, %v2651_v42, %v2646_v40  ;;  %v431_v49 = vsel %vm411_vm1, %v2652_v41, %v2647_v39  ;;  %v418_v50 = vsel %vm411_vm1, %v2646_v40, %v2651_v42  ;;  %v419_v51 = vsel %vm411_vm1, %v2647_v39, %v2652_v41 }
  0x90   : > { %v3464_v52 = vsel %vm3444_vm0, %v430_v48, 0.0  ;;  %v3468_v53 = vsel %vm3444_vm0, %v431_v49, 0.0  ;;  %v3472_v54 = vsel %vm3450_vm3, %v418_v50, 0.0  ;;  %v3476_v55 = vsel %vm3450_vm3, %v419_v51, 0.0  ;;  %v2665_v56 = vpop.permute.xlu0 %2664 }
  0x91   : > { %5847 = vst [vmem:[#allocation4_spill] sm:$0xff] %v3468_v53  ;;  %5848 = vst [vmem:[#allocation5_spill] sm:$0xff] %v3476_v55  ;;  %v2732_v57 = vpack.i.bf16 %v3468_v53, %v3464_v52  ;;  %v2737_v58 = vpack.i.bf16 %v3476_v55, %v3472_v54  ;;  %v2667_v59 = vunpack.i.h.bf16 %v2665_v56  ;;  %v2666_v60 = vunpack.i.l.bf16 %v2665_v56  ;;  %v2670_v61 = vpop.permute.xlu1 %2669 }
  0x92   : > { %v2672_v62 = vunpack.i.h.bf16 %v2670_v61  ;;  %v2671_v63 = vunpack.i.l.bf16 %v2670_v61  ;;  %v428_v16 = vsel %vm411_vm1, %v2661_v47, %v2656_v45  ;;  %v429_v29 = vsel %vm411_vm1, %v2662_v46, %v2657_v44 }
  0x93   : > { %2733 = vrot.lane.b32.xlu0 %v2732_v57, %s3254_s16  ;;  %2738 = vrot.lane.b32.xlu1 %v2737_v58, %s3254_s16  ;;  %v3506_v39 = vsel %vm3444_vm0, %v428_v16, 0.0  ;;  %v3510_v40 = vsel %vm3444_vm0, %v429_v29, 0.0  ;;  %v416_v42 = vsel %vm411_vm1, %v2656_v45, %v2661_v47  ;;  %v417_v43 = vsel %vm411_vm1, %v2657_v44, %v2662_v46 }
  0x94   : > { %v1501_v32 = vsel %vm1494_vm2, %v2666_v60, %v2671_v63  ;;  %v1502_v35 = vsel %vm1494_vm2, %v2667_v59, %v2672_v62  ;;  %5852 = vst [vmem:[#allocation7_spill] sm:$0xff] %v3510_v40  ;;  %v2752_v48 = vpack.i.bf16 %v3510_v40, %v3506_v39  ;;  %v3524_v49 = vsel %vm3450_vm3, %v416_v42, 0.0 }
  0x95   : > { %v3498_v33 = vsel %vm3482_vm4, %v1501_v32, 0.0  ;;  %v3502_v36 = vsel %vm3482_vm4, %v1502_v35, 0.0  ;;  %v3528_v50 = vsel %vm3450_vm3, %v417_v43, 0.0  ;;  %v2680_v51 = vpop.permute.xlu1 %2679  ;;  %v5854_v46 = vmov 0 }
  0x96   : > { %v2772_v41 = vpack.i.bf16 %v3502_v36, %v3498_v33  ;;  %5853 = vst [vmem:[#allocation8_spill] sm:$0xff] %v3528_v50  ;;  %v2757_v45 = vpack.i.bf16 %v3528_v50, %v3524_v49  ;;  %v5855_v46 = vsel %vm3540_vm5, 4294967295, %v5854_v46  ;;  %v1513_v47 = vsel %vm1494_vm2, %v2671_v63, %v2666_v60  ;;  %v2675_v60 = vpop.permute.xlu0 %2674 }
  0x97   : > { %2748 = vrot.lane.b32.xlu0 %v2737_v58, %s3251_s15  ;;  %2743 = vrot.lane.b32.xlu1 %v2732_v57, %s3251_s15  ;;  %5856 = vst [vmem:[#allocation9_spill] sm:$0xff] %v5855_v46  ;;  %v1514_v56 = vsel %vm1494_vm2, %v2672_v62, %v2667_v59  ;;  %v3551_v57 = vsel %vm3540_vm5, %v1513_v47, 0.0  ;;  %v2682_v62 = vunpack.i.h.bf16 %v2680_v51  ;;  %v2681_v63 = vunpack.i.l.bf16 %v2680_v51  ;;  %v2033_v51 = vld [vmem:[%s5718_s2 + $0x30] sm:$0xff]  ;;  %v2034_v47 = vld [vmem:[%s5718_s2 + $0x38] sm:$0xff] }
  0x98   : > { %v3555_v58 = vsel %vm3540_vm5, %v1514_v56, 0.0  ;;  %v2677_v16 = vunpack.i.h.bf16 %v2675_v60  ;;  %v2676_v29 = vunpack.i.l.bf16 %v2675_v60  ;;  %v3611_v60 = vld [vmem:[%s3314_s29] sm:$0xff] }
  0x99   : > { %5857 = vst [vmem:[#allocation10_spill] sm:$0xff] %v3555_v58  ;;  %v2777_v59 = vpack.i.bf16 %v3555_v58, %v3551_v57  ;;  %5860 = vst [vmem:[#allocation13_spill] sm:$0xff] %v3611_v60  ;;  %v5892_v58 = vunpack.c.l.bf16 %v3317_v2 }
  0x9a   : > { %v1512_v35 = vsel %vm1494_vm2, %v2682_v62, %v2677_v16 }
  0x9b   : > { %2773 = vrot.lane.b32.xlu0 %v2772_v41, %s3254_s16  ;;  %2753 = vrot.lane.b32.xlu1 %v2752_v48, %s3254_s16  ;;  %v3585_v43 = vsel %vm3540_vm5, %v1512_v35, 0.0  ;;  %v1499_v35 = vsel %vm1494_vm2, %v2676_v29, %v2681_v63 }
  0x9c   : > { %5859 = vst [vmem:[#allocation12_spill] sm:$0xff] %v3585_v43 }
  0x9f   : > { %1664 = vperm.xlu0 %2731, %v3411_v26   ;;  %2758 = vrot.lane.b32.xlu1 %v2757_v45, %s3254_s16 }
  0xa1   : > { %v3702_v12 = vpop.permute.xlu0 %887 }
  0xa2   : > { %v3536_v44 = vpop.permute.xlu1 %602 }
  0xa3   : > { %2789 = vset.pattern.permute.xlu0 %v5726_v27  ;;  %2763 = vrot.lane.b32.xlu1 %v2752_v48, %s3251_s15 }
  0xa4   : > { %1768 = vperm.xlu0 %2789, %v3376_v19  }
  0xa7   : > { %2768 = vrot.lane.b32.xlu1 %v2757_v45, %s3251_s15  ;;  %v3558_v34 = vpop.permute.xlu1 %698 }
  0xa8   : > { %2792 = vrot.lane.b32.xlu0 %v3344_v15, %s3251_s15  ;;  %v1511_v15 = vsel %vm1494_vm2, %v2681_v63, %v2676_v29  ;;  %v3633_v63 = vsel %vm3482_vm4, %v1499_v35, 0.0  ;;  %v3643_v29 = vld [vmem:[%s3314_s29 + $0x18] sm:$0xff] }
  0xa9   : > { %v3581_v42 = vsel %vm3540_vm5, %v1511_v15, 0.0  ;;  %v3614_v15 = vld [vmem:[%s3314_s29 + $0x8] sm:$0xff]  ;;  %5862 = vst [vmem:[#allocation15_spill] sm:$0xff] %v3633_v63  ;;  %5865 = vst [vmem:[#allocation18_spill] sm:$0xff] %v3643_v29  ;;  %v5747_v13 = vunpack.c.l.bf16 %v3643_v29 }
  0xaa   : > { %5858 = vst [vmem:[#allocation11_spill] sm:$0xff] %v3581_v42  ;;  %5861 = vst [vmem:[#allocation14_spill] sm:$0xff] %v3614_v15 }
  0xab   : > { %2778 = vrot.lane.b32.xlu1 %v2777_v59, %s3254_s16 }
  0xac   : > { %1756 = vperm.xlu0 %2789, %v3371_v18   ;;  %v3566_v61 = vpop.permute.xlu1 %895 }
  0xaf   : > { %1371 = vperm.xlu1 %2782, %v3411_v26  }
  0xb0   : > { %2801 = vset.pattern.permute.xlu0 %v5736_v28  ;;  %v3570_v32 = vpop.permute.xlu1 %899 }
  0xb1   : > { %1960 = vperm.xlu0 %2801, %v3376_v19  }
  0xb3   : > { %2784 = vrot.lane.b32.xlu1 %v2772_v41, %s3251_s15  ;;  %v2813_v41 = vpack.i.bf16 %v3585_v43, %v3581_v42 }
  0xb4   : > { %2788 = vset.pattern.permute.xlu1 %v5724_v25  ;;  %v5732_v25 = vunpack.c.h.bf16 %v3614_v15 }
  0xb5   : > { %v3587_v48 = vpop.permute.xlu1 %1091  ;;  %2804 = vrot.lane.b32.xlu0 %v2777_v59, %s3251_s15 }
  0xb7   : > { %1660 = vperm.xlu1 %2788, %v3371_v18  }
  0xb9   : > { %2814 = vrot.lane.b32.xlu0 %v2813_v41, %s3254_s16 }
  0xba   : > { %v3597_v45 = vpop.permute.xlu1 %1183 }
  0xbb   : > { %2790 = vset.pattern.permute.xlu1 %v5738_v0 }
  0xbc   : > { %2071 = vperm.xlu1 %2790, %v2033_v51   ;;  %v1500_v51 = vsel %vm1494_vm2, %v2677_v16, %v2682_v62  ;;  %v3640_v16 = vld [vmem:[%s3314_s29 + $0x10] sm:$0xff] }
  0xbd   : > { %1952 = vperm.xlu0 %2801, %v3411_v26   ;;  %v3637_v62 = vsel %vm3482_vm4, %v1500_v51, 0.0  ;;  %5864 = vst [vmem:[#allocation17_spill] sm:$0xff] %v3640_v16  ;;  %v5735_v24 = vunpack.c.h.bf16 %v3640_v16  ;;  %v5734_v51 = vunpack.c.h.bf16 %v3643_v29 }
  0xbe   : > { %v3604_v56 = vpop.permute.xlu1 %2689  ;;  %5863 = vst [vmem:[#allocation16_spill] sm:$0xff] %v3637_v62 }
  0xbf   : > { %v2692_v53 = vunpack.i.h.bf16 %v3604_v56 }
  0xc0   : > { %2076 = vperm.xlu1 %2790, %v2034_v47  }
  0xc1   : > { %2819 = vset.pattern.permute.xlu0 %v5738_v0 }
  0xc2   : > { %v3607_v59 = vpop.permute.xlu1 %2694  ;;  %597 = vperm.xlu0 %2819, %v3383_v20   ;;  %v5733_v20 = vunpack.c.h.bf16 %v3611_v60 }
  0xc3   : > { %v2697_v38 = vunpack.i.h.bf16 %v3607_v59 }
  0xc4   : > { %2797 = vrot.lane.b32.xlu1 %v3357_v17, %s3251_s15  ;;  %v2031_v17 = vld [vmem:[%s5718_s2 + $0x20] sm:$0xff]  ;;  %v3652_v35 = vpack.i.bf16 %v5732_v25, %v5733_v20 }
  0xc5   : > { %2802 = vset.pattern.permute.xlu1 %v5726_v27  ;;  %v2808_v27 = vpack.i.bf16 %v3637_v62, %v3633_v63 }
  0xc6   : > { %v3623_v47 = vpop.permute.xlu1 %592  ;;  %587 = vperm.xlu0 %2819, %v3371_v18   ;;  %5866 = vst [vmem:[#allocation19_spill] sm:$0xff] %v3652_v35 }
  0xc8   : > { %1760 = vperm.xlu1 %2802, %v3411_v26  }
  0xca   : > { %2061 = vperm.xlu0 %2819, %v2031_v17   ;;  %v3666_v17 = vpack.i.bf16 %v5734_v51, %v5735_v24  ;;  %v5744_v51 = vunpack.c.l.bf16 %v3611_v60 }
  0xcb   : > { %v3656_v23 = vpop.permute.xlu1 %690 }
  0xcc   : > { %2809 = vrot.lane.b32.xlu1 %v2808_v27, %s3254_s16  ;;  %5867 = vst [vmem:[#allocation20_spill] sm:$0xff] %v3666_v17 }
  0xcd   : > { %2818 = vset.pattern.permute.xlu1 %v5736_v28  ;;  %v2032_v28 = vld [vmem:[%s5718_s2 + $0x28] sm:$0xff] }
  0xce   : > { %2837 = vrot.lane.b32.xlu0 %v3652_v35, %s3247_s30 }
  0xd0   : > { %1948 = vperm.xlu1 %2818, %v3371_v18   ;;  %v3669_v25 = vpop.permute.xlu1 %1375  ;;  %v5743_v18 = vunpack.c.l.bf16 %v3614_v15  ;;  %v5874_v15 = vmov 1  }
  0xd2   : > { %2847 = vrot.lane.b32.xlu0 %v3666_v17, %s3247_s30 }
  0xd4   : > { %2821 = vrot.lane.b32.xlu1 %v2808_v27, %s3251_s15  ;;  %v3674_v20 = vpop.permute.xlu1 %1379  ;;  %v3692_v27 = vld [vmem:[%s5717_s1] sm:$0xff] }
  0xd5   : > { %2830 = vset.pattern.permute.xlu1 %v5738_v0  ;;  %5868 = vst [vmem:[#allocation21_spill] sm:$0xff] %v3692_v27  ;;  %v5748_v0 = vunpack.c.l.bf16 %v3640_v16 }
  0xd6   : > { %2857 = vrot.lane.b32.xlu0 %v3652_v35, %s3248_s8 }
  0xd8   : > { %2826 = vrot.lane.b32.xlu1 %v2813_v41, %s3251_s15  ;;  %v3698_v41 = vpack.i.bf16 %v5743_v18, %v5744_v51  ;;  %v3719_v51 = vpop.permute.xlu0 %1087 }
  0xd9   : > { %v3682_v24 = vpop.permute.xlu1 %891 }
  0xda   : > { %2867 = vrot.lane.b32.xlu0 %v3666_v17, %s3248_s8  ;;  %5869 = vst [vmem:[#allocation22_spill] sm:$0xff] %v3698_v41 }
  0xdc   : > { %2066 = vperm.xlu1 %2830, %v2032_v28   ;;  %v3713_v28 = vpack.i.bf16 %v5747_v13, %v5748_v0  ;;  %v3726_v10 = vpop.permute.xlu0 %2706  ;;  %v3733_v13 = vld [vmem:[%s5717_s1 + $0x8] sm:$0xff] }
  0xdd   : > { %5871 = vst [vmem:[#allocation24_spill] sm:$0xff] %v3733_v13 }
  0xde   : > { %v3704_v6 = vpop.permute.xlu1 %1668  ;;  %567 = vperm.xlu0 %2819, %v3692_v27   ;;  %5870 = vst [vmem:[#allocation23_spill] sm:$0xff] %v3713_v28 }
  0xe0   : > { %2832 = vrot.lane.b32.xlu1 %v3698_v41, %s3247_s30  ;;  %v3740_v0 = vpop.permute.xlu0 %1079 }
  0xe2   : > { %v3715_v18 = vpop.permute.xlu1 %2711  ;;  %2871 = vset.pattern.permute.xlu0 %v5760_v22 }
  0xe3   : > { %702 = vperm.xlu0 %2871, %v3376_v19  }
  0xe4   : > { %2842 = vrot.lane.b32.xlu1 %v3713_v28, %s3247_s30  ;;  %v1188_v8 = vpop.permute.xlu0 %1187 }
  0xe6   : > { %v3723_v11 = vpop.permute.xlu1 %1083 }
  0xe7   : > { %694 = vperm.xlu0 %2871, %v3411_v26  }
  0xe8   : > { %2852 = vrot.lane.b32.xlu1 %v3698_v41, %s3248_s8  ;;  %v1176_v7 = vpop.permute.xlu0 %1175 }
  0xeb   : > { %678 = vperm.xlu0 %2871, %v3733_v13   ;;  %v3736_v19 = vpop.permute.xlu1 %1764 }
  0xec   : > { %2862 = vrot.lane.b32.xlu1 %v3713_v28, %s3248_s8  ;;  %v3753_v29 = vpop.permute.xlu0 %1367 }
  0xed   : > { %5873 = vst [vmem:[#allocation26_spill] sm:$0xff] %v3753_v29 }
  0xf0   : > { %v3742_v26 = vpop.permute.xlu1 %1179  ;;  %572 = vperm.xlu1 %2830, %v3733_v13  }
  0xf4   : > { %2872 = vset.pattern.permute.xlu1 %v5760_v22  ;;  %v3759_v22 = vpop.permute.xlu0 %1672 }
  0xf5   : > { %v3746_v5 = vpop.permute.xlu1 %1956  ;;  %674 = vperm.xlu1 %2872, %v3692_v27  }
  0xf6   : > { %5872 = vst [vmem:[#allocation25_spill] sm:$0xff] %v3746_v5 }
  0xf9   : > { %2873 = vset.pattern.permute.xlu1 %v5768_v1  ;;  %v3751_v21 = vpop.permute.xlu1 %2721 }
  0xfa   : > { %871 = vperm.xlu1 %2873, %v3692_v27  }
  0xfd   : > { %v3756_v16 = vpop.permute.xlu1 %2726 }
  0xfe   : > { %875 = vperm.xlu1 %2873, %v3733_v13  }
 0x102   : > { %2884 = vset.pattern.permute.xlu1 %v5874_v15 }
 0x105   : > { %v3761_v60 = vpop.permute.xlu1 %2738  ;;  %v3765_v14 = vpop.permute.xlu0 %2733 }
 0x109   : > { %v3763_v17 = vpop.permute.xlu1 %2743  ;;  %v3769_v28 = vpop.permute.xlu0 %2748 }
 0x10d   : > { %v3767_v1 = vpop.permute.xlu1 %2753  ;;  %v3773_v41 = vpop.permute.xlu0 %2773 }
 0x111   : > { %v3771_v46 = vpop.permute.xlu1 %2758 }
 0x115   : > { %v3775_v35 = vpop.permute.xlu1 %2763 }
 0x119   : > { %v3781_v43 = vpop.permute.xlu1 %2768 }
 0x11a   : > { %v3777_v27 = vpop.permute.xlu0 %1664 }
 0x11b   : > { %5875 = vst [vmem:[#allocation27_spill] sm:$0xff] %v3777_v27 }
 0x11d   : > { %v3785_v5 = vpop.permute.xlu1 %2778 }
 0x11f   : > { %v3779_v15 = vpop.permute.xlu0 %1768 }
 0x120   : > { %5876 = vst [vmem:[#allocation28_spill] sm:$0xff] %v3779_v15 }
 0x123   : > { %v3783_v62 = vpop.permute.xlu0 %2792 }
 0x124   : > { %5877 = vst [vmem:[#allocation29_spill] sm:$0xff] %v3783_v62  ;;  %v5890_v62 = vunpack.c.l.bf16 %v3320_v3 }
 0x127   : > { %v3787_v29 = vpop.permute.xlu0 %1756 }
 0x128   : > { %5878 = vst [vmem:[#allocation30_spill] sm:$0xff] %v3787_v29 }
 0x12a   : > { %v3789_v13 = vpop.permute.xlu1 %1371 }
 0x12b   : > { %5879 = vst [vmem:[#allocation31_spill] sm:$0xff] %v3789_v13  ;;  %v2691_v13 = vunpack.i.l.bf16 %v3604_v56  ;;  %v2713_v56 = vunpack.i.l.bf16 %v3715_v18 }
 0x12c   : > { %v3791_v50 = vpop.permute.xlu0 %1960 }
 0x12d   : > { %5880 = vst [vmem:[#allocation32_spill] sm:$0xff] %v3791_v50  ;;  %v2696_v50 = vunpack.i.l.bf16 %v3607_v59 }
 0x12e   : > { %v3793_v40 = vpop.permute.xlu1 %2784 }
 0x12f   : > { %5881 = vst [vmem:[#allocation33_spill] sm:$0xff] %v3793_v40  ;;  %v3827_v40 = vmul.f32 %v3558_v34, %v3472_v54  ;;  %v1032_v63 = vsel %vm512_vm6, %v2696_v50, %v2691_v13 }
 0x130   : > { %v3795_v37 = vpop.permute.xlu0 %2804 }
 0x131   : > { %5882 = vst [vmem:[#allocation34_spill] sm:$0xff] %v3795_v37  ;;  %v2714_v37 = vunpack.i.h.bf16 %v3715_v18  ;;  %5889 = vst [vmem:[#allocation41_spill] sm:$0xff] %v3827_v40  ;;  %v3838_v18 = vmul.f32 %v3597_v45, %v5892_v58  ;;  %v1020_v58 = vsel %vm512_vm6, %v2691_v13, %v2696_v50  ;;  %v2729_v13 = vunpack.i.h.bf16 %v3756_v16 }
 0x132   : > { %v3797_v55 = vpop.permute.xlu1 %1660  ;;  %v2728_v50 = vunpack.i.l.bf16 %v3756_v16 }
 0x133   : > { %5883 = vst [vmem:[#allocation35_spill] sm:$0xff] %v3797_v55  ;;  %v2709_v55 = vunpack.i.h.bf16 %v3726_v10 }
 0x134   : > { %v3799_v27 = vpop.permute.xlu0 %2814 }
 0x135   : > { %5884 = vst [vmem:[#allocation36_spill] sm:$0xff] %v3799_v27  ;;  %v1033_v27 = vsel %vm512_vm6, %v2697_v38, %v2692_v53 }
 0x137   : > { %v3803_v42 = vpop.permute.xlu1 %2071 }
 0x138   : > { %5885 = vst [vmem:[#allocation37_spill] sm:$0xff] %v3803_v42  ;;  %v3808_v29 = vpop.permute.xlu0 %1952  ;;  %v2708_v42 = vunpack.i.l.bf16 %v3726_v10  ;;  %v3833_v10 = vmul.f32 %v1188_v8, %v5890_v62  ;;  %v5896_v62 = vunpack.c.h.bf16 %v3317_v2  ;;  %v1321_v2 = vsel %vm817_vm8, %v2714_v37, %v2709_v55 }
 0x139   : > { %5886 = vst [vmem:[#allocation38_spill] sm:$0xff] %v3808_v29  ;;  %v3823_v29 = vmul.f32 %v3558_v34, %v3464_v52  ;;  %v5895_v34 = vunpack.c.h.bf16 %v3323_v4 }
 0x13a   : > { %5891 = vst [vmem:[#allocation42_spill] sm:$0xff] %v3833_v10  ;;  %v3857_v10 = vmul.f32 %v3597_v45, %v5896_v62  ;;  %v1320_v45 = vsel %vm817_vm8, %v2713_v56, %v2708_v42  ;;  %v1308_v16 = vsel %vm817_vm8, %v2708_v42, %v2713_v56  ;;  %v2735_v56 = vunpack.i.l.bf16 %v3765_v14 }
 0x13b   : > { %v3819_v59 = vpop.permute.xlu1 %2076  ;;  %5888 = vst [vmem:[#allocation40_spill] sm:$0xff] %v3823_v29  ;;  %v5894_v29 = vunpack.c.l.bf16 %v3323_v4  ;;  %v3850_v40 = vmul.f32 %v1176_v7, %v5895_v34  ;;  %v1050_v4 = vsel %vm359_vm7, %v1032_v63, 0.0  ;;  %v1339_v62 = vsel %vm362_vm9, %v1320_v45, 0.0 }
 0x13c   : > { %5887 = vst [vmem:[#allocation39_spill] sm:$0xff] %v3819_v59  ;;  %v5893_v59 = vunpack.c.h.bf16 %v3320_v3  ;;  %v1021_v3 = vsel %vm512_vm6, %v2692_v53, %v2697_v38  ;;  %v2724_v38 = vunpack.i.h.bf16 %v3751_v21  ;;  %v2723_v53 = vunpack.i.l.bf16 %v3751_v21 }
 0x13d   : > { %v3846_v54 = vmul.f32 %v1176_v7, %v5894_v29  ;;  %v3852_v15 = vpop.permute.xlu0 %597  ;;  %v1309_v7 = vsel %vm817_vm8, %v2709_v55, %v2714_v37  ;;  %v3880_v63 = vmul.f32 %v3587_v48, %v1021_v3  ;;  %v2736_v37 = vunpack.i.h.bf16 %v3765_v14 }
 0x13e   : > { %v3842_v52 = vmul.f32 %v1188_v8, %v5893_v59  ;;  %v1052_v8 = vsel %vm359_vm7, %v1033_v27, 0.0  ;;  %v3883_v27 = vmul.f32 %v3719_v51, %v1020_v58  ;;  %v2741_v55 = vunpack.i.h.bf16 %v3761_v60 }
 0x13f   : > { %v3873_v29 = vpop.permute.xlu1 %2797  ;;  %v3890_v34 = vmul.f32 %v3587_v48, %v1052_v8  ;;  %v1341_v21 = vsel %vm362_vm9, %v1321_v2, 0.0  ;;  %v3899_v3 = vmul.f32 %v3719_v51, %v1050_v4  ;;  %v3903_v58 = vmul.f32 %v3656_v23, %v3506_v39 }
 0x140   : > { %v3907_v48 = vmul.f32 %v3656_v23, %v3524_v49  ;;  %v3910_v8 = vmul.f32 %v3674_v20, %v1309_v7  ;;  %v1030_v42 = vsel %vm512_vm6, %v2728_v50, %v2723_v53  ;;  %v1031_v51 = vsel %vm512_vm6, %v2729_v13, %v2724_v38 }
 0x141   : > { %v3887_v59 = vpop.permute.xlu0 %587  ;;  %v2740_v39 = vunpack.i.l.bf16 %v3761_v60  ;;  %v3921_v4 = vmul.f32 %v3674_v20, %v1341_v21  ;;  %v3924_v23 = vmul.f32 %v3669_v25, %v1308_v16  ;;  %v3927_v49 = vmul.f32 %v3669_v25, %v1339_v62 }
 0x142   : > { %v532_v7 = vsel %vm512_vm6, %v2741_v55, %v2736_v37  ;;  %v1018_v14 = vsel %vm512_vm6, %v2723_v53, %v2728_v50  ;;  %v2750_v60 = vunpack.i.l.bf16 %v3769_v28  ;;  %v2745_v20 = vunpack.i.l.bf16 %v3763_v17 }
 0x143   : > { %v3912_v2 = vpop.permute.xlu1 %1760  ;;  %5898 = vst [vmem:[#allocation44_spill] sm:$0xff] %v3924_v23  ;;  %5899 = vst [vmem:[#allocation45_spill] sm:$0xff] %v3927_v49  ;;  %v1019_v25 = vsel %vm512_vm6, %v2724_v38, %v2729_v13  ;;  %v1046_v21 = vsel %vm359_vm7, %v1030_v42, 0.0  ;;  %v1048_v16 = vsel %vm359_vm7, %v1031_v51, 0.0  ;;  %v2751_v53 = vunpack.i.h.bf16 %v3769_v28 }
 0x144   : > { %5897 = vst [vmem:[#allocation43_spill] sm:$0xff] %v3912_v2  ;;  %v3935_v2 = vmul.f32 %v3736_v19, %v3498_v33  ;;  %v520_v33 = vsel %vm512_vm6, %v2736_v37, %v2741_v55  ;;  %v2746_v50 = vunpack.i.h.bf16 %v3763_v17  ;;  %v555_v38 = vsel %vm359_vm7, %v532_v7, 0.0 }
 0x145   : > { %v3931_v45 = vpop.permute.xlu0 %2061  ;;  %v3959_v13 = vmul.f32 %v3736_v19, %v3551_v57  ;;  %v5903_v42 = vunpack.c.l.bf16 %v3330_v9  ;;  %v5905_v55 = vunpack.c.h.bf16 %v3330_v9  ;;  %v3972_v17 = vmul.f32 %v3740_v0, %v1018_v14 }
 0x146   : > { %5900 = vst [vmem:[#allocation46_spill] sm:$0xff] %v3931_v45  ;;  %5901 = vst [vmem:[#allocation47_spill] sm:$0xff] %v3935_v2  ;;  %v531_v45 = vsel %vm512_vm6, %v2740_v39, %v2735_v56  ;;  %v3977_v7 = vmul.f32 %v3740_v0, %v1046_v21  ;;  %v3980_v57 = vmul.f32 %v3723_v11, %v1048_v16  ;;  %v2776_v2 = vunpack.i.h.bf16 %v3773_v41 }
 0x147   : > { %v3949_v62 = vpop.permute.xlu1 %2809  ;;  %5902 = vst [vmem:[#allocation48_spill] sm:$0xff] %v3959_v13  ;;  %v3964_v37 = vmul.f32 %v3742_v26, %v5903_v42  ;;  %v3969_v28 = vmul.f32 %v3742_v26, %v5905_v55  ;;  %v3983_v19 = vmul.f32 %v3723_v11, %v1019_v25  ;;  %v836_v9 = vsel %vm817_vm8, %v2750_v60, %v2745_v20 }
 0x148   : > { %v3989_v26 = vsel %vm512_vm6, %v2735_v56, %v2740_v39  ;;  %v3993_v14 = vsel %vm359_vm7, %v531_v45, 0.0  ;;  %v3998_v0 = vmul.f32 %v3536_v44, %v555_v38  ;;  %v4001_v21 = vmul.f32 %v3536_v44, %v520_v33 }
 0x149   : > { %5904 = vst [vmem:[#allocation49_spill] sm:$0xff] %v3964_v37  ;;  %5906 = vst [vmem:[#allocation50_spill] sm:$0xff] %v3969_v28  ;;  %v3974_v51 = vpop.permute.xlu0 %2837  ;;  %v825_v11 = vsel %vm817_vm8, %v2746_v50, %v2751_v53  ;;  %v837_v25 = vsel %vm817_vm8, %v2751_v53, %v2746_v50  ;;  %v2761_v56 = vunpack.i.h.bf16 %v3771_v46  ;;  %v2770_v39 = vunpack.i.l.bf16 %v3781_v43 }
 0x14a   : > { %v824_v45 = vsel %vm817_vm8, %v2745_v20, %v2750_v60  ;;  %v859_v16 = vsel %vm362_vm9, %v836_v9, 0.0  ;;  %v2760_v38 = vunpack.i.l.bf16 %v3771_v46  ;;  %v2771_v44 = vunpack.i.h.bf16 %v3781_v43 }
 0x14b   : > { %v3995_v42 = vpop.permute.xlu1 %1948  ;;  %v2756_v55 = vunpack.i.h.bf16 %v3767_v1  ;;  %v2765_v53 = vunpack.i.l.bf16 %v3775_v35  ;;  %v2781_v50 = vunpack.i.h.bf16 %v3785_v5  ;;  %v2780_v13 = vunpack.i.l.bf16 %v3785_v5 }
 0x14c   : > { %5907 = vst [vmem:[#allocation51_spill] sm:$0xff] %v3995_v42  ;;  %v861_v60 = vsel %vm362_vm9, %v837_v25, 0.0  ;;  %v4024_v20 = vmul.f32 %v3570_v32, %v825_v11  ;;  %v2755_v46 = vunpack.i.l.bf16 %v3767_v1  ;;  %v2766_v43 = vunpack.i.h.bf16 %v3775_v35 }
 0x14d   : > { %v4015_v33 = vpop.permute.xlu0 %2847  ;;  %v2775_v42 = vunpack.i.l.bf16 %v3773_v41  ;;  %v834_v5 = vsel %vm817_vm8, %v2770_v39, %v2765_v53  ;;  %v4037_v25 = vmul.f32 %v3566_v61, %v824_v45  ;;  %v4042_v35 = vmul.f32 %v3566_v61, %v859_v16 }
 0x14e   : > { %5908 = vst [vmem:[#allocation52_spill] sm:$0xff] %v4015_v33  ;;  %v530_v33 = vsel %vm512_vm6, %v2761_v56, %v2756_v55  ;;  %v835_v1 = vsel %vm817_vm8, %v2771_v44, %v2766_v43  ;;  %v529_v11 = vsel %vm512_vm6, %v2760_v38, %v2755_v46  ;;  %v518_v41 = vsel %vm512_vm6, %v2756_v55, %v2761_v56 }
 0x14f   : > { %v4028_v9 = vpop.permute.xlu1 %2821  ;;  %v1614_v37 = vsel %vm512_vm6, %v2781_v50, %v2776_v2  ;;  %v1613_v45 = vsel %vm512_vm6, %v2780_v13, %v2775_v42  ;;  %v4055_v49 = vmul.f32 %v3570_v32, %v861_v60  ;;  %v822_v61 = vsel %vm817_vm8, %v2765_v53, %v2770_v39 }
 0x150   : > { %v823_v16 = vsel %vm817_vm8, %v2766_v43, %v2771_v44  ;;  %v551_v56 = vsel %vm359_vm7, %v530_v33, 0.0  ;;  %v857_v55 = vsel %vm362_vm9, %v835_v1, 0.0  ;;  %v1602_v32 = vsel %vm512_vm6, %v2776_v2, %v2781_v50 }
 0x151   : > { %v4046_v28 = vpop.permute.xlu0 %2857  ;;  %v517_v39 = vsel %vm512_vm6, %v2755_v46, %v2760_v38  ;;  %v549_v44 = vsel %vm359_vm7, %v529_v11, 0.0  ;;  %v1633_v53 = vsel %vm359_vm7, %v1614_v37, 0.0  ;;  %v1601_v60 = vsel %vm512_vm6, %v2775_v42, %v2780_v13 }
 0x152   : > { %5909 = vst [vmem:[#allocation53_spill] sm:$0xff] %v4046_v28  ;;  %v855_v28 = vsel %vm362_vm9, %v834_v5, 0.0  ;;  %v1631_v33 = vsel %vm359_vm7, %v1613_v45, 0.0  ;;  %v4084_v5 = vmul.f32 %v3623_v47, %v518_v41  ;;  %v926_v2 = vmul.f32 %v3702_v12, %v822_v61  ;;  %v5917_v61 = vld [vmem:[#allocation10_spill] sm:$0xff] }
 0x153   : > { %v4063_v23 = vpop.permute.xlu1 %2826  ;;  %v4088_v38 = vmul.f32 %v3682_v24, %v823_v16  ;;  %v927_v50 = vmul.f32 %v3702_v12, %v855_v28  ;;  %v4092_v37 = vmul.f32 %v3623_v47, %v551_v56  ;;  %v4095_v13 = vmul.f32 %v3759_v22, %v1602_v32  ;;  %v5915_v28 = vld [vmem:[#allocation28_spill] sm:$0xff]  ;;  %v5919_v16 = vld [vmem:[#allocation29_spill] sm:$0xff]  ;;  %v5921_v32 = vld [vmem:[#allocation15_spill] sm:$0xff] }
 0x154   : > { %v633_v42 = vmul.f32 %v3887_v59, %v549_v44  ;;  %v634_v46 = vmul.f32 %v3887_v59, %v517_v39  ;;  %v4102_v11 = vmul.f32 %v3682_v24, %v857_v55  ;;  %v4105_v41 = vmul.f32 %v3759_v22, %v1633_v53  ;;  %v5922_v39 = vld [vmem:[#allocation30_spill] sm:$0xff]  ;;  %v5924_v44 = vld [vmem:[#allocation11_spill] sm:$0xff] }
 0x155   : > { %v4081_v43 = vpop.permute.xlu0 %2867  ;;  %5911 = vst [vmem:[#allocation55_spill] sm:$0xff] %v4095_v13  ;;  %v4108_v12 = vmul.f32 %v3704_v6, %v1631_v33  ;;  %v4111_v47 = vmul.f32 %v3704_v6, %v1601_v60  ;;  %v4115_v45 = vmul.f32 %v5915_v28, %v3502_v36  ;;  %v4119_v59 = vmul.f32 %v5915_v28, %v5917_v61  ;;  %v5926_v60 = vld [vmem:[#allocation33_spill] sm:$0xff] }
 0x156   : > { %5910 = vst [vmem:[#allocation54_spill] sm:$0xff] %v4081_v43  ;;  %v637_v22 = vmul.f32 %v3852_v15, %v3993_v14  ;;  %v638_v56 = vmul.f32 %v3852_v15, %v3989_v26  ;;  %v2794_v6 = vunpack.i.l.bf16 %v5919_v16  ;;  %v4131_v36 = vmul.f32 %v5922_v39, %v5921_v32  ;;  %v5927_v14 = vld [vmem:[#allocation34_spill] sm:$0xff] }
 0x157   : > { %v4099_v1 = vpop.permute.xlu1 %2066  ;;  %5913 = vst [vmem:[#allocation57_spill] sm:$0xff] %v4108_v12  ;;  %5914 = vst [vmem:[#allocation58_spill] sm:$0xff] %v4111_v47  ;;  %v4135_v53 = vmul.f32 %v5922_v39, %v5924_v44  ;;  %v2787_v33 = vunpack.i.h.bf16 %v5926_v60  ;;  %v2807_v61 = vunpack.i.h.bf16 %v5927_v14  ;;  %v753_v15 = vadd.f32 %v3903_v58, %v633_v42  ;;  %v5928_v44 = vld [vmem:[#allocation40_spill] sm:$0xff]  ;;  %v5929_v47 = vld [vmem:[#allocation41_spill] sm:$0xff] }
 0x158   : > { %5912 = vst [vmem:[#allocation56_spill] sm:$0xff] %v4099_v1  ;;  %5916 = vst [vmem:[#allocation28_spill] sm:$0xff] %v4115_v45  ;;  %v754_v26 = vadd.f32 %v3907_v48, %v634_v46  ;;  %v2839_v32 = vunpack.i.l.bf16 %v3974_v51  ;;  %v758_v12 = vadd.f32 %v5929_v47, %v638_v56  ;;  %v2799_v28 = vunpack.i.l.bf16 %v3873_v29  ;;  %v5931_v56 = vld [vmem:[#allocation4_spill] sm:$0xff]  ;;  %v5932_v39 = vld [vmem:[#allocation5_spill] sm:$0xff] }
 0x159   : > { %5918 = vst [vmem:[#allocation10_spill] sm:$0xff] %v4119_v59  ;;  %v4126_v55 = vpop.permute.xlu0 %567  ;;  %5923 = vst [vmem:[#allocation15_spill] sm:$0xff] %v4131_v36  ;;  %v950_v59 = vadd.f32 %v926_v2, %v753_v15  ;;  %v5935_v15 = vunpack.i.l.bf16 %v5926_v60 }
 0x15a   : > { %5920 = vst [vmem:[#allocation29_spill] sm:$0xff] %v4126_v55  ;;  %5925 = vst [vmem:[#allocation30_spill] sm:$0xff] %v4135_v53  ;;  %v2840_v55 = vunpack.i.h.bf16 %v3974_v51  ;;  %v757_v53 = vadd.f32 %v5928_v44, %v637_v22  ;;  %v951_v45 = vadd.f32 %v927_v50, %v754_v26  ;;  %v1890_v50 = vsel %vm817_vm8, %v2787_v33, %v2807_v61 }
 0x15b   : > { %v2833_v24 = vpop.permute.xlu1 %2832  ;;  %v5936_v26 = vunpack.i.l.bf16 %v5927_v14 }
 0x15c   : > { %v2835_v43 = vunpack.i.h.bf16 %v2833_v24  ;;  %v2834_v1 = vunpack.i.l.bf16 %v2833_v24 }
 0x15e   : > { %v413_v58 = vsel %vm411_vm1, %v2835_v43, %v2840_v55  ;;  %v412_v48 = vsel %vm411_vm1, %v2834_v1, %v2839_v32  ;;  %v703_v42 = vpop.permute.xlu0 %702  ;;  %v424_v51 = vsel %vm411_vm1, %v2839_v32, %v2834_v1  ;;  %v425_v46 = vsel %vm411_vm1, %v2840_v55, %v2835_v43 }
 0x15f   : > { %v4158_v22 = vsel %vm3450_vm3, %v413_v58, 0.0  ;;  %v4162_v47 = vsel %vm3450_vm3, %v412_v48, 0.0  ;;  %v735_v44 = vmul.f32 %v703_v42, %v5931_v56  ;;  %v736_v36 = vmul.f32 %v703_v42, %v5932_v39  ;;  %v5938_v56 = vld [vmem:[#allocation8_spill] sm:$0xff] }
 0x160   : > { %v4168_v1 = vsel %vm3444_vm0, %v424_v51, 0.0  ;;  %v4172_v43 = vsel %vm3444_vm0, %v425_v46, 0.0  ;;  %v4182_v2 = vpack.i.bf16 %v4158_v22, %v4162_v47  ;;  %v5937_v51 = vld [vmem:[#allocation7_spill] sm:$0xff] }
 0x161   : > { %5934 = vst [vmem:[#allocation11_spill] sm:$0xff] %v4172_v43  ;;  %v759_v55 = vadd.f32 %v735_v44, %v3998_v0  ;;  %v760_v32 = vadd.f32 %v736_v36, %v4001_v21  ;;  %v4178_v58 = vpack.i.bf16 %v4172_v43, %v4168_v1  ;;  %v4192_v0 = vsel %vm817_vm8, %v5936_v26, %v5935_v15  ;;  %v5939_v43 = vld [vmem:[#allocation36_spill] sm:$0xff] }
 0x162   : > { %v1902_v21 = vsel %vm817_vm8, %v2807_v61, %v2787_v33  ;;  %v2811_v36 = vunpack.i.l.bf16 %v3949_v62  ;;  %v695_v39 = vpop.permute.xlu0 %694  ;;  %v2816_v15 = vunpack.i.l.bf16 %v5939_v43  ;;  %v954_v26 = vadd.f32 %v4037_v25, %v757_v53  ;;  %2880 = vrot.lane.b32.xlu1 %v4182_v2, %s3254_s16 }
 0x163   : > { %v956_v48 = vadd.f32 %v4024_v20, %v759_v55  ;;  %v957_v42 = vadd.f32 %v4055_v49, %v760_v32  ;;  %v731_v46 = vmul.f32 %v695_v39, %v5937_v51  ;;  %v732_v44 = vmul.f32 %v695_v39, %v5938_v56  ;;  %2875 = vrot.lane.b32.xlu0 %v4178_v58, %s3254_s16  ;;  %v5943_v51 = vld [vmem:[#allocation26_spill] sm:$0xff] }
 0x164   : > { %v955_v33 = vadd.f32 %v4042_v35, %v758_v12  ;;  %v1318_v61 = vsel %vm817_vm8, %v2799_v28, %v2794_v6  ;;  %v1142_v49 = vadd.f32 %v3977_v7, %v950_v59  ;;  %v1143_v20 = vadd.f32 %v3972_v17, %v951_v45  ;;  %v5940_v59 = vld [vmem:[#allocation42_spill] sm:$0xff] }
 0x165   : > { %v1148_v55 = vadd.f32 %v3890_v34, %v956_v48  ;;  %v1149_v32 = vadd.f32 %v3880_v63, %v957_v42  ;;  %v2817_v39 = vunpack.i.h.bf16 %v5939_v43  ;;  %v1611_v25 = vsel %vm512_vm6, %v2816_v15, %v2811_v36 }
 0x166   : > { %v755_v35 = vadd.f32 %v731_v46, %v4092_v37  ;;  %v756_v12 = vadd.f32 %v732_v44, %v4084_v5  ;;  %v2800_v53 = vunpack.i.h.bf16 %v3873_v29  ;;  %v1306_v7 = vsel %vm817_vm8, %v2794_v6, %v2799_v28  ;;  %v5941_v5 = vld [vmem:[#allocation24_spill] sm:$0xff] }
 0x167   : > { %v1244_v17 = vadd.f32 %v5940_v59, %v1148_v55  ;;  %v1245_v34 = vadd.f32 %v3842_v52, %v1149_v32  ;;  %v1146_v63 = vadd.f32 %v3899_v3, %v954_v26  ;;  %v1147_v45 = vadd.f32 %v3883_v27, %v955_v33  ;;  %1067 = vperm.xlu1 %2884, %v5941_v5  }
 0x168   : > { %v1335_v43 = vsel %vm362_vm9, %v1318_v61, 0.0  ;;  %v1599_v37 = vsel %vm512_vm6, %v2811_v36, %v2816_v15  ;;  %v1238_v29 = vadd.f32 %v3846_v54, %v1142_v49  ;;  %v1239_v6 = vadd.f32 %v3850_v40, %v1143_v20 }
 0x169   : > { %v1627_v28 = vsel %vm359_vm7, %v1611_v25, 0.0  ;;  %v2828_v52 = vunpack.i.l.bf16 %v4063_v23  ;;  %v952_v3 = vadd.f32 %v4088_v38, %v755_v35  ;;  %v953_v27 = vadd.f32 %v4102_v11, %v756_v12  ;;  %v5947_v25 = vld [vmem:[#allocation32_spill] sm:$0xff] }
 0x16a   : > { %v1436_v48 = vadd.f32 %v3910_v8, %v1244_v17  ;;  %v1437_v42 = vadd.f32 %v3921_v4, %v1245_v34  ;;  %v5942_v36 = vunpack.i.h.bf16 %v5919_v16  ;;  %v1406_v40 = vmul.f32 %v5943_v51, %v1306_v7  ;;  %v5944_v8 = vld [vmem:[#allocation35_spill] sm:$0xff] }
 0x16b   : > { %v1407_v46 = vmul.f32 %v5943_v51, %v1335_v43  ;;  %v2823_v56 = vunpack.i.l.bf16 %v4028_v9  ;;  %v1242_v44 = vadd.f32 %v3838_v18, %v1146_v63  ;;  %v1243_v38 = vadd.f32 %v3857_v10, %v1147_v45  ;;  %v5946_v10 = vld [vmem:[#allocation55_spill] sm:$0xff]  ;;  %v5951_v63 = vld [vmem:[#allocation10_spill] sm:$0xff] }
 0x16c   : > { %v1319_v54 = vsel %vm817_vm8, %v2800_v53, %v5942_v36  ;;  %v2812_v11 = vunpack.i.h.bf16 %v3949_v62  ;;  %v1700_v15 = vmul.f32 %v5944_v8, %v1599_v37  ;;  %v5945_v4 = vmov 4   ;;  %v5956_v51 = vld [vmem:[#allocation51_spill] sm:$0xff] }
 0x16d   : > { %2895 = vset.pattern.permute.xlu1 %v5945_v4  ;;  %v1431_v26 = vadd.f32 %v1407_v46, %v1239_v6  ;;  %v1699_v33 = vmul.f32 %v5944_v8, %v1627_v28  ;;  %v1899_v61 = vsel %vm817_vm8, %v2828_v52, %v2823_v56  ;;  %v1430_v49 = vadd.f32 %v1406_v40, %v1238_v29  ;;  %v5953_v29 = vld [vmem:[#allocation49_spill] sm:$0xff]  ;;  %v5954_v28 = vld [vmem:[#allocation50_spill] sm:$0xff] }
 0x16e   : > { %v1144_v20 = vadd.f32 %v3980_v57, %v952_v3  ;;  %v1145_v55 = vadd.f32 %v3983_v19, %v953_v27  ;;  %v1729_v18 = vadd.f32 %v4105_v41, %v1436_v48  ;;  %v1730_v32 = vadd.f32 %v5946_v10, %v1437_v42  ;;  %v5949_v57 = vld [vmem:[#allocation44_spill] sm:$0xff]  ;;  %v5955_v48 = vld [vmem:[#allocation31_spill] sm:$0xff]  ;;  %v5962_v10 = vld [vmem:[#allocation30_spill] sm:$0xff] }
 0x16f   : > { %v1922_v62 = vsel %vm362_vm9, %v1902_v21, 0.0  ;;  %v1993_v35 = vmul.f32 %v5947_v25, %v1890_v50  ;;  %v5948_v12 = vmov %v5942_v36  ;;  %v1337_v59 = vsel %vm362_vm9, %v1319_v54, 0.0  ;;  %v5950_v41 = vld [vmem:[#allocation28_spill] sm:$0xff]  ;;  %v5952_v21 = vld [vmem:[#allocation45_spill] sm:$0xff] }
 0x170   : > { %v1307_v7 = vsel %vm817_vm8, %v5948_v12, %v2800_v53  ;;  %v1434_v17 = vadd.f32 %v5949_v57, %v1242_v44  ;;  %v1612_v19 = vsel %vm512_vm6, %v2817_v39, %v2812_v11  ;;  %v1825_v34 = vadd.f32 %v5950_v41, %v1729_v18  ;;  %v5964_v12 = vld [vmem:[#allocation39_spill] sm:$0xff] }
 0x171   : > { %v1826_v45 = vadd.f32 %v5951_v63, %v1730_v32  ;;  %v1435_v43 = vadd.f32 %v5952_v21, %v1243_v38  ;;  %v1887_v16 = vsel %vm817_vm8, %v2823_v56, %v2828_v52  ;;  %v1916_v50 = vsel %vm362_vm9, %v1899_v61, 0.0  ;;  %v5960_v61 = vld [vmem:[#allocation57_spill] sm:$0xff]  ;;  %v5966_v41 = vld [vmem:[#allocation47_spill] sm:$0xff]  ;;  %v5967_v63 = vld [vmem:[#allocation48_spill] sm:$0xff] }
 0x172   : > { %v1723_v53 = vadd.f32 %v1699_v33, %v1430_v49  ;;  %v1724_v37 = vadd.f32 %v1700_v15, %v1431_v26  ;;  %v1240_v6 = vadd.f32 %v5953_v29, %v1144_v20  ;;  %v1241_v3 = vadd.f32 %v5954_v28, %v1145_v55  ;;  %v5959_v26 = vld [vmem:[#allocation15_spill] sm:$0xff] }
 0x173   : > { %v1994_v27 = vmul.f32 %v5947_v25, %v1922_v62  ;;  %v1408_v42 = vmul.f32 %v5955_v48, %v1307_v7  ;;  %v1409_v36 = vmul.f32 %v5955_v48, %v1337_v59  ;;  %v1600_v54 = vsel %vm512_vm6, %v2812_v11, %v2817_v39  ;;  %v5961_v11 = vld [vmem:[#allocation58_spill] sm:$0xff] }
 0x174   : > { %v1629_v52 = vsel %vm359_vm7, %v1612_v19, 0.0  ;;  %v1987_v40 = vmul.f32 %v5956_v51, %v1887_v16  ;;  %v2017_v46 = vadd.f32 %v1993_v35, %v1825_v34  ;;  %v1988_v44 = vmul.f32 %v5956_v51, %v1916_v50  ;;  %v5968_v16 = vld [vmem:[#allocation16_spill] sm:$0xff]  ;;  %v5969_v50 = vld [vmem:[#allocation43_spill] sm:$0xff] }
 0x175   : > { %v2018_v56 = vadd.f32 %v1994_v27, %v1826_v45  ;;  %v5957_v38 = vunpack.i.l.bf16 %v5927_v14  ;;  %v5958_v8 = vunpack.i.l.bf16 %v5926_v60  ;;  %v1819_v33 = vadd.f32 %v5959_v26, %v1723_v53  ;;  %v5963_v60 = vld [vmem:[#allocation27_spill] sm:$0xff]  ;;  %v5971_v27 = vld [vmem:[#allocation46_spill] sm:$0xff]  ;;  %v5973_v26 = vld [vmem:[#allocation37_spill] sm:$0xff] }
 0x176   : > { %v1727_v39 = vadd.f32 %v5960_v61, %v1434_v17  ;;  %v1728_v49 = vadd.f32 %v5961_v11, %v1435_v43  ;;  %v2829_v20 = vunpack.i.h.bf16 %v4063_v23  ;;  %v1432_v55 = vadd.f32 %v1408_v42, %v1240_v6  ;;  %v5965_v17 = vld [vmem:[#allocation25_spill] sm:$0xff] }
 0x177   : > { %v1889_v15 = vsel %vm817_vm8, %v5958_v8, %v5957_v38  ;;  %v1433_v18 = vadd.f32 %v1409_v36, %v1241_v3  ;;  %v1820_v32 = vadd.f32 %v5962_v10, %v1724_v37  ;;  %v1920_v14 = vsel %vm362_vm9, %v4192_v0, 0.0  ;;  %v5970_v37 = vld [vmem:[#allocation12_spill] sm:$0xff] }
 0x178   : > { %v1701_v62 = vmul.f32 %v5963_v60, %v1629_v52  ;;  %v1702_v25 = vmul.f32 %v5963_v60, %v1600_v54  ;;  %v2824_v35 = vunpack.i.h.bf16 %v4028_v9  ;;  %v4307_v7 = vadd.f32 %v5964_v12, %v2017_v46  ;;  %v5972_v46 = vld [vmem:[#allocation38_spill] sm:$0xff] }
 0x179   : > { %v4310_v59 = vadd.f32 %v5964_v12, %v2018_v56  ;;  %v2011_v23 = vadd.f32 %v1987_v40, %v1819_v33  ;;  %v2012_v57 = vadd.f32 %v1988_v44, %v1820_v32  ;;  %v1991_v19 = vmul.f32 %v5965_v17, %v1889_v15  ;;  %v2843_v12 = vpop.permute.xlu1 %2842 }
 0x17a   : > { %v1823_v34 = vadd.f32 %v5966_v41, %v1727_v39  ;;  %v1900_v0 = vsel %vm817_vm8, %v2829_v20, %v2824_v35  ;;  %v1824_v45 = vadd.f32 %v5967_v63, %v1728_v49  ;;  %v1725_v21 = vadd.f32 %v1701_v62, %v1432_v55  ;;  %v5979_v63 = vld [vmem:[#allocation19_spill] sm:$0xff] }
 0x17b   : > { %v1726_v43 = vadd.f32 %v1702_v25, %v1433_v18  ;;  %v1992_v9 = vmul.f32 %v5965_v17, %v1920_v14  ;;  %v1797_v53 = vmul.f32 %v5969_v50, %v5968_v16  ;;  %v1798_v29 = vmul.f32 %v5969_v50, %v5970_v37  ;;  %v5974_v18 = vld [vmem:[#allocation56_spill] sm:$0xff] }
 0x17c   : > { %v1888_v6 = vsel %vm817_vm8, %v2824_v35, %v2829_v20  ;;  %v2149_v28 = vmul.f32 %v4307_v7, %v4307_v7  ;;  %v2150_v3 = vmul.f32 %v4310_v59, %v4310_v59  ;;  %v4329_v48 = vadd.f32 %v5971_v27, %v2011_v23  ;;  %v4367_v35 = vld [vmem:[%s5717_s1 + $0x10] sm:$0xff] }
 0x17d   : > { %v4332_v42 = vadd.f32 %v5971_v27, %v2012_v57  ;;  %v1918_v36 = vsel %vm362_vm9, %v1900_v0, 0.0  ;;  %v2015_v54 = vadd.f32 %v1991_v19, %v1823_v34  ;;  %v2016_v52 = vadd.f32 %v1992_v9, %v1824_v45  ;;  %v5976_v19 = vld [vmem:[#allocation21_spill] sm:$0xff]  ;;  %v2853_v27 = vpop.permute.xlu1 %2852 }
 0x17e   : > { %v1821_v51 = vadd.f32 %v1797_v53, %v1725_v21  ;;  %v1822_v40 = vadd.f32 %v1798_v29, %v1726_v43  ;;  %v1989_v56 = vmul.f32 %v5972_v46, %v1888_v6  ;;  %v1990_v44 = vmul.f32 %v5972_v46, %v1918_v36  ;;  %v4388_v21 = vld [vmem:[%s5717_s1 + $0x18] sm:$0xff]  ;;  %v5981_v29 = vld [vmem:[#allocation22_spill] sm:$0xff] }
 0x17f   : > { %v2160_v38 = vadd.f32 %v2150_v3, %v2149_v28  ;;  %v2143_v8 = vmul.f32 %v4329_v48, %v4329_v48  ;;  %v2144_v15 = vmul.f32 %v4332_v42, %v4332_v42  ;;  %v4343_v33 = vadd.f32 %v5973_v26, %v2015_v54 }
 0x180   : > { %v4346_v61 = vadd.f32 %v5973_v26, %v2016_v52  ;;  %v2013_v39 = vadd.f32 %v1989_v56, %v1821_v51  ;;  %v2014_v11 = vadd.f32 %v1990_v44, %v1822_v40  ;;  %v5975_v23 = vmov 1   ;;  %v5984_v40 = vld [vmem:[#allocation53_spill] sm:$0xff] }
 0x181   : > { %v2151_v49 = vadd.f32 %v2144_v15, %v2143_v8  ;;  %v2147_v20 = vmul.f32 %v4343_v33, %v4343_v33  ;;  %v2845_v57 = vunpack.i.h.bf16 %v2843_v12  ;;  %v2844_v17 = vunpack.i.l.bf16 %v2843_v12 }
 0x182   : > { %2161 = vadd.xlane.f32.xlu0 %v2160_v38  ;;  %v2148_v55 = vmul.f32 %v4346_v61, %v4346_v61  ;;  %v4353_v10 = vadd.f32 %v5974_v18, %v2013_v39  ;;  %v4356_v32 = vadd.f32 %v5974_v18, %v2014_v11  ;;  %v5978_v0 = vmov 0  }
 0x183   : > { %v5980_v50 = vmov 3   ;;  %v5982_v6 = vmov 7   ;;  %v2855_v54 = vunpack.i.h.bf16 %v2853_v27  ;;  %v2854_v52 = vunpack.i.l.bf16 %v2853_v27 }
 0x184   : > { %v2157_v14 = vadd.f32 %v2148_v55, %v2147_v20  ;;  %v2145_v60 = vmul.f32 %v4353_v10, %v4353_v10  ;;  %v2146_v62 = vmul.f32 %v4356_v32, %v4356_v32  ;;  %v5983_v51 = vmov 6   ;;  %v2863_v20 = vpop.permute.xlu1 %2862  ;;  %v5988_v55 = vld [vmem:[#allocation23_spill] sm:$0xff] }
 0x185   : > { %v2860_v46 = vunpack.i.h.bf16 %v5984_v40  ;;  %v2859_v56 = vunpack.i.l.bf16 %v5984_v40  ;;  %v5986_v39 = vmov 2   ;;  %v2865_v18 = vunpack.i.h.bf16 %v2863_v20 }
 0x186   : > { %2152 = vadd.xlane.f32.xlu0 %v2151_v49  ;;  %v2154_v25 = vadd.f32 %v2146_v62, %v2145_v60  ;;  %v5987_v49 = vmov 5  }
 0x187   : > { %v1507_v44 = vsel %vm1494_vm2, %v2859_v56, %v2854_v52  ;;  %v1508_v38 = vsel %vm1494_vm2, %v2860_v46, %v2855_v54  ;;  %v1496_v60 = vsel %vm1494_vm2, %v2855_v54, %v2860_v46  ;;  %v1495_v62 = vsel %vm1494_vm2, %v2854_v52, %v2859_v56  ;;  %v4529_v54 = vpop.permute.xlu0 %678  ;;  %v2027_v52 = vld [vmem:[%s5718_s2] sm:$0xff]  ;;  %v2028_v56 = vld [vmem:[%s5718_s2 + $0x8] sm:$0xff] }
 0x188   : > { %v4441_v15 = vsel %vm3540_vm5, %v1507_v44, 0.0  ;;  %v4445_v26 = vsel %vm3540_vm5, %v1508_v38, 0.0  ;;  %v4519_v27 = vpop.permute.xlu1 %572 }
 0x189   : > { %v2952_v11 = vpack.i.bf16 %v4445_v26, %v4441_v15 }
 0x18b   : > { %2158 = vadd.xlane.f32.xlu1 %v2157_v14  ;;  %v2864_v14 = vunpack.i.l.bf16 %v2863_v20 }
 0x18f   : > { %2155 = vadd.xlane.f32.xlu1 %v2154_v25  ;;  %v5989_v25 = vld [vmem:[#allocation54_spill] sm:$0xff] }
 0x190   : > { %v2870_v12 = vunpack.i.h.bf16 %v5989_v25 }
 0x19c   : > { %2891 = vrot.lane.b32.xlu0 %v4182_v2, %s3251_s15  ;;  %v5977_v2 = vld [vmem:[#allocation52_spill] sm:$0xff] }
 0x19d   : > { %v2850_v41 = vunpack.i.h.bf16 %v5977_v2  ;;  %v2849_v34 = vunpack.i.l.bf16 %v5977_v2  ;;  %v4480_v2 = vsel %vm3482_vm4, %v1496_v60, 0.0 }
 0x19f   : > { %v415_v45 = vsel %vm411_vm1, %v2845_v57, %v2850_v41  ;;  %v426_v53 = vsel %vm411_vm1, %v2849_v34, %v2844_v17  ;;  %v427_v37 = vsel %vm411_vm1, %v2850_v41, %v2845_v57  ;;  %v2869_v57 = vunpack.i.l.bf16 %v5989_v25 }
 0x1a0   : > { %682 = vperm.xlu0 %2871, %v4367_v35   ;;  %2886 = vrot.lane.b32.xlu1 %v4178_v58, %s3251_s15  ;;  %v414_v58 = vsel %vm411_vm1, %v2844_v17, %v2849_v34  ;;  %v4396_v9 = vsel %vm3450_vm3, %v415_v45, 0.0  ;;  %v4417_v28 = vsel %vm3444_vm0, %v426_v53, 0.0  ;;  %v4421_v3 = vsel %vm3444_vm0, %v427_v37, 0.0 }
 0x1a1   : > { %v4392_v43 = vsel %vm3450_vm3, %v414_v58, 0.0  ;;  %v2935_v36 = vpack.i.bf16 %v4421_v3, %v4417_v28  ;;  %v4484_v41 = vsel %vm3482_vm4, %v1495_v62, 0.0  ;;  %v1510_v34 = vsel %vm1494_vm2, %v2870_v12, %v2865_v18 }
 0x1a2   : > { %v2927_v16 = vpack.i.bf16 %v4396_v9, %v4392_v43  ;;  %v4493_v58 = vsel %vm3540_vm5, %v1510_v34, 0.0  ;;  %v2947_v53 = vpack.i.bf16 %v4480_v2, %v4484_v41  ;;  %v1497_v20 = vsel %vm1494_vm2, %v2864_v14, %v2869_v57 }
 0x1a3   : > { %5991 = vst [vmem:[#allocation33_spill] sm:$0xff] %v4493_v58  ;;  %v4559_v25 = vsel %vm3482_vm4, %v1497_v20, 0.0 }
 0x1a4   : > { %2897 = vset.pattern.permute.xlu0 %v5975_v23  ;;  %1159 = vperm.xlu1 %2895, %v5976_v19   ;;  %5996 = vst [vmem:[#allocation41_spill] sm:$0xff] %v4559_v25 }
 0x1a5   : > { %1063 = vperm.xlu0 %2897, %v5976_v19  }
 0x1a8   : > { %2896 = vset.pattern.permute.xlu1 %v5978_v0 }
 0x1a9   : > { %2905 = vrot.lane.b32.xlu0 %v5979_v63, %s3254_s16  ;;  %577 = vperm.xlu1 %2896, %v4367_v35  }
 0x1ad   : > { %2918 = vrot.lane.b32.xlu0 %v5979_v63, %s3251_s15  ;;  %582 = vperm.xlu1 %2896, %v4388_v21   ;;  %v1509_v63 = vsel %vm1494_vm2, %v2869_v57, %v2864_v14 }
 0x1ae   : > { %v4497_v45 = vsel %vm3540_vm5, %v1509_v63, 0.0 }
 0x1af   : > { %5992 = vst [vmem:[#allocation34_spill] sm:$0xff] %v4497_v45  ;;  %v3000_v37 = vpack.i.bf16 %v4493_v58, %v4497_v45 }
 0x1b1   : > { %2928 = vrot.lane.b32.xlu0 %v2927_v16, %s3254_s16  ;;  %2898 = vset.pattern.permute.xlu1 %v5980_v50 }
 0x1b2   : > { %686 = vperm.xlu1 %2898, %v4388_v21  }
 0x1b5   : > { %1075 = vperm.xlu0 %2897, %v4388_v21  }
 0x1b6   : > { %2900 = vrot.lane.b32.xlu1 %v5981_v29, %s3254_s16 }
 0x1b7   : > { %2909 = vset.pattern.permute.xlu1 %v5982_v6 }
 0x1b9   : > { %2933 = vset.pattern.permute.xlu0 %v5945_v4 }
 0x1ba   : > { %1163 = vperm.xlu0 %2933, %v5941_v5   ;;  %1351 = vperm.xlu1 %2909, %v5976_v19  }
 0x1be   : > { %2936 = vrot.lane.b32.xlu0 %v2935_v36, %s3251_s15  ;;  %2910 = vset.pattern.permute.xlu1 %v5983_v51 }
 0x1bf   : > { %879 = vperm.xlu1 %2910, %v4367_v35  }
 0x1c2   : > { %1167 = vperm.xlu0 %2933, %v4367_v35  }
 0x1c3   : > { %883 = vperm.xlu1 %2910, %v4388_v21  }
 0x1c6   : > { %2945 = vset.pattern.permute.xlu0 %v5982_v6 }
 0x1c7   : > { %1355 = vperm.xlu0 %2945, %v5941_v5   ;;  %2911 = vset.pattern.permute.xlu1 %v5986_v39 }
 0x1c8   : > { %1648 = vperm.xlu1 %2911, %v5941_v5  }
 0x1cb   : > { %2953 = vrot.lane.b32.xlu0 %v2952_v11, %s3254_s16 }
 0x1cc   : > { %2913 = vrot.lane.b32.xlu1 %v5981_v29, %s3251_s15  ;;  %v5994_v29 = vld [vmem:[#allocation20_spill] sm:$0xff] }
 0x1cd   : > { %2932 = vset.pattern.permute.xlu1 %v5975_v23 }
 0x1cf   : > { %1359 = vperm.xlu0 %2945, %v4367_v35  }
 0x1d0   : > { %2923 = vrot.lane.b32.xlu1 %v2935_v36, %s3254_s16 }
 0x1d3   : > { %2968 = vset.pattern.permute.xlu0 %v5986_v39 }
 0x1d4   : > { %1644 = vperm.xlu0 %2968, %v5976_v19   ;;  %1071 = vperm.xlu1 %2932, %v4367_v35  }
 0x1d5   : > { %v4537_v46 = vpop.permute.xlu0 %2875 }
 0x1d8   : > { %2976 = vrot.lane.b32.xlu0 %v2952_v11, %s3251_s15  ;;  %2934 = vset.pattern.permute.xlu1 %v5987_v49  ;;  %v1498_v11 = vsel %vm1494_vm2, %v2865_v18, %v2870_v12 }
 0x1d9   : > { %1740 = vperm.xlu1 %2934, %v5976_v19   ;;  %v4555_v62 = vsel %vm3482_vm4, %v1498_v11, 0.0 }
 0x1da   : > { %5995 = vst [vmem:[#allocation40_spill] sm:$0xff] %v4555_v62  ;;  %v2995_v12 = vpack.i.bf16 %v4555_v62, %v4559_v25 }
 0x1dc   : > { %1656 = vperm.xlu0 %2968, %v4388_v21  }
 0x1dd   : > { %1744 = vperm.xlu1 %2934, %v5941_v5  }
 0x1e0   : > { %2983 = vrot.lane.b32.xlu0 %v5988_v55, %s3251_s15 }
 0x1e1   : > { %2992 = vset.pattern.permute.xlu0 %v5987_v49  ;;  %2941 = vrot.lane.b32.xlu1 %v2927_v16, %s3251_s15  ;;  %v5993_v16 = vmov 8  }
 0x1e2   : > { %2946 = vset.pattern.permute.xlu1 %v5945_v4 }
 0x1e4   : > { %1748 = vperm.xlu0 %2992, %v4367_v35  }
 0x1e5   : > { %1171 = vperm.xlu1 %2946, %v4388_v21  }
 0x1e8   : > { %2993 = vset.pattern.permute.xlu0 %v5993_v16 }
 0x1e9   : > { %1936 = vperm.xlu0 %2993, %v5941_v5   ;;  %2948 = vrot.lane.b32.xlu1 %v2947_v53, %s3254_s16  ;;  %v2029_v5 = vld [vmem:[%s5718_s2 + $0x10] sm:$0xff] }
 0x1ea   : > { %2957 = vset.pattern.permute.xlu1 %v5993_v16 }
 0x1ed   : > { %3001 = vrot.lane.b32.xlu0 %v3000_v37, %s3254_s16  ;;  %1932 = vperm.xlu1 %2957, %v5976_v19   ;;  %v4522_v19 = vpop.permute.xlu1 %674 }
 0x1ee   : > { %v722_v25 = vmul.f32 %v4522_v19, %v4162_v47 }
 0x1f1   : > { %1944 = vperm.xlu0 %2993, %v4388_v21   ;;  %2959 = vrot.lane.b32.xlu1 %v5988_v55, %s3254_s16  ;;  %v4526_v36 = vpop.permute.xlu1 %871 }
 0x1f2   : > { %2969 = vset.pattern.permute.xlu1 %v5982_v6 }
 0x1f5   : > { %3016 = vset.pattern.permute.xlu0 %v5978_v0  ;;  %2964 = vrot.lane.b32.xlu1 %v5994_v29, %s3254_s16  ;;  %v4535_v40 = vpop.permute.xlu1 %875 }
 0x1f6   : > { %2051 = vperm.xlu0 %3016, %v2029_v5  }
 0x1f9   : > { %1363 = vperm.xlu1 %2969, %v4388_v21   ;;  %v4542_v38 = vpop.permute.xlu1 %2880 }
 0x1fd   : > { %2971 = vrot.lane.b32.xlu1 %v2947_v53, %s3251_s15  ;;  %v4551_v55 = vpop.permute.xlu1 %1067 }
 0x1fe   : > { %2980 = vset.pattern.permute.xlu1 %v5986_v39  ;;  %v2883_v39 = vunpack.i.h.bf16 %v4542_v38 }
 0x201   : > { %1652 = vperm.xlu1 %2980, %v4367_v35  }
 0x205   : > { %2981 = vset.pattern.permute.xlu1 %v5978_v0 }
 0x206   : > { %2041 = vperm.xlu1 %2981, %v2027_v52  }
 0x20a   : > { %2046 = vperm.xlu1 %2981, %v2028_v56  }
 0x20b   : > { %v2162_v44 = vpop.xlane.xlu0 %2161 }
 0x20c   : > { %v2182_v18 = vmax.f32 %v2162_v44, 1e-24 }
 0x20e   : > { %2988 = vrot.lane.b32.xlu1 %v5994_v29, %s3251_s15  ;;  %3205 = vrsqrt.f32 %v2182_v18 }
 0x20f   : > { %2994 = vset.pattern.permute.xlu1 %v5987_v49  ;;  %v2153_v60 = vpop.xlane.xlu0 %2152  ;;  %v2878_v49 = vunpack.i.h.bf16 %v4537_v46 }
 0x210   : > { %v2179_v57 = vmax.f32 %v2153_v60, 1e-24 }
 0x211   : > { %v514_v51 = vsel %vm512_vm6, %v2878_v49, %v2883_v39 }
 0x212   : > { %1752 = vperm.xlu1 %2994, %v4388_v21  }
 0x213   : > { %v4564_v63 = vpop.permute.xlu0 %2891 }
 0x214   : > { %v2159_v14 = vpop.xlane.xlu1 %2158  ;;  %v2894_v13 = vunpack.i.h.bf16 %v4564_v63  ;;  %v2893_v58 = vunpack.i.l.bf16 %v4564_v63 }
 0x215   : > { %v2181_v34 = vmax.f32 %v2159_v14, 1e-24 }
 0x216   : > { %2996 = vrot.lane.b32.xlu1 %v2995_v12, %s3254_s16 }
 0x217   : > { %3207 = vrsqrt.f32 %v2181_v34  ;;  %3005 = vset.pattern.permute.xlu1 %v5993_v16 }
 0x218   : > { %v2156_v53 = vpop.xlane.xlu1 %2155  ;;  %3209 = vrsqrt.f32 %v2179_v57 }
 0x219   : > { %v2180_v5 = vmax.f32 %v2156_v53, 1e-24 }
 0x21a   : > { %1940 = vperm.xlu1 %3005, %v4367_v35   ;;  %v2030_v35 = vld [vmem:[%s5718_s2 + $0x18] sm:$0xff] }
 0x21b   : > { %v4569_v21 = vpop.permute.xlu0 %682  ;;  %3211 = vrsqrt.f32 %v2180_v5  ;;  %v3206_v44 = vpop.eup %3205 }
 0x21c   : > { %v4571_v29 = vpop.permute.xlu1 %2886  ;;  %v2198_v14 = vmul.f32 %v3206_v44, %v4310_v59  ;;  %v2197_v57 = vmul.f32 %v3206_v44, %v4307_v7 }
 0x21d   : > { %v2889_v4 = vunpack.i.h.bf16 %v4571_v29 }
 0x21e   : > { %3007 = vrot.lane.b32.xlu1 %v2995_v12, %s3251_s15 }
 0x21f   : > { %3017 = vset.pattern.permute.xlu1 %v5978_v0  ;;  %v2888_v0 = vunpack.i.l.bf16 %v4571_v29  ;;  %v831_v45 = vsel %vm817_vm8, %v2894_v13, %v2889_v4  ;;  %v724_v29 = vmul.f32 %v4529_v54, %v4158_v22  ;;  %v819_v22 = vsel %vm817_vm8, %v2889_v4, %v2894_v13 }
 0x220   : > { %v4574_v52 = vpop.permute.xlu0 %1063  ;;  %v4577_v56 = vpop.permute.xlu1 %1159  ;;  %v849_v47 = vsel %vm362_vm9, %v831_v45, 0.0  ;;  %v6005_v45 = vld [vmem:[#allocation11_spill] sm:$0xff] }
 0x222   : > { %3012 = vrot.lane.b32.xlu1 %v3000_v37, %s3251_s15 }
 0x224   : > { %v3208_v11 = vpop.eup %3207  ;;  %v4583_v20 = vpop.permute.xlu1 %577 }
 0x225   : > { %5997 = vst [vmem:[#allocation4_spill] sm:$0xff] %v4583_v20  ;;  %v4585_v60 = vpop.permute.xlu0 %2905  ;;  %v2196_v18 = vmul.f32 %v3208_v11, %v4346_v61  ;;  %v2195_v12 = vmul.f32 %v3208_v11, %v4343_v33  ;;  %v3210_v34 = vpop.eup %3209 }
 0x226   : > { %2056 = vperm.xlu1 %3017, %v2030_v35   ;;  %v2192_v16 = vmul.f32 %v3210_v34, %v4332_v42  ;;  %v2191_v44 = vmul.f32 %v3210_v34, %v4329_v48 }
 0x227   : > { %v2202_v37 = vpack.c.bf16 %v2198_v14, %v2196_v18  ;;  %v2201_v53 = vpack.c.bf16 %v2197_v57, %v2195_v12 }
 0x228   : > { %v3212_v5 = vpop.eup %3211  ;;  %v4591_v17 = vpop.permute.xlu1 %582 }
 0x229   : > { %2215 = vmatprep.subr.bf16.mxu0 %v2202_v37  ;;  %v2194_v8 = vmul.f32 %v3212_v5, %v4356_v32  ;;  %v4595_v61 = vpop.permute.xlu0 %2918  ;;  %v2193_v33 = vmul.f32 %v3212_v5, %v4353_v10 }
 0x22a   : > { %2216 = vmatpush1.bf16.xpose.msra.mxu0 %v2201_v53 }
 0x22b   : > { %v2200_v59 = vpack.c.bf16 %v2194_v8, %v2192_v16  ;;  %v2199_v35 = vpack.c.bf16 %v2193_v33, %v2191_v44  ;;  %v2877_v44 = vunpack.i.l.bf16 %v4537_v46  ;;  %v526_v46 = vsel %vm512_vm6, %v2883_v39, %v2878_v49 }
 0x22c   : > { %v543_v49 = vsel %vm359_vm7, %v526_v46, 0.0  ;;  %v2908_v46 = vunpack.i.h.bf16 %v4585_v60 }
 0x22d   : > { %2217 = vmatprep.subr.bf16.mxu0 %v2200_v59  ;;  %v4598_v7 = vpop.permute.xlu1 %686  ;;  %v4601_v11 = vpop.permute.xlu0 %2928  ;;  %v627_v13 = vmul.f32 %v4519_v27, %v543_v49  ;;  %v6006_v49 = vld [vmem:[#allocation13_spill] sm:$0xff] }
 0x231   : > { %v4603_v18 = vpop.permute.xlu1 %2900  ;;  %v4607_v32 = vpop.permute.xlu0 %1075 }
 0x232   : > { %2218 = vmatpush1.bf16.xpose.msra.mxu0 %v2199_v35  ;;  %5998 = vst [vmem:[#allocation5_spill] sm:$0xff] %v4607_v32  ;;  %v2882_v35 = vunpack.i.l.bf16 %v4542_v38  ;;  %v2902_v32 = vunpack.i.l.bf16 %v4603_v18 }
 0x234   : > { %v525_v24 = vsel %vm512_vm6, %v2882_v35, %v2877_v44  ;;  %v513_v38 = vsel %vm512_vm6, %v2877_v44, %v2882_v35  ;;  %v6004_v44 = vld [vmem:[#allocation29_spill] sm:$0xff]  ;;  %v830_v35 = vsel %vm817_vm8, %v2893_v58, %v2888_v0 }
 0x235   : > { %v4605_v42 = vpop.permute.xlu1 %1351  ;;  %v4611_v8 = vpop.permute.xlu0 %1163  ;;  %v541_v50 = vsel %vm359_vm7, %v525_v24, 0.0  ;;  %v628_v24 = vmul.f32 %v4519_v27, %v514_v51  ;;  %v626_v63 = vmul.f32 %v6004_v44, %v513_v38  ;;  %v2907_v51 = vunpack.i.l.bf16 %v4585_v60 }
 0x236   : > { %v2903_v38 = vunpack.i.h.bf16 %v4603_v18  ;;  %v847_v4 = vsel %vm362_vm9, %v830_v35, 0.0  ;;  %v921_v18 = vmul.f32 %v4535_v40, %v849_v47  ;;  %v6008_v35 = vunpack.c.h.bf16 %v6006_v49 }
 0x238   : > { %v1015_v27 = vsel %vm512_vm6, %v2903_v38, %v2908_v46 }
 0x239   : > { %v4615_v16 = vpop.permute.xlu0 %2936 }
 0x23a   : > { %v4609_v14 = vpop.permute.xlu1 %879 }
 0x23b   : > { %5999 = vst [vmem:[#allocation7_spill] sm:$0xff] %v4609_v14  ;;  %v920_v14 = vmul.f32 %v4535_v40, %v819_v22  ;;  %v4709_v40 = vmul.f32 %v4569_v21, %v4417_v28  ;;  %v1207_v22 = vmul.f32 %v4577_v56, %v6008_v35  ;;  %v1014_v28 = vsel %vm512_vm6, %v2902_v32, %v2907_v51 }
 0x23d   : > { %v4621_v57 = vpop.permute.xlu0 %1167 }
 0x23e   : > { %v4613_v10 = vpop.permute.xlu1 %883 }
 0x23f   : > { %6000 = vst [vmem:[#allocation8_spill] sm:$0xff] %v4613_v10 }
 0x242   : > { %v4625_v37 = vpop.permute.xlu0 %1355 }
 0x243   : > { %v4617_v12 = vpop.permute.xlu1 %1648 }
 0x246   : > { %v4631_v59 = vpop.permute.xlu0 %2953 }
 0x247   : > { %v4619_v48 = vpop.permute.xlu1 %2913 }
 0x24a   : > { %v4639_v6 = vpop.permute.xlu0 %1359 }
 0x24b   : > { %v4623_v34 = vpop.permute.xlu1 %2923  ;;  %6002 = vst [vmem:[#allocation42_spill] sm:$0xff] %v4639_v6  ;;  %v625_v6 = vmul.f32 %v6004_v44, %v541_v50  ;;  %v721_v50 = vmul.f32 %v4522_v19, %v4168_v1  ;;  %v746_v44 = vadd.f32 %v722_v25, %v626_v63  ;;  %v919_v1 = vmul.f32 %v4526_v36, %v847_v4 }
 0x24c   : > { %v1027_v19 = vsel %vm512_vm6, %v2908_v46, %v2903_v38  ;;  %v1113_v38 = vmul.f32 %v4551_v55, %v1015_v27 }
 0x24d   : > { %v745_v60 = vadd.f32 %v721_v50, %v625_v6  ;;  %v1040_v46 = vsel %vm359_vm7, %v1027_v19, 0.0 }
 0x24f   : > { %v4627_v53 = vpop.permute.xlu1 %1071  ;;  %v4665_v39 = vpop.permute.xlu0 %1644 }
 0x250   : > { %6001 = vst [vmem:[#allocation36_spill] sm:$0xff] %v4627_v53 }
 0x253   : > { %v4696_v20 = vpop.permute.xlu0 %2976 }
 0x254   : > { %v4629_v5 = vpop.permute.xlu1 %1740 }
 0x258   : > { %v4633_v33 = vpop.permute.xlu1 %1744 }
 0x25c   : > { %v4642_v23 = vpop.permute.xlu1 %2941 }
 0x260   : > { %v4659_v62 = vpop.permute.xlu1 %1171 }
 0x261   : > { %6003 = vst [vmem:[#allocation24_spill] sm:$0xff] %v4659_v62  ;;  %v818_v62 = vsel %vm817_vm8, %v2888_v0, %v2893_v58  ;;  %v723_v0 = vmul.f32 %v4529_v54, %v6005_v45  ;;  %v748_v58 = vadd.f32 %v724_v29, %v628_v24  ;;  %v1026_v54 = vsel %vm512_vm6, %v2907_v51, %v2902_v32 }
 0x262   : > { %v918_v10 = vmul.f32 %v4526_v36, %v818_v62  ;;  %v2920_v62 = vunpack.i.l.bf16 %v4595_v61  ;;  %v2915_v36 = vunpack.i.l.bf16 %v4619_v48  ;;  %v4715_v29 = vmul.f32 %v4569_v21, %v4392_v43 }
 0x263   : > { %v747_v25 = vadd.f32 %v723_v0, %v627_v13  ;;  %v6007_v24 = vunpack.c.l.bf16 %v6006_v49  ;;  %v1038_v43 = vsel %vm359_vm7, %v1026_v54, 0.0  ;;  %v943_v21 = vadd.f32 %v919_v1, %v746_v44  ;;  %v4738_v0 = vpop.permute.xlu0 %1656  ;;  %v6009_v1 = vld [vmem:[#allocation14_spill] sm:$0xff] }
 0x264   : > { %v4684_v53 = vpop.permute.xlu1 %2948  ;;  %v942_v47 = vadd.f32 %v918_v10, %v745_v60  ;;  %v945_v13 = vadd.f32 %v921_v18, %v748_v58  ;;  %v1111_v32 = vmul.f32 %v4574_v52, %v1014_v28  ;;  %v2916_v10 = vunpack.i.h.bf16 %v4619_v48 }
 0x265   : > { %v1206_v63 = vmul.f32 %v4577_v56, %v6007_v24  ;;  %v944_v50 = vadd.f32 %v920_v14, %v747_v25  ;;  %v2950_v4 = vunpack.i.l.bf16 %v4684_v53  ;;  %v2921_v56 = vunpack.i.h.bf16 %v4595_v61 }
 0x266   : > { %v1314_v51 = vsel %vm817_vm8, %v2920_v62, %v2915_v36  ;;  %v2931_v60 = vunpack.i.h.bf16 %v4601_v11  ;;  %v1110_v14 = vmul.f32 %v4574_v52, %v1038_v43  ;;  %v1112_v58 = vmul.f32 %v4551_v55, %v1040_v46 }
 0x267   : > { %v2955_v44 = vunpack.i.l.bf16 %v4631_v59  ;;  %v2930_v18 = vunpack.i.l.bf16 %v4601_v11  ;;  %v4747_v61 = vmul.f32 %v4598_v7, %v4421_v3  ;;  %v1137_v48 = vadd.f32 %v1113_v38, %v945_v13 }
 0x268   : > { %v4705_v6 = vpop.permute.xlu1 %1932  ;;  %v6010_v27 = vunpack.c.h.bf16 %v6009_v1  ;;  %v6011_v54 = vunpack.c.l.bf16 %v6009_v1  ;;  %v1327_v55 = vsel %vm362_vm9, %v1314_v51, 0.0  ;;  %v2951_v52 = vunpack.i.h.bf16 %v4684_v53  ;;  %v4776_v51 = vpop.permute.xlu0 %2983 }
 0x269   : > { %v1607_v49 = vsel %vm512_vm6, %v2955_v44, %v2950_v4  ;;  %v1135_v3 = vadd.f32 %v1111_v32, %v943_v21  ;;  %v1303_v35 = vsel %vm817_vm8, %v2916_v10, %v2921_v56  ;;  %v1315_v28 = vsel %vm817_vm8, %v2921_v56, %v2916_v10 }
 0x26a   : > { %v1209_v19 = vmul.f32 %v4611_v8, %v6010_v27  ;;  %v1208_v25 = vmul.f32 %v4611_v8, %v6011_v54  ;;  %v1302_v8 = vsel %vm817_vm8, %v2915_v36, %v2920_v62  ;;  %v1134_v46 = vadd.f32 %v1110_v14, %v942_v47 }
 0x26b   : > { %v1136_v38 = vadd.f32 %v1112_v58, %v944_v50  ;;  %v2956_v43 = vunpack.i.h.bf16 %v4631_v59  ;;  %v1595_v53 = vsel %vm512_vm6, %v2950_v4, %v2955_v44  ;;  %v4773_v13 = vmul.f32 %v4598_v7, %v4396_v9 }
 0x26c   : > { %v4731_v45 = vpop.permute.xlu1 %2959  ;;  %v1233_v21 = vadd.f32 %v1209_v19, %v1137_v48  ;;  %v1399_v32 = vmul.f32 %v4605_v42, %v1327_v55  ;;  %v1619_v56 = vsel %vm359_vm7, %v1607_v49, 0.0  ;;  %v1329_v62 = vsel %vm362_vm9, %v1315_v28, 0.0 }
 0x26d   : > { %v1400_v59 = vmul.f32 %v4625_v37, %v1303_v35  ;;  %v1398_v36 = vmul.f32 %v4605_v42, %v1302_v8  ;;  %v1608_v47 = vsel %vm512_vm6, %v2956_v43, %v2951_v52  ;;  %v2939_v7 = vunpack.i.h.bf16 %v4615_v16 }
 0x26e   : > { %v2938_v50 = vunpack.i.l.bf16 %v4615_v16  ;;  %v1692_v4 = vmul.f32 %v4665_v39, %v1595_v53  ;;  %v1231_v10 = vadd.f32 %v1207_v22, %v1135_v3  ;;  %v1232_v14 = vadd.f32 %v1208_v25, %v1136_v38  ;;  %v4801_v3 = vpop.permute.xlu0 %1748 }
 0x26f   : > { %v1230_v58 = vadd.f32 %v1206_v63, %v1134_v46  ;;  %v2926_v44 = vunpack.i.h.bf16 %v4623_v34  ;;  %v1691_v48 = vmul.f32 %v4665_v39, %v1619_v56  ;;  %v1401_v42 = vmul.f32 %v4625_v37, %v1329_v62 }
 0x270   : > { %v4760_v24 = vpop.permute.xlu1 %2964  ;;  %v1596_v1 = vsel %vm512_vm6, %v2951_v52, %v2956_v43  ;;  %v1621_v27 = vsel %vm359_vm7, %v1608_v47, 0.0  ;;  %v1423_v19 = vadd.f32 %v1399_v32, %v1231_v10  ;;  %v1424_v55 = vadd.f32 %v1400_v59, %v1232_v14  ;;  %v6012_v10 = vld [vmem:[#allocation17_spill] sm:$0xff] }
 0x271   : > { %v1422_v54 = vadd.f32 %v1398_v36, %v1230_v58  ;;  %v2925_v49 = vunpack.i.l.bf16 %v4623_v34  ;;  %v2979_v22 = vunpack.i.h.bf16 %v4696_v20  ;;  %v2978_v25 = vunpack.i.l.bf16 %v4696_v20 }
 0x272   : > { %v1716_v35 = vadd.f32 %v1692_v4, %v1423_v19  ;;  %v528_v52 = vsel %vm512_vm6, %v2931_v60, %v2926_v44  ;;  %v1693_v28 = vmul.f32 %v4617_v12, %v1621_v27  ;;  %v1694_v8 = vmul.f32 %v4617_v12, %v1596_v1 }
 0x273   : > { %v1715_v34 = vadd.f32 %v1691_v48, %v1422_v54  ;;  %v1788_v46 = vmul.f32 %v4629_v5, %v4441_v15  ;;  %v1787_v53 = vmul.f32 %v4629_v5, %v4484_v41  ;;  %v1425_v56 = vadd.f32 %v1401_v42, %v1233_v21 }
 0x274   : > { %v4786_v9 = vpop.permute.xlu1 %1363  ;;  %v527_v41 = vsel %vm512_vm6, %v2930_v18, %v2925_v49  ;;  %v1717_v4 = vadd.f32 %v1693_v28, %v1424_v55  ;;  %v6013_v14 = vunpack.c.l.bf16 %v6012_v10  ;;  %v547_v48 = vsel %vm359_vm7, %v528_v52, 0.0 }
 0x275   : > { %v1812_v59 = vadd.f32 %v1788_v46, %v1716_v35  ;;  %v1811_v5 = vadd.f32 %v1787_v53, %v1715_v34  ;;  %v1718_v21 = vadd.f32 %v1694_v8, %v1425_v56  ;;  %v1789_v42 = vmul.f32 %v4633_v33, %v4480_v2 }
 0x276   : > { %v4836_v58 = vmul.f32 %v4621_v57, %v6013_v14  ;;  %v1790_v27 = vmul.f32 %v4633_v33, %v4445_v26  ;;  %v2943_v2 = vunpack.i.l.bf16 %v4642_v23  ;;  %v631_v33 = vmul.f32 %v4591_v17, %v547_v48 }
 0x277   : > { %v1813_v35 = vadd.f32 %v1789_v42, %v1717_v4  ;;  %v515_v28 = vsel %vm512_vm6, %v2925_v49, %v2930_v18  ;;  %v2962_v11 = vunpack.i.h.bf16 %v4731_v45  ;;  %v2961_v53 = vunpack.i.l.bf16 %v4731_v45 }
 0x278   : > { %v2972_v63 = vpop.permute.xlu1 %2971  ;;  %v1814_v52 = vadd.f32 %v1790_v27, %v1718_v21  ;;  %v820_v45 = vsel %vm817_vm8, %v2938_v50, %v2943_v2  ;;  %v6015_v4 = vunpack.c.h.bf16 %v6012_v10 }
 0x279   : > { %v2974_v39 = vunpack.i.h.bf16 %v2972_v63  ;;  %v2973_v37 = vunpack.i.l.bf16 %v2972_v63  ;;  %v545_v63 = vsel %vm359_vm7, %v527_v41, 0.0 }
 0x27a   : > { %v4887_v21 = vmul.f32 %v4621_v57, %v6015_v4 }
 0x27b   : > { %v1883_v20 = vsel %vm817_vm8, %v2973_v37, %v2978_v25  ;;  %v1895_v38 = vsel %vm817_vm8, %v2978_v25, %v2973_v37  ;;  %v1896_v43 = vsel %vm817_vm8, %v2979_v22, %v2974_v39  ;;  %v1884_v62 = vsel %vm817_vm8, %v2974_v39, %v2979_v22 }
 0x27c   : > { %v4819_v32 = vpop.permute.xlu1 %1652  ;;  %v1979_v12 = vmul.f32 %v4705_v6, %v1883_v20  ;;  %v1908_v15 = vsel %vm362_vm9, %v1895_v38, 0.0  ;;  %v1910_v36 = vsel %vm362_vm9, %v1896_v43, 0.0  ;;  %v516_v22 = vsel %vm512_vm6, %v2926_v44, %v2931_v60  ;;  %v6014_v20 = vld [vmem:[#allocation4_spill] sm:$0xff] }
 0x27d   : > { %v1980_v47 = vmul.f32 %v4705_v6, %v1908_v15  ;;  %v1937_v6 = vpop.permute.xlu0 %1936  ;;  %v2944_v25 = vunpack.i.h.bf16 %v4642_v23  ;;  %v2967_v60 = vunpack.i.h.bf16 %v4760_v24  ;;  %v2966_v44 = vunpack.i.l.bf16 %v4760_v24 }
 0x27e   : > { %v2003_v19 = vadd.f32 %v1979_v12, %v1811_v5  ;;  %v1981_v54 = vmul.f32 %v1937_v6, %v1884_v62  ;;  %v1982_v55 = vmul.f32 %v1937_v6, %v1910_v36  ;;  %v629_v38 = vmul.f32 %v6014_v20, %v545_v63 }
 0x27f   : > { %v2004_v1 = vadd.f32 %v1980_v47, %v1812_v59  ;;  %v833_v43 = vsel %vm817_vm8, %v2944_v25, %v2939_v7  ;;  %v832_v24 = vsel %vm817_vm8, %v2943_v2, %v2938_v50  ;;  %v821_v15 = vsel %vm817_vm8, %v2939_v7, %v2944_v25 }
 0x280   : > { %v2005_v34 = vadd.f32 %v1981_v54, %v1813_v35  ;;  %v2006_v46 = vadd.f32 %v1982_v55, %v1814_v52  ;;  %v1028_v62 = vsel %vm512_vm6, %v2966_v44, %v2961_v53  ;;  %v1029_v59 = vsel %vm512_vm6, %v2967_v60, %v2962_v11 }
 0x281   : > { %v2042_v39 = vpop.permute.xlu1 %2041  ;;  %v632_v16 = vmul.f32 %v4591_v17, %v516_v22  ;;  %v853_v7 = vsel %vm362_vm9, %v833_v43, 0.0  ;;  %v851_v50 = vsel %vm362_vm9, %v832_v24, 0.0  ;;  %v630_v48 = vmul.f32 %v6014_v20, %v515_v28  ;;  %v3002_v2 = vpop.permute.xlu0 %3001 }
 0x282   : > { %v2099_v37 = vadd.f32 %v2042_v39, %v2003_v19  ;;  %v2100_v26 = vadd.f32 %v2042_v39, %v2004_v1  ;;  %v1042_v42 = vsel %vm359_vm7, %v1028_v62, 0.0  ;;  %v1044_v10 = vsel %vm359_vm7, %v1029_v59, 0.0  ;;  %v6016_v1 = vld [vmem:[#allocation8_spill] sm:$0xff]  ;;  %v6017_v19 = vld [vmem:[#allocation7_spill] sm:$0xff] }
 0x283   : > { %v751_v17 = vadd.f32 %v4747_v61, %v631_v33  ;;  %v749_v6 = vadd.f32 %v4709_v40, %v629_v38  ;;  %v924_v27 = vmul.f32 %v6016_v1, %v821_v15  ;;  %v922_v54 = vmul.f32 %v6017_v19, %v820_v45  ;;  %v6018_v39 = vld [vmem:[#allocation36_spill] sm:$0xff]  ;;  %v6020_v45 = vld [vmem:[#allocation18_spill] sm:$0xff] }
 0x284   : > { %v2123_v8 = vmul.f32 %v2099_v37, %v2099_v37  ;;  %v2124_v23 = vmul.f32 %v2100_v26, %v2100_v26  ;;  %v925_v55 = vmul.f32 %v6016_v1, %v853_v7  ;;  %v923_v22 = vmul.f32 %v6017_v19, %v851_v50  ;;  %v6022_v59 = vld [vmem:[#allocation24_spill] sm:$0xff] }
 0x285   : > { %v2047_v18 = vpop.permute.xlu1 %2046  ;;  %v1016_v63 = vsel %vm512_vm6, %v2961_v53, %v2966_v44  ;;  %v1017_v25 = vsel %vm512_vm6, %v2962_v11, %v2967_v60  ;;  %v1114_v61 = vmul.f32 %v6018_v39, %v1042_v42  ;;  %v752_v33 = vadd.f32 %v4773_v13, %v632_v16  ;;  %v6024_v42 = vld [vmem:[#allocation42_spill] sm:$0xff] }
 0x286   : > { %v2101_v49 = vadd.f32 %v2047_v18, %v2005_v34  ;;  %v2102_v12 = vadd.f32 %v2047_v18, %v2006_v46  ;;  %v4870_v56 = vadd.f32 %v2124_v23, %v2123_v8  ;;  %v750_v28 = vadd.f32 %v4715_v29, %v630_v48 }
 0x287   : > { %v2986_v8 = vunpack.i.h.bf16 %v4776_v51  ;;  %v2985_v44 = vunpack.i.l.bf16 %v4776_v51  ;;  %v946_v34 = vadd.f32 %v922_v54, %v749_v6  ;;  %v948_v46 = vadd.f32 %v924_v27, %v751_v17 }
 0x288   : > { %v2125_v36 = vmul.f32 %v2101_v49, %v2101_v49  ;;  %v2126_v47 = vmul.f32 %v2102_v12, %v2102_v12  ;;  %v2188_v41 = vpack.c.bf16 %v2102_v12, %v2100_v26  ;;  %v2187_v5 = vpack.c.bf16 %v2101_v49, %v2099_v37  ;;  %v6019_v37 = vld [vmem:[#allocation5_spill] sm:$0xff] }
 0x289   : > { %v2989_v14 = vpop.permute.xlu1 %2988  ;;  %v1116_v40 = vmul.f32 %v6019_v37, %v1044_v10  ;;  %v1115_v60 = vmul.f32 %v6018_v39, %v1016_v63  ;;  %v1117_v23 = vmul.f32 %v6019_v37, %v1017_v25  ;;  %v947_v20 = vadd.f32 %v923_v22, %v750_v28 }
 0x28a   : > { %2235 = vmatprep.mubr.bf16.mxu0 %v2188_v41  ;;  %v4899_v57 = vadd.f32 %v2126_v47, %v2125_v36  ;;  %v2991_v35 = vunpack.i.h.bf16 %v2989_v14  ;;  %v2990_v52 = vunpack.i.l.bf16 %v2989_v14  ;;  %v949_v38 = vadd.f32 %v925_v55, %v752_v33 }
 0x28b   : > { %2236 = vmatmul.mubr.bf16.vlgmr.msra.gmra.mxu0 %v2187_v5  ;;  %v3004_v43 = vunpack.i.h.bf16 %v3002_v2  ;;  %v3003_v11 = vunpack.i.l.bf16 %v3002_v2  ;;  %v1138_v53 = vadd.f32 %v1114_v61, %v946_v34  ;;  %v1140_v18 = vadd.f32 %v1116_v40, %v948_v46  ;;  %v6026_v46 = vld [vmem:[#allocation40_spill] sm:$0xff] }
 0x28c   : > { %v1317_v13 = vsel %vm817_vm8, %v2991_v35, %v2986_v8  ;;  %v1316_v29 = vsel %vm817_vm8, %v2990_v52, %v2985_v44  ;;  %v1305_v51 = vsel %vm817_vm8, %v2986_v8, %v2991_v35  ;;  %v1304_v49 = vsel %vm817_vm8, %v2985_v44, %v2990_v52  ;;  %v6025_v44 = vld [vmem:[#allocation41_spill] sm:$0xff] }
 0x28d   : > { %v4913_v26 = vpop.permute.xlu1 %1752  ;;  %v6021_v62 = vunpack.c.l.bf16 %v6020_v45  ;;  %v6023_v47 = vunpack.c.h.bf16 %v6020_v45  ;;  %v1139_v5 = vadd.f32 %v1115_v60, %v947_v20  ;;  %v1141_v4 = vadd.f32 %v1117_v23, %v949_v38  ;;  %v1945_v38 = vpop.permute.xlu0 %1944 }
 0x28e   : > { %v1333_v16 = vsel %vm362_vm9, %v1317_v13, 0.0  ;;  %v1331_v7 = vsel %vm362_vm9, %v1316_v29, 0.0  ;;  %v1404_v48 = vmul.f32 %v4786_v9, %v1305_v51  ;;  %v1402_v10 = vmul.f32 %v6024_v42, %v1304_v49  ;;  %v6028_v13 = vld [vmem:[#allocation33_spill] sm:$0xff] }
 0x28f   : > { %v1212_v36 = vmul.f32 %v6022_v59, %v6021_v62  ;;  %v1213_v41 = vmul.f32 %v6022_v59, %v6023_v47  ;;  %v1234_v55 = vadd.f32 %v4836_v58, %v1138_v53  ;;  %v1405_v22 = vmul.f32 %v4786_v9, %v1333_v16  ;;  %v6027_v53 = vld [vmem:[#allocation34_spill] sm:$0xff] }
 0x290   : > { %v1403_v63 = vmul.f32 %v6024_v42, %v1331_v7  ;;  %v1235_v61 = vadd.f32 %v4887_v21, %v1139_v5  ;;  %v1791_v34 = vmul.f32 %v4801_v3, %v6025_v44  ;;  %v1793_v60 = vmul.f32 %v4913_v26, %v6026_v46  ;;  %v2164_v44 = vld [vmem:[%s5719_s3 + $0x8] sm:$0xff] }
 0x291   : > { %v2997_v24 = vpop.permute.xlu1 %2996  ;;  %v1236_v27 = vadd.f32 %v1212_v36, %v1140_v18  ;;  %v1237_v39 = vadd.f32 %v1213_v41, %v1141_v4  ;;  %v1426_v33 = vadd.f32 %v1402_v10, %v1234_v55  ;;  %v1792_v18 = vmul.f32 %v4801_v3, %v6027_v53  ;;  %v2052_v36 = vpop.permute.xlu0 %2051 }
 0x292   : > { %v2999_v12 = vunpack.i.h.bf16 %v2997_v24  ;;  %v2998_v15 = vunpack.i.l.bf16 %v2997_v24  ;;  %v1427_v28 = vadd.f32 %v1403_v63, %v1235_v61  ;;  %v1794_v29 = vmul.f32 %v4913_v26, %v6028_v13  ;;  %v2279_v13 = vld [vmem:[%s5720_s4 + $0x18] sm:$0xff] }
 0x293   : > { %v1428_v37 = vadd.f32 %v1404_v48, %v1236_v27  ;;  %v1429_v8 = vadd.f32 %v1405_v22, %v1237_v39 }
 0x294   : > { %v1610_v50 = vsel %vm512_vm6, %v3004_v43, %v2999_v12  ;;  %v1609_v14 = vsel %vm512_vm6, %v3003_v11, %v2998_v15  ;;  %v1598_v19 = vsel %vm512_vm6, %v2999_v12, %v3004_v43  ;;  %v1597_v54 = vsel %vm512_vm6, %v2998_v15, %v3003_v11 }
 0x295   : > { %v1625_v17 = vsel %vm359_vm7, %v1610_v50, 0.0  ;;  %v1623_v6 = vsel %vm359_vm7, %v1609_v14, 0.0  ;;  %v1941_v1 = vpop.permute.xlu1 %1940  ;;  %v1698_v40 = vmul.f32 %v4738_v0, %v1598_v19  ;;  %v1696_v35 = vmul.f32 %v4819_v32, %v1597_v54 }
 0x296   : > { %v1697_v25 = vmul.f32 %v4738_v0, %v1625_v17  ;;  %v1695_v2 = vmul.f32 %v4819_v32, %v1623_v6 }
 0x297   : > { %v1720_v20 = vadd.f32 %v1696_v35, %v1427_v28  ;;  %v1722_v21 = vadd.f32 %v1698_v40, %v1429_v8  ;;  %v2166_v28 = vld [vmem:[%s5719_s3 + $0x18] sm:$0xff] }
 0x298   : > { %v1719_v58 = vadd.f32 %v1695_v2, %v1426_v33  ;;  %v1721_v9 = vadd.f32 %v1697_v25, %v1428_v37 }
 0x299   : > { %v3008_v52 = vpop.permute.xlu1 %3007  ;;  %v1816_v47 = vadd.f32 %v1792_v18, %v1720_v20  ;;  %v1818_v4 = vadd.f32 %v1794_v29, %v1722_v21 }
 0x29a   : > { %v3010_v43 = vunpack.i.h.bf16 %v3008_v52  ;;  %v3009_v0 = vunpack.i.l.bf16 %v3008_v52  ;;  %v1815_v24 = vadd.f32 %v1791_v34, %v1719_v58  ;;  %v1817_v51 = vadd.f32 %v1793_v60, %v1721_v9  ;;  %v2163_v34 = vld [vmem:[%s5719_s3] sm:$0xff] }
 0x29d   : > { %v3013_v23 = vpop.permute.xlu1 %3012 }
 0x29e   : > { %v3015_v11 = vunpack.i.h.bf16 %v3013_v23  ;;  %v3014_v32 = vunpack.i.l.bf16 %v3013_v23 }
 0x2a0   : > { %v1886_v49 = vsel %vm817_vm8, %v3010_v43, %v3015_v11  ;;  %v1898_v12 = vsel %vm817_vm8, %v3015_v11, %v3010_v43  ;;  %v1885_v15 = vsel %vm817_vm8, %v3009_v0, %v3014_v32  ;;  %v1897_v45 = vsel %vm817_vm8, %v3014_v32, %v3009_v0 }
 0x2a1   : > { %v1912_v3 = vsel %vm362_vm9, %v1897_v45, 0.0  ;;  %v1983_v62 = vmul.f32 %v1941_v1, %v1885_v15  ;;  %v1914_v26 = vsel %vm362_vm9, %v1898_v12, 0.0  ;;  %v1985_v59 = vmul.f32 %v1945_v38, %v1886_v49  ;;  %v2057_v5 = vpop.permute.xlu1 %2056  ;;  %v2278_v49 = vld [vmem:[%s5720_s4 + $0x10] sm:$0xff] }
 0x2a2   : > { %v1984_v41 = vmul.f32 %v1941_v1, %v1912_v3  ;;  %v1986_v16 = vmul.f32 %v1945_v38, %v1914_v26  ;;  %v2276_v3 = vld [vmem:[%s5720_s4] sm:$0xff] }
 0x2a3   : > { %v2007_v7 = vadd.f32 %v1983_v62, %v1815_v24  ;;  %v2009_v50 = vadd.f32 %v1985_v59, %v1817_v51 }
 0x2a4   : > { %v2008_v14 = vadd.f32 %v1984_v41, %v1816_v47  ;;  %v2010_v48 = vadd.f32 %v1986_v16, %v1818_v4 }
 0x2a5   : > { %v2103_v42 = vadd.f32 %v2052_v36, %v2007_v7  ;;  %v2105_v10 = vadd.f32 %v2057_v5, %v2009_v50 }
 0x2a6   : > { %v2104_v17 = vadd.f32 %v2052_v36, %v2008_v14  ;;  %v2106_v6 = vadd.f32 %v2057_v5, %v2010_v48  ;;  %v2277_v36 = vld [vmem:[%s5720_s4 + $0x8] sm:$0xff] }
 0x2a7   : > { %v2127_v27 = vmul.f32 %v2103_v42, %v2103_v42  ;;  %v2129_v19 = vmul.f32 %v2105_v10, %v2105_v10  ;;  %v2189_v63 = vpack.c.bf16 %v2105_v10, %v2103_v42 }
 0x2a8   : > { %v2128_v54 = vmul.f32 %v2104_v17, %v2104_v17  ;;  %v2130_v55 = vmul.f32 %v2106_v6, %v2106_v6  ;;  %v2190_v22 = vpack.c.bf16 %v2106_v6, %v2104_v17 }
 0x2aa   : > { %2243 = vmatprep.mubr.bf16.mxu0 %v2190_v22  ;;  %v2140_v25 = vadd.f32 %v2130_v55, %v2129_v19  ;;  %v2137_v1 = vadd.f32 %v2128_v54, %v2127_v27 }
 0x2ab   : > { %2244 = vmatmul.mubr.bf16.gmra.mxu0 %v2189_v63 }
 0x2ac   : > { %2141 = vadd.xlane.f32.xlu1 %v2140_v25  ;;  %2138 = vadd.xlane.f32.xlu0 %v2137_v1 }
 0x2b0   : > { %2135 = vadd.xlane.f32.xlu0 %v4899_v57  ;;  %2132 = vadd.xlane.f32.xlu1 %v4870_v56  ;;  %v2165_v56 = vld [vmem:[%s5719_s3 + $0x10] sm:$0xff] }
 0x335   : > { %v2142_v2 = vpop.xlane.xlu1 %2141  ;;  %v2139_v39 = vpop.xlane.xlu0 %2138 }
 0x336   : > { %v2170_v61 = vmax.f32 %v2142_v2, 1e-24  ;;  %v2169_v37 = vmax.f32 %v2139_v39, 1e-24 }
 0x338   : > { %3213 = vrsqrt.f32 %v2170_v61 }
 0x339   : > { %3215 = vrsqrt.f32 %v2169_v37  ;;  %v2136_v40 = vpop.xlane.xlu0 %2135  ;;  %v2133_v35 = vpop.xlane.xlu1 %2132 }
 0x33a   : > { %v2168_v52 = vmax.f32 %v2136_v40, 1e-24  ;;  %v2167_v33 = vmax.f32 %v2133_v35, 1e-24 }
 0x33c   : > { %3217 = vrsqrt.f32 %v2168_v52  ;;  %v5028_v52 = vld [vmem:[%s3314_s29 + $0x50] sm:$0xff] }
 0x33d   : > { %3219 = vrsqrt.f32 %v2167_v33  ;;  %v5031_v33 = vld [vmem:[%s3314_s29 + $0x58] sm:$0xff] }
 0x345   : > { %v3214_v57 = vpop.eup %3213 }
 0x346   : > { %v3216_v58 = vpop.eup %3215  ;;  %v2178_v8 = vmul.f32 %v3214_v57, %v2166_v28  ;;  %v313_v28 = vunpack.c.h.bf16 %v5028_v52  ;;  %v5036_v57 = vld [vmem:[%s3314_s29 + $0x40] sm:$0xff] }
 0x347   : > { %v2177_v9 = vmul.f32 %v3216_v58, %v2165_v56  ;;  %v315_v56 = vunpack.c.h.bf16 %v5031_v33  ;;  %v5039_v58 = vld [vmem:[%s3314_s29 + $0x48] sm:$0xff] }
 0x348   : > { %2269 = vperm.xlu0 %3016, %v2178_v8  }
 0x349   : > { %v3218_v46 = vpop.eup %3217  ;;  %2264 = vperm.xlu1 %3017, %v2177_v9   ;;  %v5045_v8 = vpack.i.bf16 %v315_v56, %v313_v28  ;;  %v308_v9 = vunpack.c.l.bf16 %v5036_v57 }
 0x34a   : > { %v3220_v60 = vpop.eup %3219  ;;  %v2176_v23 = vmul.f32 %v3218_v46, %v2164_v44  ;;  %v310_v44 = vunpack.c.l.bf16 %v5039_v58  ;;  %v314_v46 = vunpack.c.l.bf16 %v5031_v33 }
 0x34b   : > { %v2237_v20 = vpop.f32.mrf.mxu0  ;;  %v2175_v21 = vmul.f32 %v3220_v60, %v2163_v34  ;;  %v312_v34 = vunpack.c.l.bf16 %v5028_v52 }
 0x34c   : > { %v5057_v60 = vpack.i.bf16 %v310_v44, %v308_v9 }
 0x34d   : > { %2259 = vperm.xlu1 %3017, %v2176_v23   ;;  %2254 = vperm.xlu0 %3016, %v2175_v21   ;;  %v2239_v38 = vpop.f32.mrf.mxu0  ;;  %v5063_v23 = vpack.i.bf16 %v314_v46, %v312_v34  ;;  %v311_v21 = vunpack.c.h.bf16 %v5039_v58 }
 0x34f   : > { %v2240_v43 = vpop.f32.mrf.mxu0 }
 0x351   : > { %v2242_v0 = vpop.f32.mrf.mxu0 }
 0x352   : > { %v5096_v0 = vld [vmem:[%s5717_s1 + $0x58] sm:$0xff] }
 0x36b   : > { %v2245_v11 = vpop.f32.mrf.mxu0 }
 0x36d   : > { %v2247_v32 = vpop.f32.mrf.mxu0 }
 0x36e   : > { %v6030_v32 = vmov 6  }
 0x36f   : > { %v2248_v53 = vpop.f32.mrf.mxu0 }
 0x371   : > { %v2250_v18 = vpop.f32.mrf.mxu0 }
 0x372   : > { %v2329_v18 = vld [vmem:[%s5721_s5] sm:$0xff] }
 0x373   : > { %2615 = vmatprep.mubr.msk.f32.mxu1 %vm2284_vm10, %v2329_v18 }
 0x3c3   : > { %v2270_v29 = vpop.permute.xlu0 %2269 }
 0x3c4   : > { %v2275_v24 = vmul.f32 %v2270_v29, %v2248_v53  ;;  %v2265_v51 = vpop.permute.xlu1 %2264  ;;  %v6031_v53 = vmov 0  }
 0x3c5   : > { %v2274_v12 = vmul.f32 %v2265_v51, %v2245_v11  ;;  %v6029_v11 = vmov 3  }
 0x3c6   : > { %v2283_v15 = vadd.f32 %v2279_v13, %v2275_v24 }
 0x3c7   : > { %v2282_v45 = vadd.f32 %v2278_v49, %v2274_v12 }
 0x3c8   : > { %v2255_v62 = vpop.permute.xlu0 %2254  ;;  %v2260_v26 = vpop.permute.xlu1 %2259  ;;  %v2294_v59 = vsel %vm2284_vm10, %v2283_v15, -inf }
 0x3c9   : > { %v2272_v47 = vmul.f32 %v2255_v62, %v2237_v20  ;;  %v2273_v41 = vmul.f32 %v2260_v26, %v2240_v43  ;;  %2295 = vmax.xlane.f32.xlu1 %v2294_v59  ;;  %v2291_v5 = vsel %vm2284_vm10, %v2282_v45, -inf  ;;  %v309_v20 = vunpack.c.h.bf16 %v5036_v57  ;;  %v5088_v43 = vld [vmem:[%s5717_s1 + $0x50] sm:$0xff] }
 0x3ca   : > { %2292 = vmax.xlane.f32.xlu0 %v2291_v5 }
 0x3cb   : > { %v2280_v4 = vadd.f32 %v2276_v3, %v2272_v47  ;;  %v2281_v16 = vadd.f32 %v2277_v36, %v2273_v41  ;;  %v5075_v38 = vpack.i.bf16 %v311_v21, %v309_v20 }
 0x3cd   : > { %v2285_v7 = vsel %vm2284_vm10, %v2280_v4, -inf  ;;  %v2288_v50 = vsel %vm2284_vm10, %v2281_v16, -inf }
 0x3ce   : > { %2286 = vmax.xlane.f32.xlu1 %v2285_v7  ;;  %2289 = vmax.xlane.f32.xlu0 %v2288_v50 }
 0x452   : > { %v2296_v14 = vpop.xlane.xlu1 %2295 }
 0x453   : > { %v2293_v48 = vpop.xlane.xlu0 %2292  ;;  %v2300_v42 = vsub.f32 %v2283_v15, %v2296_v14 }
 0x454   : > { %v2299_v10 = vsub.f32 %v2282_v45, %v2293_v48 }
 0x455   : > { %v2307_v17 = vmul.f32 1.442695, %v2300_v42 }
 0x456   : > { %v2305_v6 = vmul.f32 1.442695, %v2299_v10 }
 0x457   : > { %3221 = vpow2.f32 %v2307_v17  ;;  %v2290_v27 = vpop.xlane.xlu0 %2289  ;;  %v2287_v19 = vpop.xlane.xlu1 %2286 }
 0x458   : > { %3223 = vpow2.f32 %v2305_v6  ;;  %v2298_v54 = vsub.f32 %v2281_v16, %v2290_v27  ;;  %v2297_v55 = vsub.f32 %v2280_v4, %v2287_v19  ;;  %v6037_v16 = vmov 2  }
 0x45a   : > { %v2303_v22 = vmul.f32 1.442695, %v2298_v54  ;;  %v2301_v63 = vmul.f32 1.442695, %v2297_v55  ;;  %v5142_v54 = vld [vmem:[%s5717_s1 + $0x40] sm:$0xff]  ;;  %v5147_v55 = vld [vmem:[%s5717_s1 + $0x48] sm:$0xff] }
 0x45c   : > { %3225 = vpow2.f32 %v2303_v22 }
 0x45d   : > { %3227 = vpow2.f32 %v2301_v63 }
 0x464   : > { %v5011_v25 = vpop.eup %3221 }
 0x465   : > { %v5013_v1 = vpop.eup %3223  ;;  %v2318_v2 = vsel %vm2284_vm10, %v5011_v25, 0.0 }
 0x466   : > { %v2315_v39 = vsel %vm2284_vm10, %v5013_v1, 0.0  ;;  %2319 = vadd.xlane.f32.xlu0 %v2318_v2 }
 0x467   : > { %2316 = vadd.xlane.f32.xlu1 %v2315_v39  ;;  %v2330_v39 = vld [vmem:[%s5721_s5 + $0x8] sm:$0xff] }
 0x469   : > { %v5019_v61 = vpop.eup %3225 }
 0x46a   : > { %v5021_v37 = vpop.eup %3227  ;;  %v2312_v40 = vsel %vm2284_vm10, %v5019_v61, 0.0 }
 0x46b   : > { %2313 = vadd.xlane.f32.xlu0 %v2312_v40  ;;  %v2309_v35 = vsel %vm2284_vm10, %v5021_v37, 0.0 }
 0x46c   : > { %2310 = vadd.xlane.f32.xlu1 %v2309_v35 }
 0x47d   : > { %3024 = vrot.lane.b32.xlu1 %v5045_v8, %s3247_s30 }
 0x481   : > { %3029 = vrot.lane.b32.xlu1 %v5057_v60, %s3247_s30  ;;  %3019 = vrot.lane.b32.xlu0 %v5063_v23, %s3247_s30 }
 0x485   : > { %3039 = vrot.lane.b32.xlu1 %v5063_v23, %s3248_s8  ;;  %3034 = vrot.lane.b32.xlu0 %v5075_v38, %s3247_s30 }
 0x489   : > { %3049 = vrot.lane.b32.xlu1 %v5057_v60, %s3248_s8  ;;  %3044 = vrot.lane.b32.xlu0 %v5045_v8, %s3248_s8 }
 0x48d   : > { %617 = vperm.xlu1 %3017, %v5088_v43   ;;  %3054 = vrot.lane.b32.xlu0 %v5075_v38, %s3248_s8 }
 0x491   : > { %3058 = vset.pattern.permute.xlu1 %v6029_v11  ;;  %622 = vperm.xlu0 %3016, %v5096_v0  }
 0x492   : > { %714 = vperm.xlu1 %3058, %v5088_v43  }
 0x496   : > { %3059 = vset.pattern.permute.xlu1 %v6030_v32 }
 0x497   : > { %911 = vperm.xlu1 %3059, %v5088_v43  }
 0x49b   : > { %915 = vperm.xlu1 %3059, %v5096_v0  }
 0x49f   : > { %3071 = vset.pattern.permute.xlu1 %v6031_v53 }
 0x4ef   : > { %v2320_v13 = vpop.xlane.xlu0 %2319 }
 0x4f0   : > { %3229 = vrcp.f32 %v2320_v13  ;;  %v2317_v29 = vpop.xlane.xlu1 %2316  ;;  %v6034_v13 = vmov 1  }
 0x4f1   : > { %3231 = vrcp.f32 %v2317_v29 }
 0x4f4   : > { %v2314_v24 = vpop.xlane.xlu0 %2313 }
 0x4f5   : > { %3233 = vrcp.f32 %v2314_v24  ;;  %v2311_v51 = vpop.xlane.xlu1 %2310 }
 0x4f6   : > { %3235 = vrcp.f32 %v2311_v51 }
 0x4f8   : > { %v3020_v49 = vpop.permute.xlu0 %3019 }
 0x4f9   : > { %v3022_v12 = vunpack.i.h.bf16 %v3020_v49  ;;  %v3021_v15 = vunpack.i.l.bf16 %v3020_v49  ;;  %v3025_v45 = vpop.permute.xlu1 %3024 }
 0x4fa   : > { %v3027_v3 = vunpack.i.h.bf16 %v3025_v45  ;;  %v3026_v62 = vunpack.i.l.bf16 %v3025_v45 }
 0x4fc   : > { %v423_v26 = vsel %vm411_vm1, %v3022_v12, %v3027_v3  ;;  %v435_v59 = vsel %vm411_vm1, %v3027_v3, %v3022_v12  ;;  %v422_v36 = vsel %vm411_vm1, %v3021_v15, %v3026_v62  ;;  %v434_v47 = vsel %vm411_vm1, %v3026_v62, %v3021_v15  ;;  %v3035_v29 = vpop.permute.xlu0 %3034 }
 0x4fd   : > { %v3230_v41 = vpop.eup %3229  ;;  %v5119_v4 = vsel %vm3444_vm0, %v435_v59, 0.0  ;;  %v5123_v7 = vsel %vm3450_vm3, %v423_v26, 0.0  ;;  %v460_v50 = vsel %vm3444_vm0, %v434_v47, 0.0  ;;  %v461_v14 = vsel %vm3450_vm3, %v422_v36, 0.0  ;;  %v5129_v48 = vpop.permute.xlu1 %3029 }
 0x4fe   : > { %v3232_v42 = vpop.eup %3231  ;;  %v3060_v10 = vpack.i.bf16 %v5119_v4, %v460_v50  ;;  %v3065_v17 = vpack.i.bf16 %v5123_v7, %v461_v14  ;;  %v2328_v6 = vmul.f32 %v3230_v41, %v5011_v25  ;;  %v3032_v24 = vunpack.i.h.bf16 %v5129_v48 }
 0x4ff   : > { %v2327_v19 = vmul.f32 %v3232_v42, %v5013_v1  ;;  %v3031_v51 = vunpack.i.l.bf16 %v5129_v48  ;;  %v3037_v49 = vunpack.i.h.bf16 %v3035_v29  ;;  %v3036_v12 = vunpack.i.l.bf16 %v3035_v29 }
 0x500   : > { %3061 = vrot.lane.b32.xlu0 %v3060_v10, %s3254_s16  ;;  %3066 = vrot.lane.b32.xlu1 %v3065_v17, %s3254_s16  ;;  %v6035_v62 = vmov 4   ;;  %v6040_v29 = vmov 8  }
 0x501   : > { %v5136_v27 = vpop.permute.xlu1 %3039  ;;  %2607 = vmatprep.subr.mxu1 %v2328_v6  ;;  %v432_v15 = vsel %vm411_vm1, %v3036_v12, %v3031_v51  ;;  %v433_v45 = vsel %vm411_vm1, %v3037_v49, %v3032_v24  ;;  %v420_v26 = vsel %vm411_vm1, %v3031_v51, %v3036_v12  ;;  %v421_v59 = vsel %vm411_vm1, %v3032_v24, %v3037_v49 }
 0x502   : > { %v3234_v22 = vpop.eup %3233  ;;  %2608 = vmatpush3.msra.mxu1 %v2328_v6  ;;  %v5199_v3 = vsel %vm3444_vm0, %v432_v15, 0.0  ;;  %v5218_v47 = vsel %vm3450_vm3, %v420_v26, 0.0  ;;  %v5222_v41 = vsel %vm3450_vm3, %v421_v59, 0.0  ;;  %v3042_v48 = vunpack.i.h.bf16 %v5136_v27 }
 0x503   : > { %v3236_v63 = vpop.eup %3235  ;;  %2609 = vmatprep.subr.mxu1 %v2327_v19  ;;  %v2326_v25 = vmul.f32 %v3234_v22, %v5019_v61  ;;  %v2331_v61 = vld [vmem:[%s5721_s5 + $0x10] sm:$0xff]  ;;  %v3092_v5 = vpack.i.bf16 %v5222_v41, %v5218_v47  ;;  %v3041_v42 = vunpack.i.l.bf16 %v5136_v27  ;;  %v6038_v6 = vmov 5  }
 0x504   : > { %607 = vperm.xlu0 %3016, %v5142_v54   ;;  %612 = vperm.xlu1 %3071, %v5147_v55   ;;  %v2325_v2 = vmul.f32 %v3236_v63, %v5021_v37  ;;  %v2332_v37 = vld [vmem:[%s5721_s5 + $0x18] sm:$0xff] }
 0x505   : > { %2610 = vmatpush3.msra.mxu1 %v2327_v19  ;;  %v5152_v1 = vpop.permute.xlu1 %3049 }
 0x506   : > { %2611 = vmatprep.subr.mxu1 %v2326_v25 }
 0x507   : > { %2612 = vmatpush3.msra.mxu1 %v2326_v25  ;;  %v3052_v25 = vunpack.i.h.bf16 %v5152_v1 }
 0x508   : > { %2613 = vmatprep.subr.mxu1 %v2325_v2  ;;  %3070 = vset.pattern.permute.xlu0 %v6029_v11 }
 0x509   : > { %3072 = vset.pattern.permute.xlu1 %v6029_v11  ;;  %v5160_v40 = vpop.permute.xlu1 %617  ;;  %2614 = vmatpush3.msra.mxu1 %v2325_v2  ;;  %v3051_v2 = vunpack.i.l.bf16 %v5152_v1 }
 0x50a   : > { %718 = vperm.xlu0 %3070, %v5096_v0   ;;  %706 = vperm.xlu1 %3072, %v5142_v54  }
 0x50b   : > { %2616 = vmatmul.mubr.msk.f32.vlgmr.msra.gmra.mxu1 %vm2284_vm10, %v2330_v39 }
 0x50c   : > { %2618 = vmatprep.mubr.msk.f32.mxu1 %vm2284_vm10, %v2331_v61 }
 0x50d   : > { %v715_v35 = vpop.permute.xlu1 %714 }
 0x50e   : > { %v5172_v11 = vmul.f32 %v715_v35, %v460_v50  ;;  %v5174_v18 = vmul.f32 %v715_v35, %v461_v14  ;;  %710 = vperm.xlu0 %3070, %v5147_v55   ;;  %3073 = vset.pattern.permute.xlu1 %v6034_v13  ;;  %v6036_v50 = vmov 7   ;;  %v3045_v14 = vpop.permute.xlu0 %3044 }
 0x50f   : > { %2619 = vmatmul.mubr.msk.f32.gmra.mxu1 %vm2284_vm10, %v2332_v37  ;;  %1103 = vperm.xlu1 %3073, %v5088_v43  }
 0x510   : > { %2498 = vmatprep.mubr.bf16.mxu1 %v6031_v53 }
 0x512   : > { %3075 = vrot.lane.b32.xlu0 %v3060_v10, %s3251_s15  ;;  %v3047_v10 = vunpack.i.h.bf16 %v3045_v14  ;;  %v3055_v63 = vpop.permute.xlu0 %3054 }
 0x513   : > { %3084 = vset.pattern.permute.xlu0 %v6030_v32  ;;  %1107 = vperm.xlu1 %3073, %v5096_v0   ;;  %v3057_v27 = vunpack.i.h.bf16 %v3055_v63  ;;  %v3056_v39 = vunpack.i.l.bf16 %v3055_v63 }
 0x514   : > { %v1518_v22 = vsel %vm1494_vm2, %v3047_v10, %v3042_v48  ;;  %v1506_v26 = vsel %vm1494_vm2, %v3042_v48, %v3047_v10  ;;  %v2437_v48 = vld [vmem:[%s5722_s6 + $0x8] sm:$0xff]  ;;  %v5344_v10 = vpop.permute.xlu1 %911 }
 0x515   : > { %v5266_v35 = vsel %vm3540_vm5, %v1518_v22, 0.0  ;;  %v1516_v1 = vsel %vm1494_vm2, %v3057_v27, %v3052_v25  ;;  %v1504_v12 = vsel %vm1494_vm2, %v3052_v25, %v3057_v27 }
 0x516   : > { %903 = vperm.xlu0 %3084, %v5142_v54   ;;  %v5284_v49 = vsel %vm3540_vm5, %v1516_v1, 0.0 }
 0x517   : > { %3080 = vrot.lane.b32.xlu1 %v3065_v17, %s3251_s15  ;;  %v3046_v17 = vunpack.i.l.bf16 %v3045_v14  ;;  %v2035_v14 = vld [vmem:[%s5718_s2 + $0x40] sm:$0xff] }
 0x518   : > { %3085 = vset.pattern.permute.xlu1 %v6030_v32  ;;  %v5203_v32 = vsel %vm3444_vm0, %v433_v45, 0.0  ;;  %v5308_v45 = vsel %vm3482_vm4, %v1504_v12, 0.0 }
 0x519   : > { %v3087_v36 = vpack.i.bf16 %v5203_v32, %v5199_v3  ;;  %v1517_v19 = vsel %vm1494_vm2, %v3046_v17, %v3041_v42 }
 0x51a   : > { %3098 = vrot.lane.b32.xlu0 %v5063_v23, %s3254_s16  ;;  %v5262_v37 = vsel %vm3540_vm5, %v1517_v19, 0.0  ;;  %v623_v19 = vpop.permute.xlu0 %622 }
 0x51b   : > { %3107 = vset.pattern.permute.xlu0 %v6034_v13  ;;  %907 = vperm.xlu1 %3085, %v5147_v55   ;;  %v3177_v24 = vpack.i.bf16 %v5266_v35, %v5262_v37 }
 0x51e   : > { %1095 = vperm.xlu0 %3107, %v5142_v54  }
 0x51f   : > { %3086 = vset.pattern.permute.xlu1 %v6035_v62 }
 0x520   : > { %1199 = vperm.xlu1 %3086, %v5088_v43  }
 0x522   : > { %3108 = vset.pattern.permute.xlu0 %v6035_v62 }
 0x523   : > { %1203 = vperm.xlu0 %3108, %v5096_v0  }
 0x524   : > { %3088 = vrot.lane.b32.xlu1 %v3087_v36, %s3254_s16 }
 0x525   : > { %3109 = vset.pattern.permute.xlu1 %v6034_v13  ;;  %v1515_v13 = vsel %vm1494_vm2, %v3056_v39, %v3051_v2 }
 0x526   : > { %v5280_v51 = vsel %vm3540_vm5, %v1515_v13, 0.0 }
 0x527   : > { %1191 = vperm.xlu0 %3108, %v5142_v54  }
 0x528   : > { %3093 = vrot.lane.b32.xlu1 %v3092_v5, %s3254_s16 }
 0x52b   : > { %3121 = vset.pattern.permute.xlu0 %v6036_v50 }
 0x52c   : > { %1395 = vperm.xlu0 %3121, %v5096_v0   ;;  %3103 = vrot.lane.b32.xlu1 %v5045_v8, %s3254_s16 }
 0x530   : > { %3135 = vrot.lane.b32.xlu0 %v5057_v60, %s3254_s16  ;;  %1099 = vperm.xlu1 %3109, %v5147_v55  }
 0x534   : > { %1383 = vperm.xlu0 %3121, %v5142_v54   ;;  %3110 = vset.pattern.permute.xlu1 %v6036_v50 }
 0x535   : > { %1391 = vperm.xlu1 %3110, %v5088_v43  }
 0x538   : > { %3144 = vset.pattern.permute.xlu0 %v6037_v16 }
 0x539   : > { %1688 = vperm.xlu0 %3144, %v5096_v0   ;;  %3112 = vrot.lane.b32.xlu1 %v3087_v36, %s3251_s15 }
 0x53a   : > { %3122 = vset.pattern.permute.xlu1 %v6035_v62  ;;  %v1505_v62 = vsel %vm1494_vm2, %v3041_v42, %v3046_v17  ;;  %v2439_v42 = vld [vmem:[%s5722_s6 + $0x18] sm:$0xff]  ;;  %v5348_v17 = vpop.permute.xlu1 %915 }
 0x53b   : > { %v5320_v36 = vsel %vm3482_vm4, %v1505_v62, 0.0 }
 0x53d   : > { %1676 = vperm.xlu0 %3144, %v5142_v54   ;;  %3117 = vrot.lane.b32.xlu1 %v3092_v5, %s3251_s15  ;;  %v5324_v5 = vsel %vm3482_vm4, %v1506_v26, 0.0 }
 0x541   : > { %3157 = vset.pattern.permute.xlu0 %v6038_v6  ;;  %1195 = vperm.xlu1 %3122, %v5147_v55  }
 0x542   : > { %1784 = vperm.xlu0 %3157, %v5096_v0  }
 0x545   : > { %3123 = vset.pattern.permute.xlu1 %v6037_v16 }
 0x546   : > { %1772 = vperm.xlu0 %3157, %v5142_v54   ;;  %1684 = vperm.xlu1 %3123, %v5088_v43  }
 0x54a   : > { %3170 = vset.pattern.permute.xlu0 %v6040_v29  ;;  %3125 = vrot.lane.b32.xlu1 %v5063_v23, %s3251_s15  ;;  %v5292_v23 = vpack.i.bf16 %v5284_v49, %v5280_v51 }
 0x54b   : > { %1976 = vperm.xlu0 %3170, %v5096_v0   ;;  %3145 = vset.pattern.permute.xlu1 %v6036_v50  ;;  %v1503_v0 = vsel %vm1494_vm2, %v3051_v2, %v3056_v39  ;;  %v3147_v50 = vpack.i.bf16 %v5324_v5, %v5320_v36 }
 0x54e   : > { %3130 = vrot.lane.b32.xlu1 %v5045_v8, %s3251_s15  ;;  %v5304_v8 = vsel %vm3482_vm4, %v1503_v0, 0.0 }
 0x54f   : > { %3178 = vrot.lane.b32.xlu0 %v3177_v24, %s3251_s15  ;;  %v3194_v59 = vpack.i.bf16 %v5308_v45, %v5304_v8 }
 0x552   : > { %3140 = vrot.lane.b32.xlu1 %v5075_v38, %s3254_s16 }
 0x553   : > { %3188 = vrot.lane.b32.xlu0 %v5292_v23, %s3254_s16 }
 0x556   : > { %1387 = vperm.xlu1 %3145, %v5147_v55  }
 0x557   : > { %1968 = vperm.xlu0 %3170, %v5147_v55  }
 0x55a   : > { %3146 = vset.pattern.permute.xlu1 %v6038_v6 }
 0x55b   : > { %3195 = vrot.lane.b32.xlu0 %v3194_v59, %s3251_s15  ;;  %1780 = vperm.xlu1 %3146, %v5088_v43  }
 0x55c   : > { %3204 = vset.pattern.permute.xlu0 %v6031_v53 }
 0x55f   : > { %2081 = vperm.xlu0 %3204, %v2035_v14   ;;  %3148 = vrot.lane.b32.xlu1 %v3147_v50, %s3254_s16 }
 0x560   : > { %3158 = vset.pattern.permute.xlu1 %v6037_v16 }
 0x563   : > { %2447 = vperm.xlu0 %3204, %v2437_v48   ;;  %3153 = vrot.lane.b32.xlu1 %v3177_v24, %s3254_s16 }
 0x567   : > { %2457 = vperm.xlu0 %3204, %v2439_v42   ;;  %1680 = vperm.xlu1 %3158, %v5147_v55  }
 0x56b   : > { %3159 = vset.pattern.permute.xlu1 %v6040_v29 }
 0x56c   : > { %1972 = vperm.xlu1 %3159, %v5088_v43  }
 0x570   : > { %3161 = vrot.lane.b32.xlu1 %v5057_v60, %s3251_s15 }
 0x571   : > { %3171 = vset.pattern.permute.xlu1 %v6038_v6 }
 0x572   : > { %v3062_v16 = vpop.permute.xlu0 %3061  ;;  %v3067_v22 = vpop.permute.xlu1 %3066 }
 0x573   : > { %v3064_v63 = vunpack.i.h.bf16 %v3062_v16  ;;  %v3063_v25 = vunpack.i.l.bf16 %v3062_v16  ;;  %v3069_v2 = vunpack.i.h.bf16 %v3067_v22  ;;  %v3068_v27 = vunpack.i.l.bf16 %v3067_v22 }
 0x574   : > { %3166 = vrot.lane.b32.xlu1 %v5075_v38, %s3251_s15 }
 0x575   : > { %v524_v39 = vsel %vm512_vm6, %v3064_v63, %v3069_v2  ;;  %v536_v61 = vsel %vm512_vm6, %v3069_v2, %v3064_v63  ;;  %v523_v43 = vsel %vm512_vm6, %v3063_v25, %v3068_v27  ;;  %v535_v60 = vsel %vm512_vm6, %v3068_v27, %v3063_v25 }
 0x576   : > { %v561_v6 = vsel %vm359_vm7, %v535_v60, 0.0  ;;  %v646_v13 = vmul.f32 %v5160_v40, %v523_v43  ;;  %v563_v1 = vsel %vm359_vm7, %v536_v61, 0.0  ;;  %v648_v24 = vmul.f32 %v623_v19, %v524_v39 }
 0x577   : > { %v645_v0 = vmul.f32 %v5160_v40, %v561_v6  ;;  %v647_v12 = vmul.f32 %v623_v19, %v563_v1  ;;  %v2036_v19 = vld [vmem:[%s5718_s2 + $0x48] sm:$0xff] }
 0x578   : > { %v766_v15 = vadd.f32 %v5174_v18, %v646_v13  ;;  %1776 = vperm.xlu1 %3171, %v5147_v55   ;;  %v2436_v13 = vld [vmem:[%s5722_s6] sm:$0xff] }
 0x579   : > { %v765_v62 = vadd.f32 %v5172_v11, %v645_v0  ;;  %v2037_v11 = vld [vmem:[%s5718_s2 + $0x50] sm:$0xff] }
 0x57c   : > { %3173 = vrot.lane.b32.xlu1 %v3147_v50, %s3251_s15 }
 0x57d   : > { %3192 = vset.pattern.permute.xlu1 %v6040_v29  ;;  %v2038_v29 = vld [vmem:[%s5718_s2 + $0x58] sm:$0xff] }
 0x57f   : > { %v5375_v38 = vpop.permute.xlu0 %607  ;;  %v5377_v26 = vpop.permute.xlu1 %612 }
 0x580   : > { %3183 = vrot.lane.b32.xlu1 %v3194_v59, %s3254_s16 }
 0x584   : > { %1964 = vperm.xlu1 %3192, %v5142_v54  }
 0x585   : > { %v719_v40 = vpop.permute.xlu0 %718  ;;  %v707_v14 = vpop.permute.xlu1 %706 }
 0x586   : > { %v743_v54 = vmul.f32 %v719_v40, %v5119_v4  ;;  %v744_v48 = vmul.f32 %v719_v40, %v5123_v7 }
 0x588   : > { %3193 = vset.pattern.permute.xlu1 %v6031_v53  ;;  %v767_v2 = vadd.f32 %v743_v54, %v647_v12  ;;  %v768_v1 = vadd.f32 %v744_v48, %v648_v24 }
 0x589   : > { %2091 = vperm.xlu1 %3193, %v2037_v11   ;;  %v5385_v55 = vpop.permute.xlu0 %710 }
 0x58a   : > { %v5387_v18 = vpop.permute.xlu1 %1103  ;;  %v740_v52 = vmul.f32 %v5385_v55, %v5222_v41 }
 0x58d   : > { %2096 = vperm.xlu1 %3193, %v2038_v29   ;;  %v3076_v50 = vpop.permute.xlu0 %3075 }
 0x58e   : > { %v5392_v59 = vpop.permute.xlu1 %1107  ;;  %v3078_v16 = vunpack.i.h.bf16 %v3076_v50  ;;  %v3077_v22 = vunpack.i.l.bf16 %v3076_v50  ;;  %v2438_v50 = vld [vmem:[%s5722_s6 + $0x10] sm:$0xff] }
 0x591   : > { %3200 = vrot.lane.b32.xlu1 %v5292_v23, %s3251_s15 }
 0x592   : > { %v3081_v42 = vpop.permute.xlu1 %3080 }
 0x593   : > { %v3083_v63 = vunpack.i.h.bf16 %v3081_v42  ;;  %v3082_v25 = vunpack.i.l.bf16 %v3081_v42 }
 0x595   : > { %v829_v27 = vsel %vm817_vm8, %v3078_v16, %v3083_v63  ;;  %v841_v4 = vsel %vm817_vm8, %v3083_v63, %v3078_v16  ;;  %v828_v23 = vsel %vm817_vm8, %v3077_v22, %v3082_v25  ;;  %v840_v7 = vsel %vm817_vm8, %v3082_v25, %v3077_v22  ;;  %2086 = vperm.xlu1 %3193, %v2036_v19   ;;  %v5425_v19 = vpop.permute.xlu0 %903 }
 0x596   : > { %v869_v39 = vsel %vm362_vm9, %v841_v4, 0.0  ;;  %v940_v61 = vmul.f32 %v5348_v17, %v829_v27  ;;  %v867_v43 = vsel %vm362_vm9, %v840_v7, 0.0  ;;  %v938_v60 = vmul.f32 %v5344_v10, %v828_v23  ;;  %v5415_v6 = vpop.permute.xlu1 %907 }
 0x597   : > { %v941_v0 = vmul.f32 %v5348_v17, %v869_v39  ;;  %v939_v12 = vmul.f32 %v5344_v10, %v867_v43 }
 0x598   : > { %v962_v40 = vadd.f32 %v938_v60, %v765_v62  ;;  %v964_v11 = vadd.f32 %v940_v61, %v767_v2  ;;  %v737_v62 = vmul.f32 %v707_v14, %v5199_v3 }
 0x599   : > { %v963_v29 = vadd.f32 %v939_v12, %v766_v15  ;;  %v965_v54 = vadd.f32 %v941_v0, %v768_v1  ;;  %2442 = vperm.xlu1 %3193, %v2436_v13   ;;  %v3099_v24 = vpop.permute.xlu0 %3098  ;;  %v738_v15 = vmul.f32 %v707_v14, %v5218_v47 }
 0x59a   : > { %v3101_v25 = vunpack.i.h.bf16 %v3099_v24  ;;  %v3100_v2 = vunpack.i.l.bf16 %v3099_v24 }
 0x59b   : > { %v1200_v42 = vpop.permute.xlu1 %1199 }
 0x59d   : > { %2452 = vperm.xlu1 %3193, %v2438_v50  }
 0x59f   : > { %v3089_v16 = vpop.permute.xlu1 %3088 }
 0x5a0   : > { %v3091_v48 = vunpack.i.h.bf16 %v3089_v16  ;;  %v3090_v17 = vunpack.i.l.bf16 %v3089_v16 }
 0x5a3   : > { %v3094_v22 = vpop.permute.xlu1 %3093 }
 0x5a4   : > { %v3096_v63 = vunpack.i.h.bf16 %v3094_v22  ;;  %v3095_v10 = vunpack.i.l.bf16 %v3094_v22 }
 0x5a6   : > { %v521_v27 = vsel %vm512_vm6, %v3090_v17, %v3095_v10  ;;  %v522_v4 = vsel %vm512_vm6, %v3091_v48, %v3096_v63  ;;  %v533_v23 = vsel %vm512_vm6, %v3095_v10, %v3090_v17  ;;  %v534_v7 = vsel %vm512_vm6, %v3096_v63, %v3091_v48 }
 0x5a7   : > { %v557_v39 = vsel %vm359_vm7, %v533_v23, 0.0  ;;  %v559_v3 = vsel %vm359_vm7, %v534_v7, 0.0  ;;  %v642_v47 = vmul.f32 %v5375_v38, %v521_v27  ;;  %v644_v14 = vmul.f32 %v5377_v26, %v522_v4  ;;  %v3104_v61 = vpop.permute.xlu1 %3103  ;;  %v5471_v23 = vpop.permute.xlu0 %1095 }
 0x5a8   : > { %v641_v43 = vmul.f32 %v5375_v38, %v557_v39  ;;  %v643_v60 = vmul.f32 %v5377_v26, %v559_v3  ;;  %v3106_v13 = vunpack.i.h.bf16 %v3104_v61  ;;  %v3105_v1 = vunpack.i.l.bf16 %v3104_v61 }
 0x5a9   : > { %v762_v0 = vadd.f32 %v738_v15, %v642_v47 }
 0x5aa   : > { %v761_v12 = vadd.f32 %v737_v62, %v641_v43  ;;  %v1025_v50 = vsel %vm512_vm6, %v3101_v25, %v3106_v13  ;;  %v1037_v16 = vsel %vm512_vm6, %v3106_v13, %v3101_v25  ;;  %v1024_v38 = vsel %vm512_vm6, %v3100_v2, %v3105_v1 }
 0x5ab   : > { %v1060_v22 = vsel %vm359_vm7, %v1037_v16, 0.0  ;;  %v1133_v24 = vmul.f32 %v5392_v59, %v1025_v50  ;;  %v1036_v26 = vsel %vm512_vm6, %v3105_v1, %v3100_v2  ;;  %v5456_v48 = vpop.permute.xlu1 %1099  ;;  %v1131_v10 = vmul.f32 %v5387_v18, %v1024_v38  ;;  %v5473_v61 = vpop.permute.xlu0 %1203 }
 0x5ac   : > { %v1132_v17 = vmul.f32 %v5392_v59, %v1060_v22  ;;  %v1058_v63 = vsel %vm359_vm7, %v1036_v26, 0.0  ;;  %v1227_v25 = vmul.f32 %v1200_v42, %v313_v28  ;;  %v1226_v2 = vmul.f32 %v1200_v42, %v312_v34 }
 0x5ad   : > { %v1130_v62 = vmul.f32 %v5387_v18, %v1058_v63  ;;  %v5463_v15 = vadd.f32 %v1133_v24, %v965_v54  ;;  %v1155_v27 = vadd.f32 %v1131_v10, %v963_v29  ;;  %v739_v18 = vmul.f32 %v5385_v55, %v5203_v32 }
 0x5ae   : > { %v5467_v4 = vadd.f32 %v1132_v17, %v964_v11  ;;  %v764_v22 = vadd.f32 %v740_v52, %v644_v14 }
 0x5af   : > { %v1154_v59 = vadd.f32 %v1130_v62, %v962_v40  ;;  %v1251_v7 = vadd.f32 %v1227_v25, %v1155_v27  ;;  %v763_v34 = vadd.f32 %v739_v18, %v643_v60  ;;  %v5479_v42 = vpop.permute.xlu0 %1191 }
 0x5b0   : > { %v1392_v39 = vpop.permute.xlu1 %1391  ;;  %v1222_v33 = vmul.f32 %v5479_v42, %v308_v9 }
 0x5b1   : > { %v1250_v3 = vadd.f32 %v1226_v2, %v1154_v59 }
 0x5b3   : > { %v5501_v62 = vpop.permute.xlu0 %1395 }
 0x5b4   : > { %v3113_v47 = vpop.permute.xlu1 %3112 }
 0x5b5   : > { %v3115_v28 = vunpack.i.h.bf16 %v3113_v47  ;;  %v3114_v29 = vunpack.i.l.bf16 %v3113_v47 }
 0x5b7   : > { %v3136_v2 = vpop.permute.xlu0 %3135 }
 0x5b8   : > { %v3118_v54 = vpop.permute.xlu1 %3117  ;;  %v3138_v14 = vunpack.i.h.bf16 %v3136_v2  ;;  %v3137_v58 = vunpack.i.l.bf16 %v3136_v2 }
 0x5b9   : > { %v3120_v11 = vunpack.i.h.bf16 %v3118_v54  ;;  %v3119_v43 = vunpack.i.l.bf16 %v3118_v54 }
 0x5bb   : > { %v826_v40 = vsel %vm817_vm8, %v3114_v29, %v3119_v43  ;;  %v827_v13 = vsel %vm817_vm8, %v3115_v28, %v3120_v11  ;;  %v838_v32 = vsel %vm817_vm8, %v3119_v43, %v3114_v29  ;;  %v839_v1 = vsel %vm817_vm8, %v3120_v11, %v3115_v28 }
 0x5bc   : > { %v863_v50 = vsel %vm362_vm9, %v838_v32, 0.0  ;;  %v865_v41 = vsel %vm362_vm9, %v839_v1, 0.0  ;;  %v934_v55 = vmul.f32 %v5425_v19, %v826_v40  ;;  %v936_v60 = vmul.f32 %v5415_v6, %v827_v13  ;;  %v1196_v16 = vpop.permute.xlu1 %1195 }
 0x5bd   : > { %v935_v24 = vmul.f32 %v5425_v19, %v863_v50  ;;  %v937_v38 = vmul.f32 %v5415_v6, %v865_v41 }
 0x5be   : > { %v5497_v26 = vadd.f32 %v934_v55, %v761_v12  ;;  %v960_v17 = vadd.f32 %v936_v60, %v763_v34  ;;  %v5509_v12 = vpop.permute.xlu0 %1383  ;;  %v1224_v55 = vmul.f32 %v1196_v16, %v310_v44 }
 0x5bf   : > { %v5499_v63 = vadd.f32 %v935_v24, %v762_v0  ;;  %v961_v10 = vadd.f32 %v937_v38, %v764_v22 }
 0x5c1   : > { %v5503_v25 = vpop.permute.xlu1 %1684 }
 0x5c5   : > { %v3126_v27 = vpop.permute.xlu1 %3125 }
 0x5c6   : > { %v3127_v47 = vunpack.i.l.bf16 %v3126_v27 }
 0x5c9   : > { %v3131_v59 = vpop.permute.xlu1 %3130 }
 0x5ca   : > { %v3132_v18 = vunpack.i.l.bf16 %v3131_v59 }
 0x5cc   : > { %v1312_v19 = vsel %vm817_vm8, %v3127_v47, %v3132_v18  ;;  %v1324_v6 = vsel %vm817_vm8, %v3132_v18, %v3127_v47 }
 0x5cd   : > { %v1347_v0 = vsel %vm362_vm9, %v1324_v6, 0.0  ;;  %v1418_v54 = vmul.f32 %v1392_v39, %v1312_v19  ;;  %v3141_v28 = vpop.permute.xlu1 %3140 }
 0x5ce   : > { %v1419_v29 = vmul.f32 %v1392_v39, %v1347_v0  ;;  %v3143_v11 = vunpack.i.h.bf16 %v3141_v28  ;;  %v5527_v39 = vpop.permute.xlu0 %1688  ;;  %v3142_v44 = vunpack.i.l.bf16 %v3141_v28  ;;  %v3128_v0 = vunpack.i.h.bf16 %v3126_v27 }
 0x5cf   : > { %v5513_v43 = vadd.f32 %v1418_v54, %v1250_v3  ;;  %v1225_v3 = vmul.f32 %v1196_v16, %v311_v21  ;;  %v1228_v28 = vmul.f32 %v5473_v61, %v314_v46 }
 0x5d0   : > { %v1023_v52 = vsel %vm512_vm6, %v3138_v14, %v3143_v11  ;;  %v1035_v34 = vsel %vm512_vm6, %v3143_v11, %v3138_v14  ;;  %v5525_v50 = vadd.f32 %v1419_v29, %v1251_v7  ;;  %v1034_v6 = vsel %vm512_vm6, %v3142_v44, %v3137_v58 }
 0x5d1   : > { %v1056_v40 = vsel %vm359_vm7, %v1035_v34, 0.0  ;;  %v1129_v13 = vmul.f32 %v5456_v48, %v1023_v52  ;;  %v5522_v32 = vpop.permute.xlu1 %1387  ;;  %v1022_v11 = vsel %vm512_vm6, %v3137_v58, %v3142_v44  ;;  %v1054_v2 = vsel %vm359_vm7, %v1034_v6, 0.0 }
 0x5d2   : > { %v1128_v1 = vmul.f32 %v5456_v48, %v1056_v40  ;;  %v5539_v47 = vpop.permute.xlu0 %1676 }
 0x5d3   : > { %v1153_v41 = vadd.f32 %v1129_v13, %v961_v10  ;;  %v3133_v10 = vunpack.i.h.bf16 %v3131_v59  ;;  %v1229_v59 = vmul.f32 %v5473_v61, %v315_v56 }
 0x5d4   : > { %v1152_v60 = vadd.f32 %v1128_v1, %v960_v17  ;;  %v1126_v1 = vmul.f32 %v5471_v23, %v1054_v2 }
 0x5d5   : > { %v5533_v22 = vadd.f32 %v1225_v3, %v1153_v41  ;;  %v1325_v29 = vsel %vm817_vm8, %v3133_v10, %v3128_v0  ;;  %v1313_v27 = vsel %vm817_vm8, %v3128_v0, %v3133_v10  ;;  %v1127_v3 = vmul.f32 %v5471_v23, %v1022_v11 }
 0x5d6   : > { %v5535_v24 = vpop.permute.xlu1 %1780  ;;  %v5537_v38 = vadd.f32 %v1224_v55, %v1152_v60  ;;  %v1785_v18 = vpop.permute.xlu0 %1784  ;;  %v1349_v13 = vsel %vm362_vm9, %v1325_v29, 0.0  ;;  %v1420_v56 = vmul.f32 %v5501_v62, %v1313_v27  ;;  %v1223_v55 = vmul.f32 %v5479_v42, %v309_v20 }
 0x5d7   : > { %v1253_v60 = vadd.f32 %v1229_v59, %v5463_v15  ;;  %v1252_v23 = vadd.f32 %v1228_v28, %v5467_v4  ;;  %v5588_v58 = vmul.f32 %v1785_v18, %v5266_v35  ;;  %v1421_v9 = vmul.f32 %v5501_v62, %v1349_v13 }
 0x5d8   : > { %v1150_v20 = vadd.f32 %v1126_v1, %v5497_v26  ;;  %v1151_v15 = vadd.f32 %v1127_v3, %v5499_v63 }
 0x5d9   : > { %v1444_v62 = vadd.f32 %v1420_v56, %v1252_v23  ;;  %v1445_v28 = vadd.f32 %v1421_v9, %v1253_v60 }
 0x5da   : > { %v3149_v48 = vpop.permute.xlu1 %3148  ;;  %v5543_v19 = vpop.permute.xlu0 %1772  ;;  %v5611_v59 = vadd.f32 %v1223_v55, %v1151_v15 }
 0x5db   : > { %v3151_v46 = vunpack.i.h.bf16 %v3149_v48  ;;  %v3150_v61 = vunpack.i.l.bf16 %v3149_v48 }
 0x5de   : > { %v3154_v7 = vpop.permute.xlu1 %3153  ;;  %v5547_v16 = vpop.permute.xlu0 %1976 }
 0x5df   : > { %v3156_v34 = vunpack.i.h.bf16 %v3154_v7  ;;  %v3155_v40 = vunpack.i.l.bf16 %v3154_v7  ;;  %v5584_v7 = vmul.f32 %v1785_v18, %v5324_v5 }
 0x5e1   : > { %v1617_v44 = vsel %vm512_vm6, %v3155_v40, %v3150_v61  ;;  %v1618_v57 = vsel %vm512_vm6, %v3156_v34, %v3151_v46  ;;  %v1605_v5 = vsel %vm512_vm6, %v3150_v61, %v3155_v40  ;;  %v1606_v35 = vsel %vm512_vm6, %v3151_v46, %v3156_v34 }
 0x5e2   : > { %v5541_v14 = vpop.permute.xlu1 %1680  ;;  %v3179_v52 = vpop.permute.xlu0 %3178  ;;  %v1639_v6 = vsel %vm359_vm7, %v1617_v44, 0.0  ;;  %v1641_v26 = vsel %vm359_vm7, %v1618_v57, 0.0  ;;  %v1712_v11 = vmul.f32 %v5503_v25, %v1605_v5  ;;  %v1714_v2 = vmul.f32 %v5527_v39, %v1606_v35 }
 0x5e3   : > { %v3181_v48 = vunpack.i.h.bf16 %v3179_v52  ;;  %v3180_v18 = vunpack.i.l.bf16 %v3179_v52  ;;  %v1246_v34 = vadd.f32 %v1222_v33, %v1150_v20  ;;  %v1711_v13 = vmul.f32 %v5503_v25, %v1639_v6 }
 0x5e4   : > { %v1713_v1 = vmul.f32 %v5527_v39, %v1641_v26  ;;  %v1808_v25 = vmul.f32 %v5535_v24, %v5262_v37  ;;  %v1736_v39 = vadd.f32 %v1712_v11, %v5525_v50  ;;  %v1738_v33 = vadd.f32 %v1714_v2, %v1445_v28 }
 0x5e6   : > { %v5597_v42 = vpop.permute.xlu0 %3188  ;;  %v1737_v5 = vadd.f32 %v1713_v1, %v1444_v62  ;;  %v1832_v28 = vadd.f32 %v1808_v25, %v1736_v39 }
 0x5e7   : > { %v5545_v21 = vpop.permute.xlu1 %1972  ;;  %v3191_v10 = vunpack.i.h.bf16 %v5597_v42  ;;  %v3190_v29 = vunpack.i.l.bf16 %v5597_v42  ;;  %v1735_v42 = vadd.f32 %v1711_v13, %v5513_v43 }
 0x5e8   : > { %v1833_v1 = vadd.f32 %v5584_v7, %v1737_v5 }
 0x5ea   : > { %v5657_v6 = vpop.permute.xlu0 %1968 }
 0x5eb   : > { %v5549_v17 = vpop.permute.xlu1 %3161 }
 0x5ec   : > { %v3164_v46 = vunpack.i.h.bf16 %v5549_v17  ;;  %v3163_v61 = vunpack.i.l.bf16 %v5549_v17 }
 0x5ef   : > { %v5553_v54 = vpop.permute.xlu1 %3166 }
 0x5f0   : > { %v3169_v27 = vunpack.i.h.bf16 %v5553_v54  ;;  %v3168_v52 = vunpack.i.l.bf16 %v5553_v54  ;;  %v1807_v54 = vmul.f32 %v5535_v24, %v5320_v36 }
 0x5f2   : > { %v1322_v23 = vsel %vm817_vm8, %v3168_v52, %v3163_v61  ;;  %v1323_v17 = vsel %vm817_vm8, %v3169_v27, %v3164_v46  ;;  %v1310_v20 = vsel %vm817_vm8, %v3163_v61, %v3168_v52  ;;  %v1311_v15 = vsel %vm817_vm8, %v3164_v46, %v3169_v27 }
 0x5f3   : > { %v5573_v41 = vpop.permute.xlu1 %1776  ;;  %v1343_v35 = vsel %vm362_vm9, %v1322_v23, 0.0  ;;  %v1416_v11 = vmul.f32 %v5522_v32, %v1311_v15  ;;  %v1834_v27 = vadd.f32 %v5588_v58, %v1738_v33  ;;  %v1831_v13 = vadd.f32 %v1807_v54, %v1735_v42 }
 0x5f7   : > { %v3174_v4 = vpop.permute.xlu1 %3173 }
 0x5f8   : > { %v3176_v63 = vunpack.i.h.bf16 %v3174_v4  ;;  %v3175_v0 = vunpack.i.l.bf16 %v3174_v4  ;;  %v1345_v4 = vsel %vm362_vm9, %v1323_v17, 0.0 }
 0x5fa   : > { %v1906_v55 = vsel %vm817_vm8, %v3181_v48, %v3176_v63  ;;  %v1905_v60 = vsel %vm817_vm8, %v3180_v18, %v3175_v0  ;;  %v1894_v9 = vsel %vm817_vm8, %v3176_v63, %v3181_v48  ;;  %v1893_v44 = vsel %vm817_vm8, %v3175_v0, %v3180_v18 }
 0x5fb   : > { %v3184_v40 = vpop.permute.xlu1 %3183  ;;  %v1928_v50 = vsel %vm362_vm9, %v1905_v60, 0.0  ;;  %v1930_v24 = vsel %vm362_vm9, %v1906_v55, 0.0  ;;  %v1999_v48 = vmul.f32 %v5545_v21, %v1893_v44  ;;  %v2001_v18 = vmul.f32 %v5547_v16, %v1894_v9 }
 0x5fc   : > { %v3186_v3 = vunpack.i.h.bf16 %v3184_v40  ;;  %v3185_v56 = vunpack.i.l.bf16 %v3184_v40  ;;  %v2000_v43 = vmul.f32 %v5545_v21, %v1928_v50  ;;  %v2002_v62 = vmul.f32 %v5547_v16, %v1930_v24 }
 0x5fd   : > { %v1414_v0 = vmul.f32 %v5509_v12, %v1310_v20  ;;  %v1415_v21 = vmul.f32 %v5509_v12, %v1343_v35  ;;  %v1417_v16 = vmul.f32 %v5522_v32, %v1345_v4  ;;  %v2023_v55 = vadd.f32 %v1999_v48, %v1831_v13 }
 0x5fe   : > { %v1616_v37 = vsel %vm512_vm6, %v3191_v10, %v3186_v3  ;;  %v1615_v36 = vsel %vm512_vm6, %v3190_v29, %v3185_v56  ;;  %v1604_v52 = vsel %vm512_vm6, %v3186_v3, %v3191_v10  ;;  %v1603_v40 = vsel %vm512_vm6, %v3185_v56, %v3190_v29  ;;  %v3196_v56 = vpop.permute.xlu0 %3195 }
 0x5ff   : > { %v5636_v57 = vpop.permute.xlu1 %1964  ;;  %v1637_v26 = vsel %vm359_vm7, %v1616_v37, 0.0  ;;  %v1635_v63 = vsel %vm359_vm7, %v1615_v36, 0.0  ;;  %v2024_v60 = vadd.f32 %v2000_v43, %v1832_v28  ;;  %v2025_v58 = vadd.f32 %v2001_v18, %v1833_v1 }
 0x600   : > { %v1709_v46 = vmul.f32 %v5541_v14, %v1637_v26  ;;  %v1707_v61 = vmul.f32 %v5539_v47, %v1635_v63  ;;  %v2026_v25 = vadd.f32 %v2002_v62, %v1834_v27  ;;  %v1438_v39 = vadd.f32 %v1414_v0, %v1246_v34 }
 0x601   : > { %v1440_v10 = vadd.f32 %v1416_v11, %v5537_v38  ;;  %v1710_v29 = vmul.f32 %v5541_v14, %v1604_v52  ;;  %v1708_v3 = vmul.f32 %v5539_v47, %v1603_v40  ;;  %v1439_v9 = vadd.f32 %v1415_v21, %v5611_v59  ;;  %v2617_v40 = vpop.f32.mrf.mxu1 }
 0x602   : > { %v1731_v23 = vadd.f32 %v1707_v61, %v1438_v39  ;;  %v1441_v34 = vadd.f32 %v1417_v16, %v5533_v22  ;;  %v1803_v38 = vmul.f32 %v5543_v19, %v5304_v8  ;;  %v3198_v14 = vunpack.i.h.bf16 %v3196_v56  ;;  %v2082_v30 = vpop.permute.xlu0 %2081 }
 0x603   : > { %v1733_v17 = vadd.f32 %v1709_v46, %v1440_v10  ;;  %v3197_v36 = vunpack.i.l.bf16 %v3196_v56  ;;  %v1805_v47 = vmul.f32 %v5573_v41, %v5308_v45  ;;  %v1732_v24 = vadd.f32 %v1708_v3, %v1439_v9  ;;  %v2411_v16 = vpop.f32.mrf.mxu1 }
 0x604   : > { %v2092_v2 = vpop.permute.xlu1 %2091  ;;  %v1734_v42 = vadd.f32 %v1710_v29, %v1441_v34  ;;  %v1804_v59 = vmul.f32 %v5543_v19, %v5280_v51  ;;  %v1806_v22 = vmul.f32 %v5573_v41, %v5284_v49  ;;  %v1827_v5 = vadd.f32 %v1803_v38, %v1731_v23 }
 0x605   : > { %v2119_v12 = vadd.f32 %v2092_v2, %v2023_v55  ;;  %v2120_v54 = vadd.f32 %v2092_v2, %v2024_v60  ;;  %v1829_v8 = vadd.f32 %v1805_v47, %v1733_v17  ;;  %v2620_v46 = vpop.f32.mrf.mxu1 }
 0x606   : > { %v1828_v26 = vadd.f32 %v1804_v59, %v1732_v24  ;;  %v1830_v63 = vadd.f32 %v1806_v22, %v1734_v42  ;;  %v2448_v10 = vpop.permute.xlu0 %2447 }
 0x608   : > { %v2097_v7 = vpop.permute.xlu1 %2096 }
 0x609   : > { %v2121_v32 = vadd.f32 %v2097_v7, %v2025_v58  ;;  %v2122_v33 = vadd.f32 %v2097_v7, %v2026_v25 }
 0x60a   : > { %v2458_v23 = vpop.permute.xlu0 %2457 }
 0x60b   : > { %v2434_v44 = vpack.c.bf16 %v2121_v32, %v2119_v12  ;;  %v2435_v37 = vpack.c.bf16 %v2122_v33, %v2120_v54 }
 0x60c   : > { %v3201_v50 = vpop.permute.xlu1 %3200 }
 0x60d   : > { %v3203_v20 = vunpack.i.h.bf16 %v3201_v50  ;;  %v3202_v15 = vunpack.i.l.bf16 %v3201_v50  ;;  %2478 = vmatprep.subr.bf16.mxu1 %v2435_v37 }
 0x60e   : > { %2479 = vmatpush1.bf16.msra.mxu1 %v2434_v44 }
 0x60f   : > { %v1892_v35 = vsel %vm817_vm8, %v3198_v14, %v3203_v20  ;;  %v1904_v45 = vsel %vm817_vm8, %v3203_v20, %v3198_v14  ;;  %v1891_v4 = vsel %vm817_vm8, %v3197_v36, %v3202_v15  ;;  %v1903_v48 = vsel %vm817_vm8, %v3202_v15, %v3197_v36 }
 0x610   : > { %v1924_v51 = vsel %vm362_vm9, %v1903_v48, 0.0  ;;  %v1995_v49 = vmul.f32 %v5636_v57, %v1891_v4  ;;  %v1926_v19 = vsel %vm362_vm9, %v1904_v45, 0.0  ;;  %v1997_v41 = vmul.f32 %v5657_v6, %v1892_v35  ;;  %v2087_v11 = vpop.permute.xlu1 %2086 }
 0x611   : > { %v1996_v18 = vmul.f32 %v5636_v57, %v1924_v51  ;;  %v1998_v43 = vmul.f32 %v5657_v6, %v1926_v19  ;;  %v2430_v57 = vpack.c.bf16 %v2617_v40, %v2411_v16  ;;  %v2421_v6 = vpop.f32.mrf.mxu1 }
 0x612   : > { %v2019_v62 = vadd.f32 %v1995_v49, %v1827_v5  ;;  %v2021_v0 = vadd.f32 %v1997_v41, %v1829_v8  ;;  %v2431_v61 = vpack.c.bf16 %v2620_v46, %v2421_v6 }
 0x613   : > { %v2020_v2 = vadd.f32 %v1996_v18, %v1828_v26  ;;  %v2022_v28 = vadd.f32 %v1998_v43, %v1830_v63 }
 0x614   : > { %v2115_v27 = vadd.f32 %v2082_v30, %v2019_v62  ;;  %v2117_v52 = vadd.f32 %v2087_v11, %v2021_v0  ;;  %v2443_v55 = vpop.permute.xlu1 %2442 }
 0x615   : > { %v2116_v31 = vadd.f32 %v2082_v30, %v2020_v2  ;;  %v2118_v13 = vadd.f32 %v2087_v11, %v2022_v28 }
 0x616   : > { %v2432_v1 = vpack.c.bf16 %v2117_v52, %v2115_v27 }
 0x617   : > { %v2433_v21 = vpack.c.bf16 %v2118_v13, %v2116_v31 }
 0x618   : > { %v2453_v56 = vpop.permute.xlu1 %2452 }
 0x619   : > { %2480 = vmatprep.subr.bf16.mxu1 %v2433_v21 }
 0x61a   : > { %2481 = vmatpush1.bf16.msra.mxu1 %v2432_v1 }
 0x61d   : > { %2594 = vmatmul.mubr.msk.bf16.vlgmr.msra.gmra.mxu1 %vm2284_vm10, %v2430_v57 }
 0x61e   : > { %2508 = vmatprep.mubr.bf16.mxu1 %v6031_v53 }
 0x625   : > { %2595 = vmatmul.mubr.msk.bf16.gmra.mxu1 %vm2284_vm10, %v2431_v61 }
 0x6dd   : > { %v2500_v60 = vpop.f32.mrf.mxu1 }
 0x6de   : > { %v2501_v58 = vadd.f32 %v2500_v60, %v2443_v55 }
 0x6df   : > { %v2502_v25 = vpop.f32.mrf.mxu1 }
 0x6e0   : > { %2519 = vst [vmem:[%s278_s22] sm:$0xff] %v2501_v58  ;;  %v2503_v39 = vadd.f32 %v2502_v25, %v2443_v55 }
 0x6e1   : > { %v2504_v29 = vpop.f32.mrf.mxu1 }
 0x6e2   : > { %2520 = vst [vmem:[%s278_s22 + $0x8] sm:$0xff] %v2503_v39  ;;  %v2505_v3 = vadd.f32 %v2504_v29, %v2448_v10 }
 0x6e3   : > { %v2506_v53 = vpop.f32.mrf.mxu1 }
 0x6e4   : > { %2521 = vst [vmem:[%s278_s22 + $0x10] sm:$0xff] %v2505_v3  ;;  %v2507_v7 = vadd.f32 %v2506_v53, %v2448_v10 }
 0x6e5   : > { %v2510_v12 = vpop.f32.mrf.mxu1 }
 0x6e6   : > { %2522 = vst [vmem:[%s278_s22 + $0x18] sm:$0xff] %v2507_v7  ;;  %v2511_v54 = vadd.f32 %v2510_v12, %v2453_v56 }
 0x6e7   : > { %v2512_v32 = vpop.f32.mrf.mxu1 }
 0x6e8   : > { %2523 = vst [vmem:[%s278_s22 + $0x20] sm:$0xff] %v2511_v54  ;;  %v2513_v33 = vadd.f32 %v2512_v32, %v2453_v56 }
 0x6e9   : > { %v2514_v17 = vpop.f32.mrf.mxu1 }
 0x6ea   : > { %2524 = vst [vmem:[%s278_s22 + $0x28] sm:$0xff] %v2513_v33  ;;  %v2515_v9 = vadd.f32 %v2514_v17, %v2458_v23 }
 0x6eb   : > { %v2516_v44 = vpop.f32.mrf.mxu1 }
 0x6ec   : > { %2525 = vst [vmem:[%s278_s22 + $0x30] sm:$0xff] %v2515_v9  ;;  %v2517_v37 = vadd.f32 %v2516_v44, %v2458_v23 }
 0x6ee   : > { %2526 = vst [vmem:[%s278_s22 + $0x38] sm:$0xff] %v2517_v37 }
 0x6ef PF: > { %s17_s24 = sadd.s32 1, %s3243_s24  }
 0x6f0   : > { %p14_p4 = scmp.ge.s32.totalorder %s17_s24, 4  }
 0x6f2   :  { %16 = sbr.rel (!%p14_p4) target bundleno = 1 (0x1), region = 78 }

</bundles_post_ra>
